<compile_context>
chip_gen: v7x
topology: tpu7x:2x2x1
jax: 0.10.0
libtpu: 0.0.40
codegen_flags: <defaults>
</compile_context>

<pallas_src>
import jax
import jax.numpy as jnp
from jax.experimental import pallas as pl
from jax.experimental.pallas import tpu as pltpu

_VMEM_LIMIT = 32 * 1024 * 1024     # conservative scoped-VMEM cap (fits v5e/v6e/v7x)
_MM_BUDGET = 24 * 1024 * 1024      # working-set budget used to size matmul tiles


def _round_up(x, m):
    return -(-x // m) * m


# ----------------------------- Pallas kernels ------------------------------

def _matmul_stats_kernel(a_ref, b_ref, o_ref, s_ref, q_ref, acc_ref):
    """Row-tiled matmul with a K-axis f32 accumulator.  At the last K step it
    stores the (bf16) result and emits per-row-tile channel sum / sum-of-
    squares side outputs (the BatchNorm batch statistics)."""
    @pl.when(pl.program_id(1) == 0)
    def _():
        acc_ref[...] = jnp.zeros_like(acc_ref)

    acc_ref[...] += jnp.dot(a_ref[...], b_ref[...],
                            preferred_element_type=jnp.float32)

    @pl.when(pl.program_id(1) == pl.num_programs(1) - 1)
    def _():
        acc = acc_ref[...]
        o_ref[...] = acc.astype(o_ref.dtype)
        s_ref[...] = jnp.sum(acc, axis=0)[None, None, :]
        q_ref[...] = jnp.sum(acc * acc, axis=0)[None, None, :]


def _matmul_tanh_kernel(a_ref, b_ref, o_ref, acc_ref):
    """Same tiled matmul, with Tanh fused into the epilogue (final layer)."""
    @pl.when(pl.program_id(1) == 0)
    def _():
        acc_ref[...] = jnp.zeros_like(acc_ref)

    acc_ref[...] += jnp.dot(a_ref[...], b_ref[...],
                            preferred_element_type=jnp.float32)

    @pl.when(pl.program_id(1) == pl.num_programs(1) - 1)
    def _():
        o_ref[...] = jnp.tanh(acc_ref[...]).astype(o_ref.dtype)


def _bn_relu_kernel(x_ref, s_ref, b_ref, o_ref):
    """Row-tiled BatchNorm-apply (precomputed per-column scale/shift) + ReLU."""
    x = x_ref[...].astype(jnp.float32)
    o_ref[...] = jnp.maximum(x * s_ref[...] + b_ref[...], 0.0).astype(o_ref.dtype)


# --------------------------- kernel call wrappers ---------------------------

def _pick_tk(K):
    if K <= 2048:
        return K
    for c in (2048, 1536, 1024, 768, 512, 384, 256, 128):
        if K % c == 0:
            return c
    return K


def _pick_tm(M, tk, N):
    # bf16 A/out blocks double-buffered + double-buffered weight block
    # + persistent f32 accumulator.
    for cand in (2048, 1024, 512, 256, 128, 64, 32, 16, 8):
        if M % cand:
            continue
        vmem = (2 * cand * tk + 2 * cand * N + 2 * tk * N) * 2 + cand * N * 4
        if vmem <= _MM_BUDGET:
            return cand
    return M   # tiny-M fallback (layer 1: M = batch)


def pallas_matmul(a, b, *, tanh=False, out_dtype=jnp.bfloat16):
    """C = A @ B with bf16 inputs / f32 accumulation.

    Default: returns (C, per-row-tile column sums, per-row-tile column sums of
    squares) for fused BatchNorm statistics.  With tanh=True: returns tanh(C).
    """
    M, K = a.shape
    K2, N = b.shape
    assert K == K2
    assert N % 128 == 0, "N must be lane-padded to a multiple of 128"
    a = a.astype(jnp.bfloat16)
    b = b.astype(jnp.bfloat16)

    tk = _pick_tk(K)
    tm = _pick_tm(M, tk, N)
    nmt, nkt = M // tm, K // tk

    in_specs = [
        pl.BlockSpec((tm, tk), lambda i, k: (i, k)),
        pl.BlockSpec((tk, N), lambda i, k: (k, 0)),
        # TODO(synk): keep the (K, N) weight operand single-buffered / fully
        # resident to reclaim VMEM at large ngf.
    ]
    if tanh:
        kernel = _matmul_tanh_kernel
        out_shape = jax.ShapeDtypeStruct((M, N), out_dtype)
        out_specs = pl.BlockSpec((tm, N), lambda i, k: (i, 0))
    else:
        kernel = _matmul_stats_kernel
        out_shape = [
            jax.ShapeDtypeStruct((M, N), out_dtype),
            jax.ShapeDtypeStruct((nmt, 1, N), jnp.float32),
            jax.ShapeDtypeStruct((nmt, 1, N), jnp.float32),
        ]
        out_specs = [
            pl.BlockSpec((tm, N), lambda i, k: (i, 0)),
            pl.BlockSpec((1, 1, N), lambda i, k: (i, 0, 0)),
            pl.BlockSpec((1, 1, N), lambda i, k: (i, 0, 0)),
        ]

    return pl.pallas_call(
        kernel,
        grid=(nmt, nkt),
        in_specs=in_specs,
        out_specs=out_specs,
        out_shape=out_shape,
        scratch_shapes=[pltpu.VMEM((tm, N), jnp.float32)],
        compiler_params=pltpu.CompilerParams(
            dimension_semantics=("parallel", "arbitrary"),
            vmem_limit_bytes=_VMEM_LIMIT),
    )(a, b)


def _pick_bn_rows(M, N):
    for cand in (2048, 1024, 512, 256, 128, 64, 32, 16, 8):
        if M % cand == 0 and 8 * cand * N <= 16 * 1024 * 1024:
            return cand
    return M


def pallas_bn_relu(x2d, scale_cols, shift_cols, out_dtype=jnp.bfloat16):
    """y = relu(x * scale + shift) with per-column f32 scale/shift, row-tiled."""
    M, N = x2d.shape
    tr = _pick_bn_rows(M, N)
    return pl.pallas_call(
        _bn_relu_kernel,
        grid=(M // tr,),
        in_specs=[
            pl.BlockSpec((tr, N), lambda i: (i, 0)),
            pl.BlockSpec((1, N), lambda i: (0, 0)),
            pl.BlockSpec((1, N), lambda i: (0, 0)),
        ],
        out_specs=pl.BlockSpec((tr, N), lambda i: (i, 0)),
        out_shape=jax.ShapeDtypeStruct((M, N), out_dtype),
        compiler_params=pltpu.CompilerParams(
            dimension_semantics=("parallel",),
            vmem_limit_bytes=_VMEM_LIMIT),
    )(x2d, scale_cols.reshape(1, N).astype(jnp.float32),
      shift_cols.reshape(1, N).astype(jnp.float32))


# ------------------ sub-pixel ConvTranspose2d(4, 2, 1) glue ------------------

def _pack_convT_weight(w):
    """Pack a PyTorch ConvTranspose2d(k=4,s=2,p=1) weight (Cin, Cout, 4, 4)
    into a (9*Cin, Np) matrix in sub-pixel form.

    Row index    = (window oy*3+ox) * Cin + cin   (3x3 halo window of the input)
    Column index = (parity dy*2+dx) * Cout + cout (the 4 sub-pixel outputs),
    lane-padded with zero columns up to Np = round_up(4*Cout, 128).
    """
    Cin, Cout = int(w.shape[0]), int(w.shape[1])
    wp = jnp.zeros((9, Cin, 4, Cout), jnp.float32)
    for dy in range(2):
        for dx in range(2):
            p = dy * 2 + dx
            for wy in range(2):
                for wx in range(2):
                    oy, ox = dy + wy, dx + wx
                    ky, kx = 3 - dy - 2 * wy, 3 - dx - 2 * wx
                    wp = wp.at[oy * 3 + ox, :, p, :].set(w[:, :, ky, kx])
    n_real = 4 * Cout
    n_pad = _round_up(n_real, 128)
    wp = wp.reshape(9 * Cin, n_real)
    if n_pad > n_real:
        wp = jnp.pad(wp, ((0, 0), (0, n_pad - n_real)))
    return wp.astype(jnp.bfloat16), Cout, n_pad


def _subpixel_patches(y):
    """3x3-halo im2col of the NHWC activation (sub-pixel / pixel-shuffle form).

    TODO(synk): gather these 9 shifted windows inside the conv kernel from a
    single padded-activation block (in-kernel im2col) instead of materializing
    the 9x patch matrix via XLA; kept at the JAX level because the required
    in-kernel (H, W, C) -> (H*W, C) reshape is not reliably lowered by Mosaic
    for the small, non-128-aligned channel counts of this configuration.
    """
    B, H, W, Cin = y.shape
    yp = jnp.pad(y, ((0, 0), (1, 1), (1, 1), (0, 0)))
    wins = [yp[:, oy:oy + H, ox:ox + W, :] for oy in range(3) for ox in range(3)]
    return jnp.concatenate(wins, axis=-1).reshape(B * H * W, 9 * Cin)


def _depth_to_space(x2d, B, H, W, cout):
    """(B*H*W, Np) parity-packed output -> NHWC (B, 2H, 2W, cout)."""
    x = x2d[:, : 4 * cout].reshape(B, H, W, 2, 2, cout)
    x = x.transpose(0, 1, 3, 2, 4, 5)
    return x.reshape(B, 2 * H, 2 * W, cout)


def _bn_scale_shift(total_sum, total_sq, count, gamma, beta, eps=1e-5):
    mean = total_sum / count
    var = jnp.maximum(total_sq / count - mean * mean, 0.0)
    scale = gamma * jax.lax.rsqrt(var + eps)
    shift = beta - mean * scale
    return scale, shift


# --------------------------------- params -----------------------------------

def init_params(key, nz, ngf, nc):
    ks = jax.random.split(key, 9)

    def conv_w(k, cin, cout):
        return 0.02 * jax.random.normal(k, (cin, cout, 4, 4), jnp.float32)

    return {
        "w1": conv_w(ks[0], nz, ngf * 8),
        "g1": 1.0 + 0.02 * jax.random.normal(ks[1], (ngf * 8,), jnp.float32),
        "b1": jnp.zeros((ngf * 8,), jnp.float32),
        "w2": conv_w(ks[2], ngf * 8, ngf * 4),
        "g2": 1.0 + 0.02 * jax.random.normal(ks[3], (ngf * 4,), jnp.float32),
        "b2": jnp.zeros((ngf * 4,), jnp.float32),
        "w3": conv_w(ks[4], ngf * 4, ngf * 2),
        "g3": 1.0 + 0.02 * jax.random.normal(ks[5], (ngf * 2,), jnp.float32),
        "b3": jnp.zeros((ngf * 2,), jnp.float32),
        "w4": conv_w(ks[6], ngf * 2, ngf),
        "g4": 1.0 + 0.02 * jax.random.normal(ks[7], (ngf,), jnp.float32),
        "b4": jnp.zeros((ngf,), jnp.float32),
        "w5": conv_w(ks[8], ngf, nc),
    }


# --------------------------------- forward ----------------------------------

def wgan_generator_forward(z, params):
    # Match PyTorch: z may be (B, nz) or (B, nz, 1, 1).
    if z.ndim == 4:
        z = z.reshape(z.shape[0], z.shape[1])
    B, nz = z.shape
    ngf8 = params["w1"].shape[1]

    # Layer 1: ConvTranspose2d(nz, ngf*8, 4, 1, 0) on a 1x1 input == matmul.
    w1 = params["w1"].reshape(nz, ngf8 * 16)           # columns = (cout, ky, kx)
    y, s, q = pallas_matmul(z, w1)                     # (B, ngf8*16) bf16 + stats
    ch_sum = s.sum(axis=(0, 1)).reshape(ngf8, 16).sum(axis=1)
    ch_sq = q.sum(axis=(0, 1)).reshape(ngf8, 16).sum(axis=1)
    scale, shift = _bn_scale_shift(ch_sum, ch_sq, float(B * 16),
                                   params["g1"], params["b1"])
    y = pallas_bn_relu(y, jnp.repeat(scale, 16), jnp.repeat(shift, 16))
    y = y.reshape(B, ngf8, 4, 4).transpose(0, 2, 3, 1)   # NHWC (B, 4, 4, ngf8)
    H = W = 4

    # Layers 2-4: ConvTranspose2d(k=4, s=2, p=1, bias=False) + BN + ReLU.
    for wk, gk, bk in (("w2", "g2", "b2"),
                       ("w3", "g3", "b3"),
                       ("w4", "g4", "b4")):
        wp, cout, n_pad = _pack_convT_weight(params[wk])
        patches = _subpixel_patches(y)                   # (B*H*W, 9*Cin) bf16
        raw, s, q = pallas_matmul(patches, wp)           # (B*H*W, n_pad) + stats
        # Global per-channel stats: fold the 4 sub-pixel column groups.
        ch_sum = s.sum(axis=(0, 1))[: 4 * cout].reshape(4, cout).sum(axis=0)
        ch_sq = q.sum(axis=(0, 1))[: 4 * cout].reshape(4, cout).sum(axis=0)
        count = float(B * 2 * H * 2 * W)
        scale, shift = _bn_scale_shift(ch_sum, ch_sq, count,
                                       params[gk], params[bk])
        scale_cols = jnp.pad(jnp.tile(scale, 4), (0, n_pad - 4 * cout))
        shift_cols = jnp.pad(jnp.tile(shift, 4), (0, n_pad - 4 * cout))
        act = pallas_bn_relu(raw, scale_cols, shift_cols)
        y = _depth_to_space(act, B, H, W, cout)          # NHWC (B, 2H, 2W, cout)
        H, W = 2 * H, 2 * W

    # Layer 5: ConvTranspose2d(ngf, nc, 4, 2, 1, bias=False) + Tanh (fused).
    wp, nc_out, _ = _pack_convT_weight(params["w5"])
    patches = _subpixel_patches(y)
    out = pallas_matmul(patches, wp, tanh=True, out_dtype=jnp.float32)
    out = _depth_to_space(out, B, H, W, nc_out)          # (B, 64, 64, nc) f32
    return out.transpose(0, 3, 1, 2)                     # NCHW, like PyTorch


# ---------------------------------- main ------------------------------------

if __name__ == "__main__":
    nz, ngf, nc, B = 16, 8, 3, 2
    key = jax.random.PRNGKey(0)
    pkey, zkey = jax.random.split(key)
    params = init_params(pkey, nz, ngf, nc)
    z = jax.random.normal(zkey, (B, nz, 1, 1), jnp.float32)

    out = jax.jit(wgan_generator_forward)(z, params)
    out = jax.block_until_ready(out)

    assert out.shape == (B, nc, 64, 64), out.shape
    assert bool(jnp.all(jnp.isfinite(out)))
    assert bool(jnp.all(jnp.abs(out) <= 1.0))   # tanh output range
    print("KERNEL_OK")
</pallas_src>

<mosaic_0001>
module attributes {stable_mosaic.version = 11 : i64} {
  func.func @_matmul_stats_kernel(%arg0: i32, %arg1: i32, %arg2: memref<2x16xbf16, #tpu.memory_space<vmem>>, %arg3: memref<16x1024xbf16, #tpu.memory_space<vmem>>, %arg4: memref<2x1024xbf16, #tpu.memory_space<vmem>>, %arg5: memref<1x1x1024xf32, #tpu.memory_space<vmem>>, %arg6: memref<1x1x1024xf32, #tpu.memory_space<vmem>>, %arg7: memref<2x1024xf32, #tpu.memory_space<vmem>>) attributes {dimension_semantics = [#tpu.dimension_semantics<parallel>, #tpu.dimension_semantics<arbitrary>], iteration_bounds = array<i64: 1, 1>, scalar_prefetch = 0 : i64, scratch_operands = 1 : i64, tpu.core_type = #tpu.core_type<tc>, window_params = [{transform_indices = @transform_0, window_bounds = array<i64: 2, 16>}, {transform_indices = @transform_1, window_bounds = array<i64: 16, 1024>}, {transform_indices = @transform_2, window_bounds = array<i64: 2, 1024>}, {transform_indices = @transform_3, window_bounds = array<i64: 1, 1, 1024>}, {transform_indices = @transform_4, window_bounds = array<i64: 1, 1, 1024>}]} {
    %c0_i32 = arith.constant 0 : i32
    %0 = arith.cmpi eq, %arg1, %c0_i32 : i32
    %1 = arith.extui %0 : i1 to i32
    %c0_i32_0 = arith.constant 0 : i32
    %2 = arith.cmpi ne, %1, %c0_i32_0 : i32
    scf.if %2 {
      %cst_10 = arith.constant 0.000000e+00 : f32
      %12 = vector.broadcast %cst_10 : f32 to vector<2x1024xf32>
      %c0_11 = arith.constant 0 : index
      %c0_12 = arith.constant 0 : index
      %13 = vector.load %arg7[%c0_11, %c0_12] : memref<2x1024xf32, #tpu.memory_space<vmem>>, vector<2x1024xf32>
      tpu.vector_store %arg7[%c0_11, %c0_12], %12 {strides = array<i32>} : memref<2x1024xf32, #tpu.memory_space<vmem>>, vector<2x1024xf32>,
    } else {
    }
    %c0 = arith.constant 0 : index
    %c0_1 = arith.constant 0 : index
    %3 = vector.load %arg7[%c0, %c0_1] : memref<2x1024xf32, #tpu.memory_space<vmem>>, vector<2x1024xf32>
    %c0_2 = arith.constant 0 : index
    %c0_3 = arith.constant 0 : index
    %4 = vector.load %arg2[%c0_2, %c0_3] : memref<2x16xbf16, #tpu.memory_space<vmem>>, vector<2x16xbf16>
    %c0_4 = arith.constant 0 : index
    %c0_5 = arith.constant 0 : index
    %5 = vector.load %arg3[%c0_4, %c0_5] : memref<16x1024xbf16, #tpu.memory_space<vmem>>, vector<16x1024xbf16>
    %cst = arith.constant dense<0.000000e+00> : vector<2x1024xf32>
    %6 = tpu.matmul %4, %5, %cst {dimension_numbers = #tpu.dot_dimension_numbers<[1], [0], [0], [1], [0, 0, 1, 1], [], []>} : vector<2x16xbf16>, vector<16x1024xbf16>, vector<2x1024xf32> -> vector<2x1024xf32>
    %7 = arith.addf %3, %6 : vector<2x1024xf32>
    %c0_6 = arith.constant 0 : index
    %c0_7 = arith.constant 0 : index
    %8 = vector.load %arg7[%c0_6, %c0_7] : memref<2x1024xf32, #tpu.memory_space<vmem>>, vector<2x1024xf32>
    tpu.vector_store %arg7[%c0_6, %c0_7], %7 {strides = array<i32>} : memref<2x1024xf32, #tpu.memory_space<vmem>>, vector<2x1024xf32>,
    %c0_i32_8 = arith.constant 0 : i32
    %9 = arith.cmpi eq, %arg1, %c0_i32_8 : i32
    %10 = arith.extui %9 : i1 to i32
    %c0_i32_9 = arith.constant 0 : i32
    %11 = arith.cmpi ne, %10, %c0_i32_9 : i32
    scf.if %11 {
      %c0_10 = arith.constant 0 : index
      %c0_11 = arith.constant 0 : index
      %12 = vector.load %arg7[%c0_10, %c0_11] : memref<2x1024xf32, #tpu.memory_space<vmem>>, vector<2x1024xf32>
      %13 = arith.truncf %12 : vector<2x1024xf32> to vector<2x1024xbf16>
      %c0_12 = arith.constant 0 : index
      %c0_13 = arith.constant 0 : index
      %14 = vector.load %arg4[%c0_12, %c0_13] : memref<2x1024xbf16, #tpu.memory_space<vmem>>, vector<2x1024xbf16>
      tpu.vector_store %arg4[%c0_12, %c0_13], %13 {strides = array<i32>} : memref<2x1024xbf16, #tpu.memory_space<vmem>>, vector<2x1024xbf16>,
      %cst_14 = arith.constant dense<0.000000e+00> : vector<1024xf32>
      %15 = vector.multi_reduction <add>, %12, %cst_14 [0] : vector<2x1024xf32> to vector<1024xf32>
      %16 = vector.shape_cast %15 : vector<1024xf32> to vector<1x1x1024xf32>
      %c0_15 = arith.constant 0 : index
      %c0_16 = arith.constant 0 : index
      %c0_17 = arith.constant 0 : index
      %17 = vector.load %arg5[%c0_15, %c0_16, %c0_17] : memref<1x1x1024xf32, #tpu.memory_space<vmem>>, vector<1x1x1024xf32>
      tpu.vector_store %arg5[%c0_15, %c0_16, %c0_17], %16 {strides = array<i32>} : memref<1x1x1024xf32, #tpu.memory_space<vmem>>, vector<1x1x1024xf32>,
      %18 = arith.mulf %12, %12 : vector<2x1024xf32>
      %cst_18 = arith.constant dense<0.000000e+00> : vector<1024xf32>
      %19 = vector.multi_reduction <add>, %18, %cst_18 [0] : vector<2x1024xf32> to vector<1024xf32>
      %20 = vector.shape_cast %19 : vector<1024xf32> to vector<1x1x1024xf32>
      %c0_19 = arith.constant 0 : index
      %c0_20 = arith.constant 0 : index
      %c0_21 = arith.constant 0 : index
      %21 = vector.load %arg6[%c0_19, %c0_20, %c0_21] : memref<1x1x1024xf32, #tpu.memory_space<vmem>>, vector<1x1x1024xf32>
      tpu.vector_store %arg6[%c0_19, %c0_20, %c0_21], %20 {strides = array<i32>} : memref<1x1x1024xf32, #tpu.memory_space<vmem>>, vector<1x1x1024xf32>,
    } else {
    }
    return
  }
  func.func @transform_0(%arg0: i32, %arg1: i32) -> (i32, i32) {
    %c0_i32 = arith.constant 0 : i32
    return %arg0, %arg1 : i32, i32
  }
  func.func @transform_1(%arg0: i32, %arg1: i32) -> (i32, i32) {
    %c0_i32 = arith.constant 0 : i32
    %c0_i32_0 = arith.constant 0 : i32
    return %arg1, %c0_i32 : i32, i32
  }
  func.func @transform_2(%arg0: i32, %arg1: i32) -> (i32, i32) {
    %c0_i32 = arith.constant 0 : i32
    %c0_i32_0 = arith.constant 0 : i32
    return %arg0, %c0_i32 : i32, i32
  }
  func.func @transform_3(%arg0: i32, %arg1: i32) -> (i32, i32, i32) {
    %c0_i32 = arith.constant 0 : i32
    %c0_i32_0 = arith.constant 0 : i32
    %c0_i32_1 = arith.constant 0 : i32
    return %arg0, %c0_i32, %c0_i32_0 : i32, i32, i32
  }
  func.func @transform_4(%arg0: i32, %arg1: i32) -> (i32, i32, i32) {
    %c0_i32 = arith.constant 0 : i32
    %c0_i32_0 = arith.constant 0 : i32
    %c0_i32_1 = arith.constant 0 : i32
    return %arg0, %c0_i32, %c0_i32_0 : i32, i32, i32
  }
}

module attributes {stable_mosaic.version = 11 : i64} {
  func.func @_bn_relu_kernel(%arg0: i32, %arg1: memref<2x1024xbf16, #tpu.memory_space<vmem>>, %arg2: memref<1x1024xf32, #tpu.memory_space<vmem>>, %arg3: memref<1x1024xf32, #tpu.memory_space<vmem>>, %arg4: memref<2x1024xbf16, #tpu.memory_space<vmem>>) attributes {dimension_semantics = [#tpu.dimension_semantics<parallel>], iteration_bounds = array<i64: 1>, scalar_prefetch = 0 : i64, scratch_operands = 0 : i64, tpu.core_type = #tpu.core_type<tc>, window_params = [{transform_indices = @transform_0, window_bounds = array<i64: 2, 1024>}, {pipeline_mode = #tpu.pipeline_mode<synchronous>, transform_indices = @transform_1, window_bounds = array<i64: 1, 1024>}, {pipeline_mode = #tpu.pipeline_mode<synchronous>, transform_indices = @transform_2, window_bounds = array<i64: 1, 1024>}, {transform_indices = @transform_3, window_bounds = array<i64: 2, 1024>}]} {
    %c0 = arith.constant 0 : index
    %c0_0 = arith.constant 0 : index
    %0 = vector.load %arg1[%c0, %c0_0] : memref<2x1024xbf16, #tpu.memory_space<vmem>>, vector<2x1024xbf16>
    %1 = arith.extf %0 : vector<2x1024xbf16> to vector<2x1024xf32>
    %c0_1 = arith.constant 0 : index
    %c0_2 = arith.constant 0 : index
    %2 = vector.load %arg2[%c0_1, %c0_2] : memref<1x1024xf32, #tpu.memory_space<vmem>>, vector<1x1024xf32>
    %3 = vector.broadcast %2 : vector<1x1024xf32> to vector<2x1024xf32>
    %4 = arith.mulf %1, %3 : vector<2x1024xf32>
    %c0_3 = arith.constant 0 : index
    %c0_4 = arith.constant 0 : index
    %5 = vector.load %arg3[%c0_3, %c0_4] : memref<1x1024xf32, #tpu.memory_space<vmem>>, vector<1x1024xf32>
    %6 = vector.broadcast %5 : vector<1x1024xf32> to vector<2x1024xf32>
    %7 = arith.addf %4, %6 : vector<2x1024xf32>
    %cst = arith.constant 0.000000e+00 : f32
    %8 = vector.broadcast %cst : f32 to vector<2x1024xf32>
    %9 = arith.maximumf %7, %8 : vector<2x1024xf32>
    %10 = arith.truncf %9 : vector<2x1024xf32> to vector<2x1024xbf16>
    %c0_5 = arith.constant 0 : index
    %c0_6 = arith.constant 0 : index
    %11 = vector.load %arg4[%c0_5, %c0_6] : memref<2x1024xbf16, #tpu.memory_space<vmem>>, vector<2x1024xbf16>
    tpu.vector_store %arg4[%c0_5, %c0_6], %10 {strides = array<i32>} : memref<2x1024xbf16, #tpu.memory_space<vmem>>, vector<2x1024xbf16>,
    return
  }
  func.func @transform_0(%arg0: i32) -> (i32, i32) {
    %c0_i32 = arith.constant 0 : i32
    %c0_i32_0 = arith.constant 0 : i32
    return %arg0, %c0_i32 : i32, i32
  }
  func.func @transform_1(%arg0: i32) -> (i32, i32) {
    %c0_i32 = arith.constant 0 : i32
    %c0_i32_0 = arith.constant 0 : i32
    %c0_i32_1 = arith.constant 0 : i32
    return %c0_i32, %c0_i32_0 : i32, i32
  }
  func.func @transform_2(%arg0: i32) -> (i32, i32) {
    %c0_i32 = arith.constant 0 : i32
    %c0_i32_0 = arith.constant 0 : i32
    %c0_i32_1 = arith.constant 0 : i32
    return %c0_i32, %c0_i32_0 : i32, i32
  }
  func.func @transform_3(%arg0: i32) -> (i32, i32) {
    %c0_i32 = arith.constant 0 : i32
    %c0_i32_0 = arith.constant 0 : i32
    return %arg0, %c0_i32 : i32, i32
  }
}

module attributes {stable_mosaic.version = 11 : i64} {
  func.func @_matmul_stats_kernel(%arg0: i32, %arg1: i32, %arg2: memref<32x576xbf16, #tpu.memory_space<vmem>>, %arg3: memref<576x128xbf16, #tpu.memory_space<vmem>>, %arg4: memref<32x128xbf16, #tpu.memory_space<vmem>>, %arg5: memref<1x1x128xf32, #tpu.memory_space<vmem>>, %arg6: memref<1x1x128xf32, #tpu.memory_space<vmem>>, %arg7: memref<32x128xf32, #tpu.memory_space<vmem>>) attributes {dimension_semantics = [#tpu.dimension_semantics<parallel>, #tpu.dimension_semantics<arbitrary>], iteration_bounds = array<i64: 1, 1>, scalar_prefetch = 0 : i64, scratch_operands = 1 : i64, tpu.core_type = #tpu.core_type<tc>, window_params = [{transform_indices = @transform_0, window_bounds = array<i64: 32, 576>}, {transform_indices = @transform_1, window_bounds = array<i64: 576, 128>}, {transform_indices = @transform_2, window_bounds = array<i64: 32, 128>}, {transform_indices = @transform_3, window_bounds = array<i64: 1, 1, 128>}, {transform_indices = @transform_4, window_bounds = array<i64: 1, 1, 128>}]} {
    %c0_i32 = arith.constant 0 : i32
    %0 = arith.cmpi eq, %arg1, %c0_i32 : i32
    %1 = arith.extui %0 : i1 to i32
    %c0_i32_0 = arith.constant 0 : i32
    %2 = arith.cmpi ne, %1, %c0_i32_0 : i32
    scf.if %2 {
      %cst_10 = arith.constant 0.000000e+00 : f32
      %12 = vector.broadcast %cst_10 : f32 to vector<32x128xf32>
      %c0_11 = arith.constant 0 : index
      %c0_12 = arith.constant 0 : index
      %13 = vector.load %arg7[%c0_11, %c0_12] : memref<32x128xf32, #tpu.memory_space<vmem>>, vector<32x128xf32>
      tpu.vector_store %arg7[%c0_11, %c0_12], %12 {strides = array<i32>} : memref<32x128xf32, #tpu.memory_space<vmem>>, vector<32x128xf32>,
    } else {
    }
    %c0 = arith.constant 0 : index
    %c0_1 = arith.constant 0 : index
    %3 = vector.load %arg7[%c0, %c0_1] : memref<32x128xf32, #tpu.memory_space<vmem>>, vector<32x128xf32>
    %c0_2 = arith.constant 0 : index
    %c0_3 = arith.constant 0 : index
    %4 = vector.load %arg2[%c0_2, %c0_3] : memref<32x576xbf16, #tpu.memory_space<vmem>>, vector<32x576xbf16>
    %c0_4 = arith.constant 0 : index
    %c0_5 = arith.constant 0 : index
    %5 = vector.load %arg3[%c0_4, %c0_5] : memref<576x128xbf16, #tpu.memory_space<vmem>>, vector<576x128xbf16>
    %cst = arith.constant dense<0.000000e+00> : vector<32x128xf32>
    %6 = tpu.matmul %4, %5, %cst {dimension_numbers = #tpu.dot_dimension_numbers<[1], [0], [0], [1], [0, 0, 1, 1], [], []>} : vector<32x576xbf16>, vector<576x128xbf16>, vector<32x128xf32> -> vector<32x128xf32>
    %7 = arith.addf %3, %6 : vector<32x128xf32>
    %c0_6 = arith.constant 0 : index
    %c0_7 = arith.constant 0 : index
    %8 = vector.load %arg7[%c0_6, %c0_7] : memref<32x128xf32, #tpu.memory_space<vmem>>, vector<32x128xf32>
    tpu.vector_store %arg7[%c0_6, %c0_7], %7 {strides = array<i32>} : memref<32x128xf32, #tpu.memory_space<vmem>>, vector<32x128xf32>,
    %c0_i32_8 = arith.constant 0 : i32
    %9 = arith.cmpi eq, %arg1, %c0_i32_8 : i32
    %10 = arith.extui %9 : i1 to i32
    %c0_i32_9 = arith.constant 0 : i32
    %11 = arith.cmpi ne, %10, %c0_i32_9 : i32
    scf.if %11 {
      %c0_10 = arith.constant 0 : index
      %c0_11 = arith.constant 0 : index
      %12 = vector.load %arg7[%c0_10, %c0_11] : memref<32x128xf32, #tpu.memory_space<vmem>>, vector<32x128xf32>
      %13 = arith.truncf %12 : vector<32x128xf32> to vector<32x128xbf16>
      %c0_12 = arith.constant 0 : index
      %c0_13 = arith.constant 0 : index
      %14 = vector.load %arg4[%c0_12, %c0_13] : memref<32x128xbf16, #tpu.memory_space<vmem>>, vector<32x128xbf16>
      tpu.vector_store %arg4[%c0_12, %c0_13], %13 {strides = array<i32>} : memref<32x128xbf16, #tpu.memory_space<vmem>>, vector<32x128xbf16>,
      %cst_14 = arith.constant dense<0.000000e+00> : vector<128xf32>
      %15 = vector.multi_reduction <add>, %12, %cst_14 [0] : vector<32x128xf32> to vector<128xf32>
      %16 = vector.shape_cast %15 : vector<128xf32> to vector<1x1x128xf32>
      %c0_15 = arith.constant 0 : index
      %c0_16 = arith.constant 0 : index
      %c0_17 = arith.constant 0 : index
      %17 = vector.load %arg5[%c0_15, %c0_16, %c0_17] : memref<1x1x128xf32, #tpu.memory_space<vmem>>, vector<1x1x128xf32>
      tpu.vector_store %arg5[%c0_15, %c0_16, %c0_17], %16 {strides = array<i32>} : memref<1x1x128xf32, #tpu.memory_space<vmem>>, vector<1x1x128xf32>,
      %18 = arith.mulf %12, %12 : vector<32x128xf32>
      %cst_18 = arith.constant dense<0.000000e+00> : vector<128xf32>
      %19 = vector.multi_reduction <add>, %18, %cst_18 [0] : vector<32x128xf32> to vector<128xf32>
      %20 = vector.shape_cast %19 : vector<128xf32> to vector<1x1x128xf32>
      %c0_19 = arith.constant 0 : index
      %c0_20 = arith.constant 0 : index
      %c0_21 = arith.constant 0 : index
      %21 = vector.load %arg6[%c0_19, %c0_20, %c0_21] : memref<1x1x128xf32, #tpu.memory_space<vmem>>, vector<1x1x128xf32>
      tpu.vector_store %arg6[%c0_19, %c0_20, %c0_21], %20 {strides = array<i32>} : memref<1x1x128xf32, #tpu.memory_space<vmem>>, vector<1x1x128xf32>,
    } else {
    }
    return
  }
  func.func @transform_0(%arg0: i32, %arg1: i32) -> (i32, i32) {
    %c0_i32 = arith.constant 0 : i32
    return %arg0, %arg1 : i32, i32
  }
  func.func @transform_1(%arg0: i32, %arg1: i32) -> (i32, i32) {
    %c0_i32 = arith.constant 0 : i32
    %c0_i32_0 = arith.constant 0 : i32
    return %arg1, %c0_i32 : i32, i32
  }
  func.func @transform_2(%arg0: i32, %arg1: i32) -> (i32, i32) {
    %c0_i32 = arith.constant 0 : i32
    %c0_i32_0 = arith.constant 0 : i32
    return %arg0, %c0_i32 : i32, i32
  }
  func.func @transform_3(%arg0: i32, %arg1: i32) -> (i32, i32, i32) {
    %c0_i32 = arith.constant 0 : i32
    %c0_i32_0 = arith.constant 0 : i32
    %c0_i32_1 = arith.constant 0 : i32
    return %arg0, %c0_i32, %c0_i32_0 : i32, i32, i32
  }
  func.func @transform_4(%arg0: i32, %arg1: i32) -> (i32, i32, i32) {
    %c0_i32 = arith.constant 0 : i32
    %c0_i32_0 = arith.constant 0 : i32
    %c0_i32_1 = arith.constant 0 : i32
    return %arg0, %c0_i32, %c0_i32_0 : i32, i32, i32
  }
}

module attributes {stable_mosaic.version = 11 : i64} {
  func.func @_bn_relu_kernel(%arg0: i32, %arg1: memref<32x128xbf16, #tpu.memory_space<vmem>>, %arg2: memref<1x128xf32, #tpu.memory_space<vmem>>, %arg3: memref<1x128xf32, #tpu.memory_space<vmem>>, %arg4: memref<32x128xbf16, #tpu.memory_space<vmem>>) attributes {dimension_semantics = [#tpu.dimension_semantics<parallel>], iteration_bounds = array<i64: 1>, scalar_prefetch = 0 : i64, scratch_operands = 0 : i64, tpu.core_type = #tpu.core_type<tc>, window_params = [{transform_indices = @transform_0, window_bounds = array<i64: 32, 128>}, {pipeline_mode = #tpu.pipeline_mode<synchronous>, transform_indices = @transform_1, window_bounds = array<i64: 1, 128>}, {pipeline_mode = #tpu.pipeline_mode<synchronous>, transform_indices = @transform_2, window_bounds = array<i64: 1, 128>}, {transform_indices = @transform_3, window_bounds = array<i64: 32, 128>}]} {
    %c0 = arith.constant 0 : index
    %c0_0 = arith.constant 0 : index
    %0 = vector.load %arg1[%c0, %c0_0] : memref<32x128xbf16, #tpu.memory_space<vmem>>, vector<32x128xbf16>
    %1 = arith.extf %0 : vector<32x128xbf16> to vector<32x128xf32>
    %c0_1 = arith.constant 0 : index
    %c0_2 = arith.constant 0 : index
    %2 = vector.load %arg2[%c0_1, %c0_2] : memref<1x128xf32, #tpu.memory_space<vmem>>, vector<1x128xf32>
    %3 = vector.broadcast %2 : vector<1x128xf32> to vector<32x128xf32>
    %4 = arith.mulf %1, %3 : vector<32x128xf32>
    %c0_3 = arith.constant 0 : index
    %c0_4 = arith.constant 0 : index
    %5 = vector.load %arg3[%c0_3, %c0_4] : memref<1x128xf32, #tpu.memory_space<vmem>>, vector<1x128xf32>
    %6 = vector.broadcast %5 : vector<1x128xf32> to vector<32x128xf32>
    %7 = arith.addf %4, %6 : vector<32x128xf32>
    %cst = arith.constant 0.000000e+00 : f32
    %8 = vector.broadcast %cst : f32 to vector<32x128xf32>
    %9 = arith.maximumf %7, %8 : vector<32x128xf32>
    %10 = arith.truncf %9 : vector<32x128xf32> to vector<32x128xbf16>
    %c0_5 = arith.constant 0 : index
    %c0_6 = arith.constant 0 : index
    %11 = vector.load %arg4[%c0_5, %c0_6] : memref<32x128xbf16, #tpu.memory_space<vmem>>, vector<32x128xbf16>
    tpu.vector_store %arg4[%c0_5, %c0_6], %10 {strides = array<i32>} : memref<32x128xbf16, #tpu.memory_space<vmem>>, vector<32x128xbf16>,
    return
  }
  func.func @transform_0(%arg0: i32) -> (i32, i32) {
    %c0_i32 = arith.constant 0 : i32
    %c0_i32_0 = arith.constant 0 : i32
    return %arg0, %c0_i32 : i32, i32
  }
  func.func @transform_1(%arg0: i32) -> (i32, i32) {
    %c0_i32 = arith.constant 0 : i32
    %c0_i32_0 = arith.constant 0 : i32
    %c0_i32_1 = arith.constant 0 : i32
    return %c0_i32, %c0_i32_0 : i32, i32
  }
  func.func @transform_2(%arg0: i32) -> (i32, i32) {
    %c0_i32 = arith.constant 0 : i32
    %c0_i32_0 = arith.constant 0 : i32
    %c0_i32_1 = arith.constant 0 : i32
    return %c0_i32, %c0_i32_0 : i32, i32
  }
  func.func @transform_3(%arg0: i32) -> (i32, i32) {
    %c0_i32 = arith.constant 0 : i32
    %c0_i32_0 = arith.constant 0 : i32
    return %arg0, %c0_i32 : i32, i32
  }
}

module attributes {stable_mosaic.version = 11 : i64} {
  func.func @_matmul_stats_kernel(%arg0: i32, %arg1: i32, %arg2: memref<128x288xbf16, #tpu.memory_space<vmem>>, %arg3: memref<288x128xbf16, #tpu.memory_space<vmem>>, %arg4: memref<128x128xbf16, #tpu.memory_space<vmem>>, %arg5: memref<1x1x128xf32, #tpu.memory_space<vmem>>, %arg6: memref<1x1x128xf32, #tpu.memory_space<vmem>>, %arg7: memref<128x128xf32, #tpu.memory_space<vmem>>) attributes {dimension_semantics = [#tpu.dimension_semantics<parallel>, #tpu.dimension_semantics<arbitrary>], iteration_bounds = array<i64: 1, 1>, scalar_prefetch = 0 : i64, scratch_operands = 1 : i64, tpu.core_type = #tpu.core_type<tc>, window_params = [{transform_indices = @transform_0, window_bounds = array<i64: 128, 288>}, {transform_indices = @transform_1, window_bounds = array<i64: 288, 128>}, {transform_indices = @transform_2, window_bounds = array<i64: 128, 128>}, {transform_indices = @transform_3, window_bounds = array<i64: 1, 1, 128>}, {transform_indices = @transform_4, window_bounds = array<i64: 1, 1, 128>}]} {
    %c0_i32 = arith.constant 0 : i32
    %0 = arith.cmpi eq, %arg1, %c0_i32 : i32
    %1 = arith.extui %0 : i1 to i32
    %c0_i32_0 = arith.constant 0 : i32
    %2 = arith.cmpi ne, %1, %c0_i32_0 : i32
    scf.if %2 {
      %cst_10 = arith.constant 0.000000e+00 : f32
      %12 = vector.broadcast %cst_10 : f32 to vector<128x128xf32>
      %c0_11 = arith.constant 0 : index
      %c0_12 = arith.constant 0 : index
      %13 = vector.load %arg7[%c0_11, %c0_12] : memref<128x128xf32, #tpu.memory_space<vmem>>, vector<128x128xf32>
      tpu.vector_store %arg7[%c0_11, %c0_12], %12 {strides = array<i32>} : memref<128x128xf32, #tpu.memory_space<vmem>>, vector<128x128xf32>,
    } else {
    }
    %c0 = arith.constant 0 : index
    %c0_1 = arith.constant 0 : index
    %3 = vector.load %arg7[%c0, %c0_1] : memref<128x128xf32, #tpu.memory_space<vmem>>, vector<128x128xf32>
    %c0_2 = arith.constant 0 : index
    %c0_3 = arith.constant 0 : index
    %4 = vector.load %arg2[%c0_2, %c0_3] : memref<128x288xbf16, #tpu.memory_space<vmem>>, vector<128x288xbf16>
    %c0_4 = arith.constant 0 : index
    %c0_5 = arith.constant 0 : index
    %5 = vector.load %arg3[%c0_4, %c0_5] : memref<288x128xbf16, #tpu.memory_space<vmem>>, vector<288x128xbf16>
    %cst = arith.constant dense<0.000000e+00> : vector<128x128xf32>
    %6 = tpu.matmul %4, %5, %cst {dimension_numbers = #tpu.dot_dimension_numbers<[1], [0], [0], [1], [0, 0, 1, 1], [], []>} : vector<128x288xbf16>, vector<288x128xbf16>, vector<128x128xf32> -> vector<128x128xf32>
    %7 = arith.addf %3, %6 : vector<128x128xf32>
    %c0_6 = arith.constant 0 : index
    %c0_7 = arith.constant 0 : index
    %8 = vector.load %arg7[%c0_6, %c0_7] : memref<128x128xf32, #tpu.memory_space<vmem>>, vector<128x128xf32>
    tpu.vector_store %arg7[%c0_6, %c0_7], %7 {strides = array<i32>} : memref<128x128xf32, #tpu.memory_space<vmem>>, vector<128x128xf32>,
    %c0_i32_8 = arith.constant 0 : i32
    %9 = arith.cmpi eq, %arg1, %c0_i32_8 : i32
    %10 = arith.extui %9 : i1 to i32
    %c0_i32_9 = arith.constant 0 : i32
    %11 = arith.cmpi ne, %10, %c0_i32_9 : i32
    scf.if %11 {
      %c0_10 = arith.constant 0 : index
      %c0_11 = arith.constant 0 : index
      %12 = vector.load %arg7[%c0_10, %c0_11] : memref<128x128xf32, #tpu.memory_space<vmem>>, vector<128x128xf32>
      %13 = arith.truncf %12 : vector<128x128xf32> to vector<128x128xbf16>
      %c0_12 = arith.constant 0 : index
      %c0_13 = arith.constant 0 : index
      %14 = vector.load %arg4[%c0_12, %c0_13] : memref<128x128xbf16, #tpu.memory_space<vmem>>, vector<128x128xbf16>
      tpu.vector_store %arg4[%c0_12, %c0_13], %13 {strides = array<i32>} : memref<128x128xbf16, #tpu.memory_space<vmem>>, vector<128x128xbf16>,
      %cst_14 = arith.constant dense<0.000000e+00> : vector<128xf32>
      %15 = vector.multi_reduction <add>, %12, %cst_14 [0] : vector<128x128xf32> to vector<128xf32>
      %16 = vector.shape_cast %15 : vector<128xf32> to vector<1x1x128xf32>
      %c0_15 = arith.constant 0 : index
      %c0_16 = arith.constant 0 : index
      %c0_17 = arith.constant 0 : index
      %17 = vector.load %arg5[%c0_15, %c0_16, %c0_17] : memref<1x1x128xf32, #tpu.memory_space<vmem>>, vector<1x1x128xf32>
      tpu.vector_store %arg5[%c0_15, %c0_16, %c0_17], %16 {strides = array<i32>} : memref<1x1x128xf32, #tpu.memory_space<vmem>>, vector<1x1x128xf32>,
      %18 = arith.mulf %12, %12 : vector<128x128xf32>
      %cst_18 = arith.constant dense<0.000000e+00> : vector<128xf32>
      %19 = vector.multi_reduction <add>, %18, %cst_18 [0] : vector<128x128xf32> to vector<128xf32>
      %20 = vector.shape_cast %19 : vector<128xf32> to vector<1x1x128xf32>
      %c0_19 = arith.constant 0 : index
      %c0_20 = arith.constant 0 : index
      %c0_21 = arith.constant 0 : index
      %21 = vector.load %arg6[%c0_19, %c0_20, %c0_21] : memref<1x1x128xf32, #tpu.memory_space<vmem>>, vector<1x1x128xf32>
      tpu.vector_store %arg6[%c0_19, %c0_20, %c0_21], %20 {strides = array<i32>} : memref<1x1x128xf32, #tpu.memory_space<vmem>>, vector<1x1x128xf32>,
    } else {
    }
    return
  }
  func.func @transform_0(%arg0: i32, %arg1: i32) -> (i32, i32) {
    %c0_i32 = arith.constant 0 : i32
    return %arg0, %arg1 : i32, i32
  }
  func.func @transform_1(%arg0: i32, %arg1: i32) -> (i32, i32) {
    %c0_i32 = arith.constant 0 : i32
    %c0_i32_0 = arith.constant 0 : i32
    return %arg1, %c0_i32 : i32, i32
  }
  func.func @transform_2(%arg0: i32, %arg1: i32) -> (i32, i32) {
    %c0_i32 = arith.constant 0 : i32
    %c0_i32_0 = arith.constant 0 : i32
    return %arg0, %c0_i32 : i32, i32
  }
  func.func @transform_3(%arg0: i32, %arg1: i32) -> (i32, i32, i32) {
    %c0_i32 = arith.constant 0 : i32
    %c0_i32_0 = arith.constant 0 : i32
    %c0_i32_1 = arith.constant 0 : i32
    return %arg0, %c0_i32, %c0_i32_0 : i32, i32, i32
  }
  func.func @transform_4(%arg0: i32, %arg1: i32) -> (i32, i32, i32) {
    %c0_i32 = arith.constant 0 : i32
    %c0_i32_0 = arith.constant 0 : i32
    %c0_i32_1 = arith.constant 0 : i32
    return %arg0, %c0_i32, %c0_i32_0 : i32, i32, i32
  }
}

module attributes {stable_mosaic.version = 11 : i64} {
  func.func @_bn_relu_kernel(%arg0: i32, %arg1: memref<128x128xbf16, #tpu.memory_space<vmem>>, %arg2: memref<1x128xf32, #tpu.memory_space<vmem>>, %arg3: memref<1x128xf32, #tpu.memory_space<vmem>>, %arg4: memref<128x128xbf16, #tpu.memory_space<vmem>>) attributes {dimension_semantics = [#tpu.dimension_semantics<parallel>], iteration_bounds = array<i64: 1>, scalar_prefetch = 0 : i64, scratch_operands = 0 : i64, tpu.core_type = #tpu.core_type<tc>, window_params = [{transform_indices = @transform_0, window_bounds = array<i64: 128, 128>}, {pipeline_mode = #tpu.pipeline_mode<synchronous>, transform_indices = @transform_1, window_bounds = array<i64: 1, 128>}, {pipeline_mode = #tpu.pipeline_mode<synchronous>, transform_indices = @transform_2, window_bounds = array<i64: 1, 128>}, {transform_indices = @transform_3, window_bounds = array<i64: 128, 128>}]} {
    %c0 = arith.constant 0 : index
    %c0_0 = arith.constant 0 : index
    %0 = vector.load %arg1[%c0, %c0_0] : memref<128x128xbf16, #tpu.memory_space<vmem>>, vector<128x128xbf16>
    %1 = arith.extf %0 : vector<128x128xbf16> to vector<128x128xf32>
    %c0_1 = arith.constant 0 : index
    %c0_2 = arith.constant 0 : index
    %2 = vector.load %arg2[%c0_1, %c0_2] : memref<1x128xf32, #tpu.memory_space<vmem>>, vector<1x128xf32>
    %3 = vector.broadcast %2 : vector<1x128xf32> to vector<128x128xf32>
    %4 = arith.mulf %1, %3 : vector<128x128xf32>
    %c0_3 = arith.constant 0 : index
    %c0_4 = arith.constant 0 : index
    %5 = vector.load %arg3[%c0_3, %c0_4] : memref<1x128xf32, #tpu.memory_space<vmem>>, vector<1x128xf32>
    %6 = vector.broadcast %5 : vector<1x128xf32> to vector<128x128xf32>
    %7 = arith.addf %4, %6 : vector<128x128xf32>
    %cst = arith.constant 0.000000e+00 : f32
    %8 = vector.broadcast %cst : f32 to vector<128x128xf32>
    %9 = arith.maximumf %7, %8 : vector<128x128xf32>
    %10 = arith.truncf %9 : vector<128x128xf32> to vector<128x128xbf16>
    %c0_5 = arith.constant 0 : index
    %c0_6 = arith.constant 0 : index
    %11 = vector.load %arg4[%c0_5, %c0_6] : memref<128x128xbf16, #tpu.memory_space<vmem>>, vector<128x128xbf16>
    tpu.vector_store %arg4[%c0_5, %c0_6], %10 {strides = array<i32>} : memref<128x128xbf16, #tpu.memory_space<vmem>>, vector<128x128xbf16>,
    return
  }
  func.func @transform_0(%arg0: i32) -> (i32, i32) {
    %c0_i32 = arith.constant 0 : i32
    %c0_i32_0 = arith.constant 0 : i32
    return %arg0, %c0_i32 : i32, i32
  }
  func.func @transform_1(%arg0: i32) -> (i32, i32) {
    %c0_i32 = arith.constant 0 : i32
    %c0_i32_0 = arith.constant 0 : i32
    %c0_i32_1 = arith.constant 0 : i32
    return %c0_i32, %c0_i32_0 : i32, i32
  }
  func.func @transform_2(%arg0: i32) -> (i32, i32) {
    %c0_i32 = arith.constant 0 : i32
    %c0_i32_0 = arith.constant 0 : i32
    %c0_i32_1 = arith.constant 0 : i32
    return %c0_i32, %c0_i32_0 : i32, i32
  }
  func.func @transform_3(%arg0: i32) -> (i32, i32) {
    %c0_i32 = arith.constant 0 : i32
    %c0_i32_0 = arith.constant 0 : i32
    return %arg0, %c0_i32 : i32, i32
  }
}

module attributes {stable_mosaic.version = 11 : i64} {
  func.func @_matmul_stats_kernel(%arg0: i32, %arg1: i32, %arg2: memref<512x144xbf16, #tpu.memory_space<vmem>>, %arg3: memref<144x128xbf16, #tpu.memory_space<vmem>>, %arg4: memref<512x128xbf16, #tpu.memory_space<vmem>>, %arg5: memref<1x1x128xf32, #tpu.memory_space<vmem>>, %arg6: memref<1x1x128xf32, #tpu.memory_space<vmem>>, %arg7: memref<512x128xf32, #tpu.memory_space<vmem>>) attributes {dimension_semantics = [#tpu.dimension_semantics<parallel>, #tpu.dimension_semantics<arbitrary>], iteration_bounds = array<i64: 1, 1>, scalar_prefetch = 0 : i64, scratch_operands = 1 : i64, tpu.core_type = #tpu.core_type<tc>, window_params = [{transform_indices = @transform_0, window_bounds = array<i64: 512, 144>}, {transform_indices = @transform_1, window_bounds = array<i64: 144, 128>}, {transform_indices = @transform_2, window_bounds = array<i64: 512, 128>}, {transform_indices = @transform_3, window_bounds = array<i64: 1, 1, 128>}, {transform_indices = @transform_4, window_bounds = array<i64: 1, 1, 128>}]} {
    %c0_i32 = arith.constant 0 : i32
    %0 = arith.cmpi eq, %arg1, %c0_i32 : i32
    %1 = arith.extui %0 : i1 to i32
    %c0_i32_0 = arith.constant 0 : i32
    %2 = arith.cmpi ne, %1, %c0_i32_0 : i32
    scf.if %2 {
      %cst_10 = arith.constant 0.000000e+00 : f32
      %12 = vector.broadcast %cst_10 : f32 to vector<512x128xf32>
      %c0_11 = arith.constant 0 : index
      %c0_12 = arith.constant 0 : index
      %13 = vector.load %arg7[%c0_11, %c0_12] : memref<512x128xf32, #tpu.memory_space<vmem>>, vector<512x128xf32>
      tpu.vector_store %arg7[%c0_11, %c0_12], %12 {strides = array<i32>} : memref<512x128xf32, #tpu.memory_space<vmem>>, vector<512x128xf32>,
    } else {
    }
    %c0 = arith.constant 0 : index
    %c0_1 = arith.constant 0 : index
    %3 = vector.load %arg7[%c0, %c0_1] : memref<512x128xf32, #tpu.memory_space<vmem>>, vector<512x128xf32>
    %c0_2 = arith.constant 0 : index
    %c0_3 = arith.constant 0 : index
    %4 = vector.load %arg2[%c0_2, %c0_3] : memref<512x144xbf16, #tpu.memory_space<vmem>>, vector<512x144xbf16>
    %c0_4 = arith.constant 0 : index
    %c0_5 = arith.constant 0 : index
    %5 = vector.load %arg3[%c0_4, %c0_5] : memref<144x128xbf16, #tpu.memory_space<vmem>>, vector<144x128xbf16>
    %cst = arith.constant dense<0.000000e+00> : vector<512x128xf32>
    %6 = tpu.matmul %4, %5, %cst {dimension_numbers = #tpu.dot_dimension_numbers<[1], [0], [0], [1], [0, 0, 1, 1], [], []>} : vector<512x144xbf16>, vector<144x128xbf16>, vector<512x128xf32> -> vector<512x128xf32>
    %7 = arith.addf %3, %6 : vector<512x128xf32>
    %c0_6 = arith.constant 0 : index
    %c0_7 = arith.constant 0 : index
    %8 = vector.load %arg7[%c0_6, %c0_7] : memref<512x128xf32, #tpu.memory_space<vmem>>, vector<512x128xf32>
    tpu.vector_store %arg7[%c0_6, %c0_7], %7 {strides = array<i32>} : memref<512x128xf32, #tpu.memory_space<vmem>>, vector<512x128xf32>,
    %c0_i32_8 = arith.constant 0 : i32
    %9 = arith.cmpi eq, %arg1, %c0_i32_8 : i32
    %10 = arith.extui %9 : i1 to i32
    %c0_i32_9 = arith.constant 0 : i32
    %11 = arith.cmpi ne, %10, %c0_i32_9 : i32
    scf.if %11 {
      %c0_10 = arith.constant 0 : index
      %c0_11 = arith.constant 0 : index
      %12 = vector.load %arg7[%c0_10, %c0_11] : memref<512x128xf32, #tpu.memory_space<vmem>>, vector<512x128xf32>
      %13 = arith.truncf %12 : vector<512x128xf32> to vector<512x128xbf16>
      %c0_12 = arith.constant 0 : index
      %c0_13 = arith.constant 0 : index
      %14 = vector.load %arg4[%c0_12, %c0_13] : memref<512x128xbf16, #tpu.memory_space<vmem>>, vector<512x128xbf16>
      tpu.vector_store %arg4[%c0_12, %c0_13], %13 {strides = array<i32>} : memref<512x128xbf16, #tpu.memory_space<vmem>>, vector<512x128xbf16>,
      %cst_14 = arith.constant dense<0.000000e+00> : vector<128xf32>
      %15 = vector.multi_reduction <add>, %12, %cst_14 [0] : vector<512x128xf32> to vector<128xf32>
      %16 = vector.shape_cast %15 : vector<128xf32> to vector<1x1x128xf32>
      %c0_15 = arith.constant 0 : index
      %c0_16 = arith.constant 0 : index
      %c0_17 = arith.constant 0 : index
      %17 = vector.load %arg5[%c0_15, %c0_16, %c0_17] : memref<1x1x128xf32, #tpu.memory_space<vmem>>, vector<1x1x128xf32>
      tpu.vector_store %arg5[%c0_15, %c0_16, %c0_17], %16 {strides = array<i32>} : memref<1x1x128xf32, #tpu.memory_space<vmem>>, vector<1x1x128xf32>,
      %18 = arith.mulf %12, %12 : vector<512x128xf32>
      %cst_18 = arith.constant dense<0.000000e+00> : vector<128xf32>
      %19 = vector.multi_reduction <add>, %18, %cst_18 [0] : vector<512x128xf32> to vector<128xf32>
      %20 = vector.shape_cast %19 : vector<128xf32> to vector<1x1x128xf32>
      %c0_19 = arith.constant 0 : index
      %c0_20 = arith.constant 0 : index
      %c0_21 = arith.constant 0 : index
      %21 = vector.load %arg6[%c0_19, %c0_20, %c0_21] : memref<1x1x128xf32, #tpu.memory_space<vmem>>, vector<1x1x128xf32>
      tpu.vector_store %arg6[%c0_19, %c0_20, %c0_21], %20 {strides = array<i32>} : memref<1x1x128xf32, #tpu.memory_space<vmem>>, vector<1x1x128xf32>,
    } else {
    }
    return
  }
  func.func @transform_0(%arg0: i32, %arg1: i32) -> (i32, i32) {
    %c0_i32 = arith.constant 0 : i32
    return %arg0, %arg1 : i32, i32
  }
  func.func @transform_1(%arg0: i32, %arg1: i32) -> (i32, i32) {
    %c0_i32 = arith.constant 0 : i32
    %c0_i32_0 = arith.constant 0 : i32
    return %arg1, %c0_i32 : i32, i32
  }
  func.func @transform_2(%arg0: i32, %arg1: i32) -> (i32, i32) {
    %c0_i32 = arith.constant 0 : i32
    %c0_i32_0 = arith.constant 0 : i32
    return %arg0, %c0_i32 : i32, i32
  }
  func.func @transform_3(%arg0: i32, %arg1: i32) -> (i32, i32, i32) {
    %c0_i32 = arith.constant 0 : i32
    %c0_i32_0 = arith.constant 0 : i32
    %c0_i32_1 = arith.constant 0 : i32
    return %arg0, %c0_i32, %c0_i32_0 : i32, i32, i32
  }
  func.func @transform_4(%arg0: i32, %arg1: i32) -> (i32, i32, i32) {
    %c0_i32 = arith.constant 0 : i32
    %c0_i32_0 = arith.constant 0 : i32
    %c0_i32_1 = arith.constant 0 : i32
    return %arg0, %c0_i32, %c0_i32_0 : i32, i32, i32
  }
}

module attributes {stable_mosaic.version = 11 : i64} {
  func.func @_bn_relu_kernel(%arg0: i32, %arg1: memref<512x128xbf16, #tpu.memory_space<vmem>>, %arg2: memref<1x128xf32, #tpu.memory_space<vmem>>, %arg3: memref<1x128xf32, #tpu.memory_space<vmem>>, %arg4: memref<512x128xbf16, #tpu.memory_space<vmem>>) attributes {dimension_semantics = [#tpu.dimension_semantics<parallel>], iteration_bounds = array<i64: 1>, scalar_prefetch = 0 : i64, scratch_operands = 0 : i64, tpu.core_type = #tpu.core_type<tc>, window_params = [{transform_indices = @transform_0, window_bounds = array<i64: 512, 128>}, {pipeline_mode = #tpu.pipeline_mode<synchronous>, transform_indices = @transform_1, window_bounds = array<i64: 1, 128>}, {pipeline_mode = #tpu.pipeline_mode<synchronous>, transform_indices = @transform_2, window_bounds = array<i64: 1, 128>}, {transform_indices = @transform_3, window_bounds = array<i64: 512, 128>}]} {
    %c0 = arith.constant 0 : index
    %c0_0 = arith.constant 0 : index
    %0 = vector.load %arg1[%c0, %c0_0] : memref<512x128xbf16, #tpu.memory_space<vmem>>, vector<512x128xbf16>
    %1 = arith.extf %0 : vector<512x128xbf16> to vector<512x128xf32>
    %c0_1 = arith.constant 0 : index
    %c0_2 = arith.constant 0 : index
    %2 = vector.load %arg2[%c0_1, %c0_2] : memref<1x128xf32, #tpu.memory_space<vmem>>, vector<1x128xf32>
    %3 = vector.broadcast %2 : vector<1x128xf32> to vector<512x128xf32>
    %4 = arith.mulf %1, %3 : vector<512x128xf32>
    %c0_3 = arith.constant 0 : index
    %c0_4 = arith.constant 0 : index
    %5 = vector.load %arg3[%c0_3, %c0_4] : memref<1x128xf32, #tpu.memory_space<vmem>>, vector<1x128xf32>
    %6 = vector.broadcast %5 : vector<1x128xf32> to vector<512x128xf32>
    %7 = arith.addf %4, %6 : vector<512x128xf32>
    %cst = arith.constant 0.000000e+00 : f32
    %8 = vector.broadcast %cst : f32 to vector<512x128xf32>
    %9 = arith.maximumf %7, %8 : vector<512x128xf32>
    %10 = arith.truncf %9 : vector<512x128xf32> to vector<512x128xbf16>
    %c0_5 = arith.constant 0 : index
    %c0_6 = arith.constant 0 : index
    %11 = vector.load %arg4[%c0_5, %c0_6] : memref<512x128xbf16, #tpu.memory_space<vmem>>, vector<512x128xbf16>
    tpu.vector_store %arg4[%c0_5, %c0_6], %10 {strides = array<i32>} : memref<512x128xbf16, #tpu.memory_space<vmem>>, vector<512x128xbf16>,
    return
  }
  func.func @transform_0(%arg0: i32) -> (i32, i32) {
    %c0_i32 = arith.constant 0 : i32
    %c0_i32_0 = arith.constant 0 : i32
    return %arg0, %c0_i32 : i32, i32
  }
  func.func @transform_1(%arg0: i32) -> (i32, i32) {
    %c0_i32 = arith.constant 0 : i32
    %c0_i32_0 = arith.constant 0 : i32
    %c0_i32_1 = arith.constant 0 : i32
    return %c0_i32, %c0_i32_0 : i32, i32
  }
  func.func @transform_2(%arg0: i32) -> (i32, i32) {
    %c0_i32 = arith.constant 0 : i32
    %c0_i32_0 = arith.constant 0 : i32
    %c0_i32_1 = arith.constant 0 : i32
    return %c0_i32, %c0_i32_0 : i32, i32
  }
  func.func @transform_3(%arg0: i32) -> (i32, i32) {
    %c0_i32 = arith.constant 0 : i32
    %c0_i32_0 = arith.constant 0 : i32
    return %arg0, %c0_i32 : i32, i32
  }
}

module attributes {stable_mosaic.version = 11 : i64} {
  func.func @_matmul_tanh_kernel(%arg0: i32, %arg1: i32, %arg2: memref<2048x72xbf16, #tpu.memory_space<vmem>>, %arg3: memref<72x128xbf16, #tpu.memory_space<vmem>>, %arg4: memref<2048x128xf32, #tpu.memory_space<vmem>>, %arg5: memref<2048x128xf32, #tpu.memory_space<vmem>>) attributes {dimension_semantics = [#tpu.dimension_semantics<parallel>, #tpu.dimension_semantics<arbitrary>], iteration_bounds = array<i64: 1, 1>, scalar_prefetch = 0 : i64, scratch_operands = 1 : i64, tpu.core_type = #tpu.core_type<tc>, window_params = [{transform_indices = @transform_0, window_bounds = array<i64: 2048, 72>}, {transform_indices = @transform_1, window_bounds = array<i64: 72, 128>}, {transform_indices = @transform_2, window_bounds = array<i64: 2048, 128>}]} {
    %c0_i32 = arith.constant 0 : i32
    %0 = arith.cmpi eq, %arg1, %c0_i32 : i32
    %1 = arith.extui %0 : i1 to i32
    %c0_i32_0 = arith.constant 0 : i32
    %2 = arith.cmpi ne, %1, %c0_i32_0 : i32
    scf.if %2 {
      %cst_10 = arith.constant 0.000000e+00 : f32
      %12 = vector.broadcast %cst_10 : f32 to vector<2048x128xf32>
      %c0_11 = arith.constant 0 : index
      %c0_12 = arith.constant 0 : index
      %13 = vector.load %arg5[%c0_11, %c0_12] : memref<2048x128xf32, #tpu.memory_space<vmem>>, vector<2048x128xf32>
      tpu.vector_store %arg5[%c0_11, %c0_12], %12 {strides = array<i32>} : memref<2048x128xf32, #tpu.memory_space<vmem>>, vector<2048x128xf32>,
    } else {
    }
    %c0 = arith.constant 0 : index
    %c0_1 = arith.constant 0 : index
    %3 = vector.load %arg5[%c0, %c0_1] : memref<2048x128xf32, #tpu.memory_space<vmem>>, vector<2048x128xf32>
    %c0_2 = arith.constant 0 : index
    %c0_3 = arith.constant 0 : index
    %4 = vector.load %arg2[%c0_2, %c0_3] : memref<2048x72xbf16, #tpu.memory_space<vmem>>, vector<2048x72xbf16>
    %c0_4 = arith.constant 0 : index
    %c0_5 = arith.constant 0 : index
    %5 = vector.load %arg3[%c0_4, %c0_5] : memref<72x128xbf16, #tpu.memory_space<vmem>>, vector<72x128xbf16>
    %cst = arith.constant dense<0.000000e+00> : vector<2048x128xf32>
    %6 = tpu.matmul %4, %5, %cst {dimension_numbers = #tpu.dot_dimension_numbers<[1], [0], [0], [1], [0, 0, 1, 1], [], []>} : vector<2048x72xbf16>, vector<72x128xbf16>, vector<2048x128xf32> -> vector<2048x128xf32>
    %7 = arith.addf %3, %6 : vector<2048x128xf32>
    %c0_6 = arith.constant 0 : index
    %c0_7 = arith.constant 0 : index
    %8 = vector.load %arg5[%c0_6, %c0_7] : memref<2048x128xf32, #tpu.memory_space<vmem>>, vector<2048x128xf32>
    tpu.vector_store %arg5[%c0_6, %c0_7], %7 {strides = array<i32>} : memref<2048x128xf32, #tpu.memory_space<vmem>>, vector<2048x128xf32>,
    %c0_i32_8 = arith.constant 0 : i32
    %9 = arith.cmpi eq, %arg1, %c0_i32_8 : i32
    %10 = arith.extui %9 : i1 to i32
    %c0_i32_9 = arith.constant 0 : i32
    %11 = arith.cmpi ne, %10, %c0_i32_9 : i32
    scf.if %11 {
      %c0_10 = arith.constant 0 : index
      %c0_11 = arith.constant 0 : index
      %12 = vector.load %arg5[%c0_10, %c0_11] : memref<2048x128xf32, #tpu.memory_space<vmem>>, vector<2048x128xf32>
      %13 = math.tanh %12 : vector<2048x128xf32>
      %c0_12 = arith.constant 0 : index
      %c0_13 = arith.constant 0 : index
      %14 = vector.load %arg4[%c0_12, %c0_13] : memref<2048x128xf32, #tpu.memory_space<vmem>>, vector<2048x128xf32>
      tpu.vector_store %arg4[%c0_12, %c0_13], %13 {strides = array<i32>} : memref<2048x128xf32, #tpu.memory_space<vmem>>, vector<2048x128xf32>,
    } else {
    }
    return
  }
  func.func @transform_0(%arg0: i32, %arg1: i32) -> (i32, i32) {
    %c0_i32 = arith.constant 0 : i32
    return %arg0, %arg1 : i32, i32
  }
  func.func @transform_1(%arg0: i32, %arg1: i32) -> (i32, i32) {
    %c0_i32 = arith.constant 0 : i32
    %c0_i32_0 = arith.constant 0 : i32
    return %arg1, %c0_i32 : i32, i32
  }
  func.func @transform_2(%arg0: i32, %arg1: i32) -> (i32, i32) {
    %c0_i32 = arith.constant 0 : i32
    %c0_i32_0 = arith.constant 0 : i32
    return %arg0, %c0_i32 : i32, i32
  }
}

</mosaic_0001>

<bundles_post_ra>
// kernel: wgan_generator_forward.9
= control target key start
LH: loop header
LB: loop body
LE: loop exit
PB: predicated region body
PF: predicated region fallthrough
CT: control target
= control target key end

     0   :  { %v714_v3 = vmov 0   ;;  %vm72_vm0 = vcmask 130048   ;;  %v715_v18 = vmov 1983009808   ;;  %v253_v20 = vlaneseq  ;;  %s853_s1 = inlined_call_operand.vmem [shape: bf16[16,1024], index: 1, kind: input, shape index: {}]   ;;  %s854_s0 = inlined_call_operand.vmem [shape: bf16[2,16], index: 0, kind: input, shape index: {}]   ;;  %s855_s2 = inlined_call_operand.vmem [shape: bf16[2,1024], index: 2, kind: output, shape index: {0}]   ;;  %s856_s3 = inlined_call_operand.vmem [shape: f32[1,1,1024], index: 3, kind: output, shape index: {1}]   ;;  %s857_s4 = inlined_call_operand.vmem [shape: f32[1,1,1024], index: 4, kind: output, shape index: {2}]  }
   0x1   :  { %v24_v0 = vld [vmem:[%s853_s1] sm:$0xff]  ;;  %v25_v2 = vld [vmem:[%s853_s1 + $0x8] sm:$0xff]  ;;  %108 = vmatprep.mubr.bf16.mxu0 %v714_v3  ;;  %149 = vmatprep.mubr.bf16.mxu1 %v714_v3  ;;  %v26_v7 = vld [vmem:[%s853_s1 + $0x10] sm:$0xff]  ;;  %v251_v19 = vunpack.c.l.s4 %v715_v18  ;;  %v716_v28 = vmov 1966171168   ;;  %vm404_vm1 = vcmask 1041408  }
   0x2   :  { %v28_v1 = vld [vmem:[%s853_s1 + $0x20] sm:$0xff]  ;;  %v29_v5 = vld [vmem:[%s853_s1 + $0x28] sm:$0xff]  ;;  %v30_v10 = vld [vmem:[%s853_s1 + $0x30] sm:$0xff]  ;;  %v254_v22 = vshrl.u32 %v253_v20, 7  ;;  %v358_v29 = vunpack.c.l.s4 %v716_v28 }
   0x3   :  { %v694_v4 = vcombine.high %v24_v0, %v28_v1  ;;  %v693_v6 = vcombine.low %v24_v0, %v28_v1  ;;  %v696_v8 = vcombine.high %v25_v2, %v29_v5  ;;  %v695_v9 = vcombine.low %v25_v2, %v29_v5  ;;  %v27_v11 = vld [vmem:[%s853_s1 + $0x18] sm:$0xff]  ;;  %v23_v15 = vld [vmem:[%s854_s0] sm:$0x1] }
   0x4   :  { %v31_v12 = vld [vmem:[%s853_s1 + $0x38] sm:$0xff]  ;;  %v698_v13 = vcombine.high %v26_v7, %v30_v10  ;;  %v697_v16 = vcombine.low %v26_v7, %v30_v10  ;;  %v252_v21 = vunpack.c.0.s8 %v251_v19  ;;  %v359_v38 = vunpack.c.0.s8 %v358_v29 }
   0x5   :  { %76 = vmatprep.subr.bf16.mxu0 %v694_v4  ;;  %v700_v14 = vcombine.high %v27_v11, %v31_v12  ;;  %117 = vmatprep.subr.bf16.mxu1 %v696_v8  ;;  %v699_v17 = vcombine.low %v27_v11, %v31_v12 }
   0x6   :  { %77 = vmatpush1.bf16.msra.mxu0 %v693_v6  ;;  %118 = vmatpush1.bf16.msra.mxu1 %v695_v9  ;;  %v769_v24 = vsub.s32 %v252_v21, %v254_v22  ;;  %v779_v47 = vsub.s32 %v359_v38, %v254_v22 }
   0x7   :  { %158 = vmatprep.subr.bf16.mxu0 %v698_v13  ;;  %199 = vmatprep.subr.bf16.mxu1 %v700_v14 }
   0x9   :  { %701 = vmatmul.mubr.msk.bf16.vlgmr.msra.gmra.mrb[0].mxu0 %vm72_vm0, %v23_v15  ;;  %702 = vmatmul.mubr.msk.bf16.vlgmr.msra.gmra.mrb[0].mxu1 %vm72_vm0, %v23_v15 }
   0xa   :  { %159 = vmatpush1.bf16.msra.mxu0 %v697_v16  ;;  %200 = vmatpush1.bf16.msra.mxu1 %v699_v17 }
   0xb   :  { %190 = vmatprep.mubr.bf16.mxu0 %v714_v3  ;;  %231 = vmatprep.mubr.bf16.mxu1 %v714_v3 }
  0x11   :  { %703 = vmatmul.mubr.msk.bf16.vlgmr.msra.gmra.mrb[4].mxu0 %vm72_vm0, %v23_v15  ;;  %704 = vmatmul.mubr.msk.bf16.vlgmr.msra.gmra.mrb[4].mxu1 %vm72_vm0, %v23_v15 }
  0xdc   :  { %v110_v23 = vpop.f32.mrb[0].mxu0  ;;  %v151_v25 = vpop.f32.mrb[0].mxu1 }
  0xdd   :  { %v112_v26 = vpop.f32.mrb[1].mxu0  ;;  %v153_v30 = vpop.f32.mrb[1].mxu1 }
  0xde   :  { %v248_v27 = vcombine.low %v110_v23, %v112_v26  ;;  %v114_v31 = vpop.f32.mrb[2].mxu0  ;;  %v249_v32 = vcombine.low %v151_v25, %v153_v30  ;;  %v155_v33 = vpop.f32.mrb[2].mxu1 }
  0xdf   :  { %v115_v34 = vpop.f32.mrb[3].mxu0  ;;  %v156_v36 = vpop.f32.mrb[3].mxu1 }
  0xe0   :  { %v256_v35 = vrot.slane %v248_v27, %v769_v24  ;;  %v263_v37 = vrot.slane %v249_v32, %v769_v24 }
  0xe2   :  { %v264_v39 = vcombine.low %v256_v35, %v263_v37  ;;  %v709_v40 = vcombine.low %v263_v37, %v263_v37 }
  0xe4   :  { %v773_v41 = vpop.f32.mrb[4].mxu0  ;;  %v302_v42 = vrot.slane %v264_v39, %v769_v24  ;;  %v309_v43 = vrot.slane %v709_v40, %v769_v24  ;;  %v520_v44 = vmul.f32 %v264_v39, %v264_v39  ;;  %v777_v45 = vpop.f32.mrb[4].mxu1 }
  0xe5   :  { %v194_v46 = vpop.f32.mrb[5].mxu0  ;;  %v235_v49 = vpop.f32.mrb[5].mxu1 }
  0xe6   :  { %v265_v48 = vcombine.low %v773_v41, %v194_v46  ;;  %v196_v50 = vpop.f32.mrb[6].mxu0  ;;  %v310_v51 = vcombine.high %v302_v42, %v302_v42  ;;  %v311_v52 = vcombine.high %v309_v43, %v309_v43  ;;  %v405_v53 = vsel %vm404_vm1, %v302_v42, 0.0  ;;  %v237_v55 = vpop.f32.mrb[6].mxu1 }
  0xe7   :  { %v419_v54 = vsel %vm404_vm1, %v309_v43, 0.0  ;;  %v197_v56 = vpop.f32.mrb[7].mxu0  ;;  %v406_v57 = vrot.slane %v405_v53, 4  ;;  %v524_v59 = vcombine.high %v520_v44, %v520_v44  ;;  %v531_v60 = vrot.slane %v520_v44, %v769_v24  ;;  %v238_v61 = vpop.f32.mrb[7].mxu1 }
  0xe8   :  { %v420_v58 = vrot.slane %v419_v54, 4  ;;  %v705_v62 = vpack.c.bf16 %v310_v51, %v302_v42  ;;  %v706_v63 = vpack.c.bf16 %v311_v52, %v309_v43  ;;  %v412_v0 = vsel %vm404_vm1, %v310_v51, 0.0 }
  0xe9   :  { %v426_v1 = vsel %vm404_vm1, %v311_v52, 0.0  ;;  %v407_v2 = vadd.f32 %v406_v57, %v405_v53  ;;  %v413_v3 = vrot.slane %v412_v0, 4  ;;  %v538_v8 = vrot.slane %v524_v59, %v769_v24 }
  0xea   :  { %v421_v4 = vadd.f32 %v420_v58, %v419_v54  ;;  %v427_v5 = vrot.slane %v426_v1, 4  ;;  %v363_v6 = vrot.slane %v705_v62, %v779_v47  ;;  %v370_v7 = vrot.slane %v706_v63, %v779_v47 }
  0xeb   :  { %v539_v9 = vcombine.high %v531_v60, %v531_v60  ;;  %v408_v10 = vrot.slane %v407_v2, 2  ;;  %v414_v11 = vadd.f32 %v413_v3, %v412_v0  ;;  %v566_v15 = vsel %vm404_vm1, %v531_v60, 0.0 }
  0xec   :  { %v422_v12 = vrot.slane %v421_v4, 2  ;;  %v428_v13 = vadd.f32 %v427_v5, %v426_v1  ;;  %v385_v14 = vcombine.low %v363_v6, %v370_v7  ;;  %v540_v21 = vcombine.high %v538_v8, %v538_v8 }
  0xed   :  { %v573_v16 = vsel %vm404_vm1, %v539_v9, 0.0  ;;  %v409_v17 = vadd.f32 %v408_v10, %v407_v2  ;;  %v415_v18 = vrot.slane %v414_v11, 2  ;;  %v567_v22 = vrot.slane %v566_v15, 4 }
  0xee   :  { %v423_v19 = vadd.f32 %v422_v12, %v421_v4  ;;  %v429_v20 = vrot.slane %v428_v13, 2  ;;  %v574_v23 = vrot.slane %v573_v16, 4  ;;  %v580_v25 = vsel %vm404_vm1, %v538_v8, 0.0 }
  0xef   :  { %v410_v26 = vrot.slane %v409_v17, 1  ;;  %v416_v27 = vadd.f32 %v415_v18, %v414_v11  ;;  %v568_v30 = vadd.f32 %v567_v22, %v566_v15  ;;  %v581_v34 = vrot.slane %v580_v25, 4 }
  0xf0   :  { %v424_v28 = vrot.slane %v423_v19, 1  ;;  %v430_v29 = vadd.f32 %v429_v20, %v428_v13  ;;  %v575_v31 = vadd.f32 %v574_v23, %v573_v16  ;;  %v587_v38 = vsel %vm404_vm1, %v540_v21, 0.0 }
  0xf1   :  { %v417_v32 = vrot.slane %v416_v27, 1  ;;  %v411_v35 = vadd.f32 %v410_v26, %v409_v17  ;;  %v569_v37 = vrot.slane %v568_v30, 2  ;;  %v273_v41 = vrot.slane %v265_v48, %v769_v24 }
  0xf2   :  { %v431_v33 = vrot.slane %v430_v29, 1  ;;  %v425_v36 = vadd.f32 %v424_v28, %v423_v19  ;;  %v266_v42 = vcombine.low %v777_v45, %v235_v49  ;;  %v576_v43 = vrot.slane %v575_v31, 2 }
  0xf3   :  { %v418_v39 = vadd.f32 %v417_v32, %v416_v27  ;;  %v797_v51 = vadd.f32 %v569_v37, %v568_v30  ;;  %v582_v52 = vadd.f32 %v581_v34, %v580_v25  ;;  %v588_v53 = vrot.slane %v587_v38, 4 }
  0xf4   :  { %v432_v40 = vadd.f32 %v431_v33, %v430_v29  ;;  %v280_v50 = vrot.slane %v266_v42, %v769_v24  ;;  %v805_v48 = vadd.f32 %v576_v43, %v575_v31  ;;  %v393_v59 = vrot.slane %v385_v14, %v779_v47 }
  0xf5   :  { %v469_v44 = vcombine.low %v411_v35, %v418_v39  ;;  %v583_v60 = vrot.slane %v582_v52, 2  ;;  %v589_v61 = vadd.f32 %v588_v53, %v587_v38  ;;  %v571_v62 = vrot.slane %v797_v51, 1 }
  0xf6   :  { %v470_v46 = vcombine.low %v425_v36, %v432_v40  ;;  %v281_v56 = vcombine.low %v273_v41, %v280_v50  ;;  %v710_v57 = vcombine.low %v280_v50, %v280_v50  ;;  %v578_v2 = vrot.slane %v805_v48, 1 }
  0xf7   :  { %v800_v54 = vrot.slane %v469_v44, %v779_v47  ;;  %v590_v10 = vrot.slane %v589_v61, 2  ;;  %v584_v18 = vadd.f32 %v583_v60, %v582_v52 }
  0xf8   :  { %v803_v55 = vrot.slane %v470_v46, %v779_v47  ;;  %v319_v49 = vrot.slane %v281_v56, %v769_v24  ;;  %v326_v58 = vrot.slane %v710_v57, %v769_v24  ;;  %v521_v5 = vmul.f32 %v281_v56, %v281_v56 }
  0xf9   :  { %v591_v27 = vadd.f32 %v590_v10, %v589_v61  ;;  %v585_v35 = vrot.slane %v584_v18, 1 }
  0xfa   :  { %v501_v45 = vcombine.low %v800_v54, %v803_v55  ;;  %v327_v63 = vcombine.high %v319_v49, %v319_v49  ;;  %v328_v0 = vcombine.high %v326_v58, %v326_v58  ;;  %v433_v1 = vsel %vm404_vm1, %v319_v49, 0.0 }
  0xfb   :  { %v434_v3 = vrot.slane %v433_v1, 4  ;;  %v447_v4 = vsel %vm404_vm1, %v326_v58, 0.0  ;;  %v541_v21 = vcombine.high %v521_v5, %v521_v5  ;;  %v548_v26 = vrot.slane %v521_v5, %v769_v24 }
  0xfc   :  { %v707_v6 = vpack.c.bf16 %v327_v63, %v319_v49  ;;  %v708_v7 = vpack.c.bf16 %v328_v0, %v326_v58  ;;  %v440_v8 = vsel %vm404_vm1, %v327_v63, 0.0  ;;  %v448_v9 = vrot.slane %v447_v4, 4 }
  0xfd   :  { %v435_v11 = vadd.f32 %v434_v3, %v433_v1  ;;  %v441_v12 = vrot.slane %v440_v8, 4  ;;  %v454_v13 = vsel %vm404_vm1, %v328_v0, 0.0  ;;  %v555_v30 = vrot.slane %v541_v21, %v769_v24 }
  0xfe   :  { %v377_v14 = vrot.slane %v707_v6, %v779_v47  ;;  %v384_v15 = vrot.slane %v708_v7, %v779_v47  ;;  %v449_v16 = vadd.f32 %v448_v9, %v447_v4  ;;  %v455_v17 = vrot.slane %v454_v13, 4 }
  0xff   :  { %v436_v19 = vrot.slane %v435_v11, 2  ;;  %v442_v20 = vadd.f32 %v441_v12, %v440_v8  ;;  %v556_v34 = vcombine.high %v548_v26, %v548_v26  ;;  %v557_v38 = vcombine.high %v555_v30, %v555_v30 }
 0x100   :  { %v386_v22 = vcombine.low %v377_v14, %v384_v15  ;;  %v450_v23 = vrot.slane %v449_v16, 2  ;;  %v456_v25 = vadd.f32 %v455_v17, %v454_v13  ;;  %v594_v42 = vsel %vm404_vm1, %v548_v26, 0.0 }
 0x101   :  { %v437_v28 = vadd.f32 %v436_v19, %v435_v11  ;;  %v443_v29 = vrot.slane %v442_v20, 2  ;;  %v592_v43 = vrot.slane %v591_v27, 1  ;;  %v595_v46 = vrot.slane %v594_v42, 4 }
 0x102   :  { %v400_v31 = vrot.slane %v386_v22, %v779_v47  ;;  %v451_v32 = vadd.f32 %v450_v23, %v449_v16  ;;  %v457_v33 = vrot.slane %v456_v25, 2  ;;  %v601_v50 = vsel %vm404_vm1, %v556_v34, 0.0 }
 0x103   :  { %v438_v36 = vrot.slane %v437_v28, 1  ;;  %v444_v37 = vadd.f32 %v443_v29, %v442_v20  ;;  %v602_v53 = vrot.slane %v601_v50, 4  ;;  %v608_v56 = vsel %vm404_vm1, %v555_v30, 0.0 }
 0x104   :  { %v401_v39 = vcombine.low %v393_v59, %v400_v31  ;;  %v452_v40 = vrot.slane %v451_v32, 1  ;;  %v458_v41 = vadd.f32 %v457_v33, %v456_v25  ;;  %v596_v49 = vadd.f32 %v595_v46, %v594_v42 }
 0x105   :  { %v445_v44 = vrot.slane %v444_v37, 1  ;;  %v439_v24 = vadd.f32 %v438_v36, %v437_v28  ;;  %v609_v58 = vrot.slane %v608_v56, 4  ;;  %v615_v59 = vsel %vm404_vm1, %v557_v38, 0.0 }
 0x106   :  { %403 = vst [vmem:[%s855_s2] sm:$0xff] %v401_v39  ;;  %v459_v52 = vrot.slane %v458_v41, 1  ;;  %v453_v60 = vadd.f32 %v452_v40, %v451_v32  ;;  %v603_v63 = vadd.f32 %v602_v53, %v601_v50  ;;  %v616_v0 = vrot.slane %v615_v59, 4 }
 0x107   :  { %v446_v57 = vadd.f32 %v445_v44, %v444_v37  ;;  %v593_v1 = vadd.f32 %v592_v43, %v591_v27  ;;  %v597_v4 = vrot.slane %v596_v49, 2  ;;  %v610_v5 = vadd.f32 %v609_v58, %v608_v56 }
 0x108   :  { %v460_v61 = vadd.f32 %v459_v52, %v458_v41  ;;  %v579_v6 = vadd.f32 %v578_v2, %v805_v48  ;;  %v604_v8 = vrot.slane %v603_v63, 2  ;;  %v617_v9 = vadd.f32 %v616_v0, %v615_v59 }
 0x109   :  { %v471_v3 = vcombine.low %v439_v24, %v446_v57  ;;  %v586_v10 = vadd.f32 %v585_v35, %v584_v18  ;;  %v598_v12 = vadd.f32 %v597_v4, %v596_v49  ;;  %v611_v13 = vrot.slane %v610_v5, 2 }
 0x10a   :  { %v472_v7 = vcombine.low %v453_v60, %v460_v61  ;;  %v605_v15 = vadd.f32 %v604_v8, %v603_v63  ;;  %v618_v16 = vrot.slane %v617_v9, 2  ;;  %v572_v17 = vadd.f32 %v571_v62, %v797_v51 }
 0x10b   :  { %v493_v11 = vrot.slane %v471_v3, %v779_v47  ;;  %v631_v19 = vcombine.low %v586_v10, %v593_v1  ;;  %v599_v20 = vrot.slane %v598_v12, 1  ;;  %v612_v21 = vadd.f32 %v611_v13, %v610_v5 }
 0x10c   :  { %v500_v14 = vrot.slane %v472_v7, %v779_v47  ;;  %v606_v2 = vrot.slane %v605_v15, 1  ;;  %v619_v22 = vadd.f32 %v618_v16, %v617_v9  ;;  %v509_v18 = vrot.slane %v501_v45, %v779_v47 }
 0x10d   :  { %v630_v23 = vcombine.low %v572_v17, %v579_v6  ;;  %v613_v25 = vrot.slane %v612_v21, 1  ;;  %v600_v27 = vadd.f32 %v599_v20, %v598_v12  ;;  %v647_v51 = vrot.slane %v631_v19, %v779_v47 }
 0x10e   :  { %v502_v48 = vcombine.low %v493_v11, %v500_v14  ;;  %v607_v28 = vadd.f32 %v606_v2, %v605_v15  ;;  %v620_v29 = vrot.slane %v619_v22, 1 }
 0x10f   :  { %v614_v30 = vadd.f32 %v613_v25, %v612_v21  ;;  %v640_v33 = vrot.slane %v630_v23, %v779_v47 }
 0x110   :  { %v516_v26 = vrot.slane %v502_v48, %v779_v47  ;;  %v621_v31 = vadd.f32 %v620_v29, %v619_v22  ;;  %v632_v32 = vcombine.low %v600_v27, %v607_v28 }
 0x111   :  { %v662_v55 = vcombine.low %v640_v33, %v647_v51 }
 0x112   :  { %v517_v62 = vcombine.low %v509_v18, %v516_v26  ;;  %v633_v54 = vcombine.low %v614_v30, %v621_v31  ;;  %v654_v45 = vrot.slane %v632_v32, %v779_v47 }
 0x113   :  { %v670_v36 = vrot.slane %v662_v55, %v779_v47 }
 0x114   :  { %519 = vst [vmem:[%s856_s3] sm:$0xff] %v517_v62  ;;  %v661_v34 = vrot.slane %v633_v54, %v779_v47 }
 0x116   :  { %v663_v35 = vcombine.low %v654_v45, %v661_v34 }
 0x118   :  { %v677_v37 = vrot.slane %v663_v35, %v779_v47 }
 0x11a   :  { %v678_v38 = vcombine.low %v670_v36, %v677_v37 }
 0x11c   :  { %680 = vst [vmem:[%s857_s4] sm:$0xff] %v678_v38 }

// kernel: wgan_generator_forward.10
= control target key start
LH: loop header
LB: loop body
LE: loop exit
PB: predicated region body
PF: predicated region fallthrough
CT: control target
= control target key end

     0   :  { %v19_v0 = vlaneseq  ;;  %v284_v2 = vmov 1983009808   ;;  %v285_v53 = vmov 1966171168   ;;  %s318_s0 = inlined_call_operand.vmem [shape: bf16[2,1024], index: 0, kind: input, shape index: {}]   ;;  %s319_s1 = inlined_call_operand.vmem [shape: f32[1,1024], index: 1, kind: input, shape index: {}]   ;;  %s320_s2 = inlined_call_operand.vmem [shape: f32[1,1024], index: 2, kind: input, shape index: {}]   ;;  %s321_s3 = inlined_call_operand.vmem [shape: bf16[2,1024], index: 3, kind: output, shape index: {}]  }
   0x1   :  { %v14_v1 = vld [vmem:[%s318_s0] sm:$0xff]  ;;  %v54_v3 = vunpack.c.l.s4 %v284_v2  ;;  %v228_v54 = vunpack.c.l.s4 %v285_v53 }
   0x2   :  { %v20_v4 = vshrl.u32 %v19_v0, 7  ;;  %v15_v5 = vunpack.c.l.bf16 %v14_v1  ;;  %v16_v6 = vunpack.c.h.bf16 %v14_v1  ;;  %v17_v7 = vld [vmem:[%s319_s1] sm:$0xff] }
   0x3   :  { %v55_v8 = vunpack.c.0.s8 %v54_v3  ;;  %v89_v17 = vld [vmem:[%s320_s2] sm:$0xff]  ;;  %v229_v60 = vunpack.c.0.s8 %v228_v54 }
   0x4   :  { %v21_v9 = vsub.s32 0, %v20_v4  ;;  %v25_v10 = vsub.s32 1, %v20_v4  ;;  %v29_v11 = vsub.s32 2, %v20_v4  ;;  %v33_v12 = vsub.s32 3, %v20_v4 }
   0x5   :  { %v37_v13 = vsub.s32 4, %v20_v4  ;;  %v41_v14 = vsub.s32 5, %v20_v4  ;;  %v45_v15 = vsub.s32 6, %v20_v4  ;;  %v49_v16 = vsub.s32 7, %v20_v4 }
   0x6   :  { %v22_v18 = vrot.slane %v17_v7, %v21_v9  ;;  %v26_v19 = vrot.slane %v17_v7, %v25_v10  ;;  %v30_v20 = vrot.slane %v17_v7, %v29_v11  ;;  %v34_v21 = vrot.slane %v17_v7, %v33_v12 }
   0x7   :  { %v38_v22 = vrot.slane %v17_v7, %v37_v13  ;;  %v42_v23 = vrot.slane %v17_v7, %v41_v14  ;;  %v46_v24 = vrot.slane %v17_v7, %v45_v15  ;;  %v50_v25 = vrot.slane %v17_v7, %v49_v16 }
   0x8   :  { %v51_v26 = vcombine.low %v22_v18, %v26_v19  ;;  %v52_v27 = vcombine.low %v30_v20, %v34_v21  ;;  %v58_v28 = vsub.s32 %v55_v8, %v20_v4  ;;  %v94_v29 = vrot.slane %v89_v17, %v21_v9 }
   0x9   :  { %v68_v30 = vcombine.low %v38_v22, %v42_v23  ;;  %v69_v31 = vcombine.low %v46_v24, %v50_v25  ;;  %v98_v32 = vrot.slane %v89_v17, %v25_v10  ;;  %v102_v33 = vrot.slane %v89_v17, %v29_v11 }
   0xa   :  { %v59_v34 = vrot.slane %v51_v26, %v58_v28  ;;  %v66_v35 = vrot.slane %v52_v27, %v58_v28  ;;  %v106_v36 = vrot.slane %v89_v17, %v33_v12  ;;  %v110_v37 = vrot.slane %v89_v17, %v37_v13 }
   0xb   :  { %v76_v38 = vrot.slane %v68_v30, %v58_v28  ;;  %v83_v39 = vrot.slane %v69_v31, %v58_v28  ;;  %v114_v40 = vrot.slane %v89_v17, %v41_v14  ;;  %v118_v41 = vrot.slane %v89_v17, %v45_v15 }
   0xc   :  { %v67_v42 = vcombine.low %v59_v34, %v66_v35  ;;  %v122_v43 = vrot.slane %v89_v17, %v49_v16  ;;  %v123_v44 = vcombine.low %v94_v29, %v98_v32  ;;  %v124_v45 = vcombine.low %v102_v33, %v106_v36 }
   0xd   :  { %v84_v46 = vcombine.low %v76_v38, %v83_v39  ;;  %v140_v47 = vcombine.low %v110_v37, %v114_v40  ;;  %v232_v2 = vsub.s32 %v229_v60, %v20_v4 }
   0xe   :  { %v87_v48 = vmul.f32 %v67_v42, %v15_v5  ;;  %v131_v49 = vrot.slane %v123_v44, %v58_v28  ;;  %v138_v50 = vrot.slane %v124_v45, %v58_v28  ;;  %v141_v51 = vcombine.low %v118_v41, %v122_v43 }
   0xf   :  { %v148_v52 = vrot.slane %v140_v47, %v58_v28  ;;  %v88_v55 = vmul.f32 %v84_v46, %v16_v6 }
  0x10   :  { %v139_v56 = vcombine.low %v131_v49, %v138_v50  ;;  %v155_v57 = vrot.slane %v141_v51, %v58_v28 }
  0x12   :  { %v156_v58 = vcombine.low %v148_v52, %v155_v57  ;;  %v159_v59 = vadd.f32 %v139_v56, %v87_v48 }
  0x14   :  { %v160_v61 = vadd.f32 %v156_v58, %v88_v55  ;;  %v161_v62 = vmax.f32 %v159_v59, 0.0 }
  0x16   :  { %v162_v63 = vmax.f32 %v160_v61, 0.0  ;;  %v165_v0 = vcombine.high %v161_v62, %v161_v62  ;;  %v172_v1 = vrot.slane %v161_v62, %v58_v28 }
  0x18   :  { %v179_v3 = vrot.slane %v165_v0, %v58_v28  ;;  %v180_v5 = vcombine.high %v172_v1, %v172_v1  ;;  %v182_v7 = vcombine.high %v162_v63, %v162_v63  ;;  %v189_v8 = vrot.slane %v162_v63, %v58_v28 }
  0x1a   :  { %v181_v9 = vcombine.high %v179_v3, %v179_v3  ;;  %v196_v10 = vrot.slane %v182_v7, %v58_v28  ;;  %v197_v11 = vcombine.high %v189_v8, %v189_v8  ;;  %v278_v12 = vpack.c.bf16 %v180_v5, %v172_v1 }
  0x1c   :  { %v198_v6 = vcombine.high %v196_v10, %v196_v10  ;;  %v279_v13 = vpack.c.bf16 %v181_v9, %v179_v3  ;;  %v280_v14 = vpack.c.bf16 %v197_v11, %v189_v8  ;;  %v233_v15 = vrot.slane %v278_v12, %v232_v2 }
  0x1e   :  { %v281_v16 = vpack.c.bf16 %v198_v6, %v196_v10  ;;  %v240_v17 = vrot.slane %v279_v13, %v232_v2  ;;  %v247_v18 = vrot.slane %v280_v14, %v232_v2 }
  0x20   :  { %v254_v19 = vrot.slane %v281_v16, %v232_v2  ;;  %v255_v20 = vcombine.low %v233_v15, %v240_v17 }
  0x22   :  { %v256_v21 = vcombine.low %v247_v18, %v254_v19  ;;  %v263_v22 = vrot.slane %v255_v20, %v232_v2 }
  0x24   :  { %v270_v4 = vrot.slane %v256_v21, %v232_v2 }
  0x26   :  { %v271_v23 = vcombine.low %v263_v22, %v270_v4 }
  0x28   :  { %273 = vst [vmem:[%s321_s3] sm:$0xff] %v271_v23 }

// kernel: tile.38
= control target key start
LH: loop header
LB: loop body
LE: loop exit
PB: predicated region body
PF: predicated region fallthrough
CT: control target
= control target key end

     0   :  { %s22_s0 = inlined_call_operand.vmem [shape: f32[32], index: 0, kind: input, shape index: {}]   ;;  %s23_s1 = inlined_call_operand.vmem [shape: f32[4,32], index: 1, kind: output, shape index: {}]  }
   0x1   :  { %v4_v0 = vld [vmem:[%s22_s0] ss:$0 sm:$0xff] }
   0x2   :  { %5 = vst [vmem:[%s23_s1] sm:$0xf] %v4_v0 }

// kernel: wgan_generator_forward.11
= control target key start
LH: loop header
LB: loop body
LE: loop exit
PB: predicated region body
PF: predicated region fallthrough
CT: control target
= control target key end

     0   :  { %vm377_vm0 = vcmask 523264   ;;  %s968_s1 = inlined_call_operand.vmem [shape: bf16[576,128], index: 1, kind: input, shape index: {}]   ;;  %s969_s0 = inlined_call_operand.vmem [shape: bf16[32,576], index: 0, kind: input, shape index: {}]   ;;  %s970_s2 = inlined_call_operand.vmem [shape: bf16[32,128], index: 2, kind: output, shape index: {0}]   ;;  %s971_s3 = inlined_call_operand.vmem [shape: f32[1,1,128], index: 3, kind: output, shape index: {1}]   ;;  %s972_s4 = inlined_call_operand.vmem [shape: f32[1,1,128], index: 4, kind: output, shape index: {2}]  }
   0x1   :  { %v743_v0 = vld [vmem:[%s968_s1 + $0x40] sm:$0xff]   ;;  %v747_v4 = vld [vmem:[%s968_s1 + $0x48] sm:$0xff]   ;;  %v751_v8 = vld [vmem:[%s968_s1 + $0x50] sm:$0xff]  }
   0x2   :  { %v744_v1 = vld [vmem:[%s968_s1 + $0xc0] sm:$0xff]   ;;  %669 = vmatprep.subr.bf16.mxu0 %v743_v0  ;;  %v748_v5 = vld [vmem:[%s968_s1 + $0xc8] sm:$0xff]   ;;  %v752_v9 = vld [vmem:[%s968_s1 + $0xd0] sm:$0xff]  }
   0x3   :  { %v745_v2 = vld [vmem:[%s968_s1] sm:$0xff]   ;;  %697 = vmatprep.subr.bf16.mxu1 %v744_v1  ;;  %v749_v6 = vld [vmem:[%s968_s1 + $0x8] sm:$0xff]   ;;  %v753_v10 = vld [vmem:[%s968_s1 + $0x10] sm:$0xff]  }
   0x4   :  { %v746_v3 = vld [vmem:[%s968_s1 + $0x80] sm:$0xff]   ;;  %670 = vmatpush3.bf16.msra.mxu0 %v745_v2  ;;  %v750_v7 = vld [vmem:[%s968_s1 + $0x88] sm:$0xff]   ;;  %v754_v11 = vld [vmem:[%s968_s1 + $0x90] sm:$0xff]  }
   0x5   :  { %698 = vmatpush3.bf16.msra.mxu1 %v746_v3  ;;  %671 = vmatprep.subr.bf16.mxu0 %v747_v4  ;;  %v755_v12 = vld [vmem:[%s968_s1 + $0x58] sm:$0xff]   ;;  %v759_v16 = vld [vmem:[%s968_s1 + $0x60] sm:$0xff]   ;;  %v763_v20 = vld [vmem:[%s968_s1 + $0x68] sm:$0xff]  }
   0x6   :  { %699 = vmatprep.subr.bf16.mxu1 %v748_v5  ;;  %v756_v13 = vld [vmem:[%s968_s1 + $0xd8] sm:$0xff]   ;;  %v760_v17 = vld [vmem:[%s968_s1 + $0xe0] sm:$0xff]   ;;  %v764_v21 = vld [vmem:[%s968_s1 + $0xe8] sm:$0xff]  }
   0x7   :  { %v757_v14 = vld [vmem:[%s968_s1 + $0x18] sm:$0xff]   ;;  %v761_v18 = vld [vmem:[%s968_s1 + $0x20] sm:$0xff]   ;;  %v765_v22 = vld [vmem:[%s968_s1 + $0x28] sm:$0xff]  }
   0x8   :  { %672 = vmatpush3.bf16.msra.mxu0 %v749_v6  ;;  %v758_v15 = vld [vmem:[%s968_s1 + $0x98] sm:$0xff]   ;;  %v762_v19 = vld [vmem:[%s968_s1 + $0xa0] sm:$0xff]   ;;  %v766_v23 = vld [vmem:[%s968_s1 + $0xa8] sm:$0xff]  }
   0x9   :  { %700 = vmatpush3.bf16.msra.mxu1 %v750_v7  ;;  %673 = vmatprep.subr.bf16.mxu0 %v751_v8  ;;  %v767_v24 = vld [vmem:[%s968_s1 + $0x70] sm:$0xff]   ;;  %v771_v28 = vld [vmem:[%s968_s1 + $0x78] sm:$0xff]   ;;  %v780_v35 = vld [vmem:[%s969_s0 + $0xc] ss:$20 sps:$4 sm:$0xff]  }
   0xa   :  { %701 = vmatprep.subr.bf16.mxu1 %v752_v9  ;;  %v768_v25 = vld [vmem:[%s968_s1 + $0xf0] sm:$0xff]   ;;  %v772_v29 = vld [vmem:[%s968_s1 + $0xf8] sm:$0xff]   ;;  %v781_v36 = vld [vmem:[%s968_s1 + $0x100] sm:$0xff]   ;;  %465 = vmatprep.mubr.bf16.mxu1 %v780_v35 }
   0xb   :  { %v769_v26 = vld [vmem:[%s968_s1 + $0x30] sm:$0xff]   ;;  %v773_v30 = vld [vmem:[%s968_s1 + $0x38] sm:$0xff]   ;;  %v782_v37 = vld [vmem:[%s968_s1 + $0x108] sm:$0xff]  }
   0xc   :  { %674 = vmatpush3.bf16.msra.mxu0 %v753_v10  ;;  %v770_v27 = vld [vmem:[%s968_s1 + $0xb0] sm:$0xff]   ;;  %v774_v31 = vld [vmem:[%s968_s1 + $0xb8] sm:$0xff]   ;;  %v783_v38 = vld [vmem:[%s969_s0 + $0x2c] ss:$20 sps:$4 sm:$0xff]  }
   0xd   :  { %702 = vmatpush3.bf16.msra.mxu1 %v754_v11  ;;  %675 = vmatprep.subr.bf16.mxu0 %v755_v12  ;;  %v775_v32 = vld [vmem:[%s969_s0] ss:$20 sps:$4 sm:$0xff]   ;;  %v777_v33 = vld [vmem:[%s969_s0 + $0x4] ss:$20 sps:$4 sm:$0xff]   ;;  %v778_v34 = vld [vmem:[%s969_s0 + $0x8] ss:$20 sps:$4 sm:$0xff]  }
   0xe   :  { %703 = vmatprep.subr.bf16.mxu1 %v756_v13  ;;  %416 = vmatprep.mubr.bf16.mxu0 %v777_v33  ;;  %v785_v39 = vld [vmem:[%s969_s0 + $0x34] ss:$20 sps:$4 sm:$0xff]   ;;  %v788_v42 = vld [vmem:[%s969_s0 + $0x30] ss:$20 sps:$4 sm:$0xff]   ;;  %v790_v44 = vld [vmem:[%s968_s1 + $0x118] sm:$0xff]  }
   0xf   :  { %v787_v40 = vld [vmem:[%s969_s0 + $0x28] ss:$20 sps:$4 sm:$0xff]   ;;  %v789_v41 = vld [vmem:[%s968_s1 + $0x110] sm:$0xff]   ;;  %v792_v45 = vld [vmem:[%s969_s0 + $0x38] ss:$20 sps:$4 sm:$0xff]  }
  0x10   :  { %676 = vmatpush3.bf16.msra.mxu0 %v757_v14  ;;  %v791_v43 = vld [vmem:[%s969_s0 + $0x10] ss:$20 sps:$4 sm:$0xff]  }
  0x11   :  { %704 = vmatpush3.bf16.msra.mxu1 %v758_v15  ;;  %677 = vmatprep.subr.bf16.mxu0 %v759_v16 }
  0x12   :  { %705 = vmatprep.subr.bf16.mxu1 %v760_v17 }
  0x14   :  { %678 = vmatpush3.bf16.msra.mxu0 %v761_v18 }
  0x15   :  { %706 = vmatpush3.bf16.msra.mxu1 %v762_v19  ;;  %679 = vmatprep.subr.bf16.mxu0 %v763_v20 }
  0x16   :  { %707 = vmatprep.subr.bf16.mxu1 %v764_v21 }
  0x18   :  { %680 = vmatpush3.bf16.msra.mxu0 %v765_v22 }
  0x19   :  { %708 = vmatpush3.bf16.msra.mxu1 %v766_v23  ;;  %681 = vmatprep.subr.bf16.mxu0 %v767_v24 }
  0x1a   :  { %709 = vmatprep.subr.bf16.mxu1 %v768_v25 }
  0x1c   :  { %682 = vmatpush3.bf16.msra.mxu0 %v769_v26 }
  0x1d   :  { %710 = vmatpush3.bf16.msra.mxu1 %v770_v27  ;;  %683 = vmatprep.subr.bf16.mxu0 %v771_v28 }
  0x1e   :  { %711 = vmatprep.subr.bf16.mxu1 %v772_v29 }
  0x20   :  { %684 = vmatpush3.bf16.msra.mxu0 %v773_v30 }
  0x21   :  { %712 = vmatpush3.bf16.msra.mxu1 %v774_v31  ;;  %731 = vmatprep.subr.bf16.mxu0 %v781_v36 }
  0x23   :  { %417 = vmatmul.mubr.bf16.vlgmr.msra.gmra.mrb[0].mxu0 %v775_v32 }
  0x24   :  { %466 = vmatmul.mubr.bf16.vlgmr.msra.gmra.mrb[0].mxu1 %v778_v34  ;;  %732 = vmatpush3.bf16.msra.mxu0 %v781_v36 }
  0x25   :  { %733 = vmatprep.subr.bf16.mxu0 %v782_v37  ;;  %424 = vmatprep.mubr.bf16.mxu0 %v783_v38 }
  0x26   :  { %473 = vmatprep.mubr.bf16.mxu1 %v785_v39 }
  0x28   :  { %734 = vmatpush3.bf16.msra.mxu0 %v782_v37 }
  0x29   :  { %735 = vmatprep.subr.bf16.mxu0 %v789_v41 }
  0x2b   :  { %425 = vmatmul.mubr.bf16.gmra.mrb[4].mxu0 %v787_v40 }
  0x2c   :  { %474 = vmatmul.mubr.bf16.gmra.mrb[4].mxu1 %v788_v42  ;;  %739 = vmatprep.mubr.msk.bf16.mxu0 %vm377_vm0, %v791_v43 }
  0x2d   :  { %736 = vmatpush3.bf16.msra.mxu0 %v789_v41 }
  0x2e   :  { %737 = vmatprep.subr.bf16.mxu0 %v790_v44 }
  0x31   :  { %738 = vmatpush3.bf16.msra.mxu0 %v790_v44 }
  0x34   :  { %740 = vmatmul.mubr.msk.bf16.vlgmr.msra.gmra.mrb[8].mxu0 %vm377_vm0, %v792_v45 }
  0xf6   :  { %v685_v46 = vpop.f32.mrb[0].mxu0 }
  0xf7   :  { %v713_v47 = vpop.f32.mrb[0].mxu1  ;;  %v686_v48 = vpop.f32.mrb[1].mxu0 }
  0xf8   :  { %v687_v49 = vadd.f32 %v686_v48, %v685_v46  ;;  %v714_v50 = vpop.f32.mrb[1].mxu1  ;;  %v688_v51 = vpop.f32.mrb[2].mxu0 }
  0xf9   :  { %v715_v52 = vadd.f32 %v714_v50, %v713_v47  ;;  %v716_v53 = vpop.f32.mrb[2].mxu1  ;;  %v689_v54 = vpop.f32.mrb[3].mxu0 }
  0xfa   :  { %v690_v55 = vadd.f32 %v689_v54, %v688_v51  ;;  %v717_v56 = vpop.f32.mrb[3].mxu1 }
  0xfb   :  { %v718_v57 = vadd.f32 %v717_v56, %v716_v53  ;;  %v468_v58 = vadd.f32 %v715_v52, %v687_v49 }
  0xfd   :  { %v471_v59 = vadd.f32 %v718_v57, %v690_v55 }
  0xfe   :  { %v691_v60 = vpop.f32.mrb[4].mxu0 }
  0xff   :  { %v719_v61 = vpop.f32.mrb[4].mxu1  ;;  %v692_v62 = vpop.f32.mrb[5].mxu0 }
 0x100   :  { %v693_v63 = vadd.f32 %v692_v62, %v691_v60  ;;  %v720_v0 = vpop.f32.mrb[5].mxu1  ;;  %v694_v1 = vpop.f32.mrb[6].mxu0 }
 0x101   :  { %v721_v2 = vadd.f32 %v720_v0, %v719_v61  ;;  %v722_v3 = vpop.f32.mrb[6].mxu1  ;;  %v695_v4 = vpop.f32.mrb[7].mxu0 }
 0x102   :  { %v696_v5 = vadd.f32 %v695_v4, %v694_v1  ;;  %v723_v6 = vpop.f32.mrb[7].mxu1 }
 0x103   :  { %v724_v7 = vadd.f32 %v723_v6, %v722_v3  ;;  %v476_v8 = vadd.f32 %v721_v2, %v693_v63 }
 0x105   :  { %v479_v9 = vadd.f32 %v724_v7, %v696_v5 }
 0x107   :  { %v741_v10 = vpop.f32.mrb[8].mxu0 }
 0x108   :  { %v525_v11 = vadd.f32 %v741_v10, %v476_v8  ;;  %v516_v12 = vpop.f32.mrb[9].mxu0 }
 0x109   :  { %v517_v13 = vadd.f32 %v516_v12, %v468_v58  ;;  %v742_v14 = vpop.f32.mrb[10].mxu0 }
 0x10a   :  { %v528_v15 = vadd.f32 %v742_v14, %v479_v9  ;;  %v519_v16 = vpop.f32.mrb[11].mxu0  ;;  %v578_v23 = vmul.f32 %v525_v11, %v525_v11 }
 0x10b   :  { %v520_v17 = vadd.f32 %v519_v16, %v471_v59  ;;  %v576_v19 = vmul.f32 %v517_v13, %v517_v13 }
 0x10c   :  { %v666_v18 = vpack.c.bf16 %v528_v15, %v525_v11  ;;  %v579_v26 = vmul.f32 %v528_v15, %v528_v15 }
 0x10d   :  { %v661_v20 = vpack.c.bf16 %v520_v17, %v517_v13  ;;  %v566_v21 = vadd.f32 %v520_v17, %v517_v13  ;;  %v577_v22 = vmul.f32 %v520_v17, %v520_v17 }
 0x10e   :  { %668 = vst [vmem:[%s970_s2 + $0x8] sm:$0xff] %v666_v18  }
 0x10f   :  { %662 = vst [vmem:[%s970_s2] sm:$0xff] %v661_v20   ;;  %v567_v24 = vadd.f32 %v566_v21, %v525_v11  ;;  %v580_v25 = vadd.f32 %v577_v22, %v576_v19 }
 0x111   :  { %v568_v27 = vadd.f32 %v567_v24, %v528_v15  ;;  %v581_v28 = vadd.f32 %v580_v25, %v578_v23 }
 0x113   :  { %v569_v29 = vrot.slane %v568_v27, 4  ;;  %v582_v30 = vadd.f32 %v581_v28, %v579_v26 }
 0x115   :  { %v570_v31 = vadd.f32 %v569_v29, %v568_v27  ;;  %v583_v32 = vrot.slane %v582_v30, 4 }
 0x117   :  { %v571_v33 = vrot.slane %v570_v31, 2  ;;  %v584_v34 = vadd.f32 %v583_v32, %v582_v30 }
 0x119   :  { %v572_v35 = vadd.f32 %v571_v33, %v570_v31  ;;  %v585_v36 = vrot.slane %v584_v34, 2 }
 0x11b   :  { %v573_v37 = vrot.slane %v572_v35, 1  ;;  %v586_v38 = vadd.f32 %v585_v36, %v584_v34 }
 0x11d   :  { %v574_v39 = vadd.f32 %v573_v37, %v572_v35  ;;  %v587_v40 = vrot.slane %v586_v38, 1 }
 0x11f   :  { %575 = vst [vmem:[%s971_s3] sm:$0x1] %v574_v39  ;;  %v588_v41 = vadd.f32 %v587_v40, %v586_v38 }
 0x121   :  { %589 = vst [vmem:[%s972_s4] sm:$0x1] %v588_v41 }

// kernel: wgan_generator_forward.12
= control target key start
LH: loop header
LB: loop body
LE: loop exit
PB: predicated region body
PF: predicated region fallthrough
CT: control target
= control target key end

     0   :  { %s140_s0 = inlined_call_operand.vmem [shape: bf16[32,128], index: 0, kind: input, shape index: {}]   ;;  %s141_s1 = inlined_call_operand.vmem [shape: f32[1,128], index: 1, kind: input, shape index: {}]   ;;  %s142_s2 = inlined_call_operand.vmem [shape: f32[1,128], index: 2, kind: input, shape index: {}]   ;;  %s143_s3 = inlined_call_operand.vmem [shape: bf16[32,128], index: 3, kind: output, shape index: {}]  }
   0x1   :  { %v83_v0 = vld [vmem:[%s140_s0] sm:$0xff]   ;;  %v100_v4 = vld [vmem:[%s140_s0 + $0x8] sm:$0xff]  }
   0x2   :  { %v72_v1 = vld [vmem:[%s141_s1] ss:$0 sm:$0xff]  ;;  %v84_v2 = vunpack.c.l.bf16 %v83_v0  ;;  %v85_v3 = vunpack.c.h.bf16 %v83_v0  ;;  %v88_v6 = vunpack.c.l.bf16 %v100_v4  ;;  %v89_v7 = vunpack.c.h.bf16 %v100_v4 }
   0x3   :  { %v73_v5 = vld [vmem:[%s142_s2] ss:$0 sm:$0xff] }
   0x4   :  { %v29_v8 = vmul.f32 %v84_v2, %v72_v1  ;;  %v30_v9 = vmul.f32 %v85_v3, %v72_v1  ;;  %v31_v10 = vmul.f32 %v88_v6, %v72_v1  ;;  %v32_v11 = vmul.f32 %v89_v7, %v72_v1 }
   0x6   :  { %v40_v12 = vadd.f32 %v73_v5, %v29_v8  ;;  %v41_v13 = vadd.f32 %v73_v5, %v30_v9  ;;  %v42_v14 = vadd.f32 %v73_v5, %v31_v10  ;;  %v43_v15 = vadd.f32 %v73_v5, %v32_v11 }
   0x8   :  { %v44_v16 = vmax.f32 %v40_v12, 0.0  ;;  %v45_v17 = vmax.f32 %v41_v13, 0.0  ;;  %v46_v18 = vmax.f32 %v42_v14, 0.0  ;;  %v47_v19 = vmax.f32 %v43_v15, 0.0 }
   0xa   :  { %v93_v20 = vpack.c.bf16 %v45_v17, %v44_v16  ;;  %v98_v21 = vpack.c.bf16 %v47_v19, %v46_v18 }
   0xc   :  { %94 = vst [vmem:[%s143_s3] sm:$0xff] %v93_v20   ;;  %101 = vst [vmem:[%s143_s3 + $0x8] sm:$0xff] %v98_v21  }

// kernel: tile.48
= control target key start
LH: loop header
LB: loop body
LE: loop exit
PB: predicated region body
PF: predicated region fallthrough
CT: control target
= control target key end

     0   :  { %s22_s0 = inlined_call_operand.vmem [shape: f32[16], index: 0, kind: input, shape index: {}]   ;;  %s23_s1 = inlined_call_operand.vmem [shape: f32[4,16], index: 1, kind: output, shape index: {}]  }
   0x1   :  { %v4_v0 = vld [vmem:[%s22_s0] ss:$0 sm:$0xff] }
   0x2   :  { %5 = vst [vmem:[%s23_s1] sm:$0xf] %v4_v0 }

// kernel: tile.49
= control target key start
LH: loop header
LB: loop body
LE: loop exit
PB: predicated region body
PF: predicated region fallthrough
CT: control target
= control target key end

     0   :  { %vm7_vm0 = vcmask 130048   ;;  %s37_s8 = smov 16   ;;  %s38_s9 = smov 32   ;;  %vm13_vm1 = vcmask 523648   ;;  %vm19_vm2 = vcmask 392448   ;;  %vm25_vm3 = vcmask 261248   ;;  %s55_s0 = inlined_call_operand.vmem [shape: f32[4,16], index: 0, kind: input, shape index: {}]   ;;  %s56_s1 = inlined_call_operand.vmem [shape: f32[64], index: 1, kind: output, shape index: {}]  }
   0x1   :  { %v4_v0 = vld [vmem:[%s55_s0] sm:$0xf]  ;;  %s36_s0 = smov 48  }
   0x2   :  { %5 = vst [vmem:[#allocation1] sm:$0xf] %v4_v0 }
   0x9   :  { %v10_v1 = vld [vmem:[#allocation1 + $0x3] sm:$0x1]   ;;  %v22_v2 = vld [vmem:[#allocation1 + $0x1] sm:$0x1]   ;;  %v6_v3 = vld [vmem:[#allocation1] sm:$0x1]  }
   0xa   :  { %11 = vrot.lane.b32.xlu0 %v10_v1, %s36_s0  ;;  %23 = vrot.lane.b32.xlu1 %v22_v2, %s37_s8  ;;  %v16_v4 = vld [vmem:[#allocation1 + $0x2] sm:$0x1]   ;;  %8 = vst.msk [vmem:[#allocation0] sm:$0x1] %vm7_vm0, %v6_v3  }
   0xe   :  { %17 = vrot.lane.b32.xlu0 %v16_v4, %s38_s9 }
  0x7c   :  { %v12_v5 = vpop.permute.xlu0 %11   ;;  %v24_v6 = vpop.permute.xlu1 %23  }
  0x7d   :  { %14 = vst.msk [vmem:[#allocation0] sm:$0x1] %vm13_vm1, %v12_v5  }
  0x80   :  { %v18_v7 = vpop.permute.xlu0 %17  }
  0x81   :  { %20 = vst.msk [vmem:[#allocation0] sm:$0x1] %vm19_vm2, %v18_v7  }
  0x82   :  { %26 = vst.msk [vmem:[#allocation0] sm:$0x1] %vm25_vm3, %v24_v6  }
  0x89   :  { %v30_v8 = vld [vmem:[#allocation0] sm:$0x1] }
  0x8a   :  { %32 = vst [vmem:[%s56_s1] sm:$0x1] %v30_v8 }

// kernel: wgan_generator_forward.13
= control target key start
LH: loop header
LB: loop body
LE: loop exit
PB: predicated region body
PF: predicated region fallthrough
CT: control target
= control target key end

     0   :  { %vm347_vm0 = vcmask 261120   ;;  %s1259_s1 = inlined_call_operand.vmem [shape: bf16[288,128], index: 1, kind: input, shape index: {}]   ;;  %s1260_s0 = inlined_call_operand.vmem [shape: bf16[128,288], index: 0, kind: input, shape index: {}]   ;;  %s1261_s2 = inlined_call_operand.vmem [shape: bf16[128,128], index: 2, kind: output, shape index: {0}]   ;;  %s1262_s3 = inlined_call_operand.vmem [shape: f32[1,1,128], index: 3, kind: output, shape index: {1}]   ;;  %s1263_s4 = inlined_call_operand.vmem [shape: f32[1,1,128], index: 4, kind: output, shape index: {2}]  }
   0x1   :  { %v1008_v0 = vld [vmem:[%s1259_s1 + $0x40] sm:$0xff]   ;;  %v1010_v2 = vld [vmem:[%s1259_s1 + $0x48] sm:$0xff]   ;;  %v1012_v4 = vld [vmem:[%s1259_s1 + $0x50] sm:$0xff]  }
   0x2   :  { %v1009_v1 = vld [vmem:[%s1259_s1] sm:$0xff]   ;;  %898 = vmatprep.subr.bf16.mxu0 %v1008_v0  ;;  %992 = vmatprep.subr.bf16.mxu1 %v1008_v0  ;;  %v1011_v3 = vld [vmem:[%s1259_s1 + $0x8] sm:$0xff]   ;;  %v1013_v5 = vld [vmem:[%s1259_s1 + $0x10] sm:$0xff]  }
   0x3   :  { %899 = vmatpush3.bf16.msra.mxu0 %v1009_v1  ;;  %1000 = vmatpush3.bf16.msra.mxu1 %v1009_v1  ;;  %v1014_v6 = vld [vmem:[%s1259_s1 + $0x58] sm:$0xff]   ;;  %v1016_v8 = vld [vmem:[%s1259_s1 + $0x60] sm:$0xff]   ;;  %v1018_v10 = vld [vmem:[%s1259_s1 + $0x68] sm:$0xff]  }
   0x4   :  { %900 = vmatprep.subr.bf16.mxu0 %v1010_v2  ;;  %993 = vmatprep.subr.bf16.mxu1 %v1010_v2  ;;  %v1015_v7 = vld [vmem:[%s1259_s1 + $0x18] sm:$0xff]   ;;  %v1017_v9 = vld [vmem:[%s1259_s1 + $0x20] sm:$0xff]   ;;  %v1019_v13 = vld [vmem:[%s1259_s1 + $0x28] sm:$0xff]  }
   0x5   :  { %v1026_v11 = vld [vmem:[%s1260_s0 + $0x4] ss:$12 sps:$4 sm:$0xff]   ;;  %v1029_v12 = vld [vmem:[%s1260_s0 + $0x94] ss:$12 sps:$4 sm:$0xff]   ;;  %v1022_v16 = vld [vmem:[%s1259_s1 + $0x78] sm:$0xff]  }
   0x6   :  { %v1020_v14 = vld [vmem:[%s1259_s1 + $0x70] sm:$0xff]   ;;  %404 = vmatprep.mubr.bf16.mxu0 %v1026_v11  ;;  %452 = vmatprep.mubr.bf16.mxu1 %v1029_v12  ;;  %v1023_v17 = vld [vmem:[%s1259_s1 + $0x38] sm:$0xff]   ;;  %v1024_v18 = vld [vmem:[%s1260_s0] ss:$12 sps:$4 sm:$0xff]  }
   0x7   :  { %901 = vmatpush3.bf16.msra.mxu0 %v1011_v3  ;;  %1001 = vmatpush3.bf16.msra.mxu1 %v1011_v3  ;;  %v1021_v15 = vld [vmem:[%s1259_s1 + $0x30] sm:$0xff]   ;;  %v1030_v19 = vld [vmem:[%s1259_s1 + $0x80] sm:$0xff]   ;;  %v1031_v21 = vld [vmem:[%s1260_s0 + $0x1c] ss:$12 sps:$4 sm:$0xff]  }
   0x8   :  { %902 = vmatprep.subr.bf16.mxu0 %v1012_v4  ;;  %994 = vmatprep.subr.bf16.mxu1 %v1012_v4  ;;  %v1027_v20 = vld [vmem:[%s1260_s0 + $0x90] ss:$12 sps:$4 sm:$0xff]   ;;  %v1033_v22 = vld [vmem:[%s1260_s0 + $0xac] ss:$12 sps:$4 sm:$0xff]   ;;  %v1036_v25 = vld [vmem:[%s1260_s0 + $0xa8] ss:$12 sps:$4 sm:$0xff]  }
   0x9   :  { %v1037_v23 = vld [vmem:[%s1259_s1 + $0x88] sm:$0xff]   ;;  %v1035_v24 = vld [vmem:[%s1260_s0 + $0x18] ss:$12 sps:$4 sm:$0xff]   ;;  %v1038_v26 = vld [vmem:[%s1260_s0 + $0x34] ss:$12 sps:$4 sm:$0xff]  }
   0xa   :  { %v1040_v27 = vld [vmem:[%s1260_s0 + $0x8] ss:$12 sps:$4 sm:$0xff]   ;;  %v1041_v28 = vld [vmem:[%s1260_s0 + $0x30] ss:$12 sps:$4 sm:$0xff]   ;;  %v1042_v29 = vld [vmem:[%s1260_s0 + $0x20] ss:$12 sps:$4 sm:$0xff]  }
   0xb   :  { %903 = vmatpush3.bf16.msra.mxu0 %v1013_v5  ;;  %1002 = vmatpush3.bf16.msra.mxu1 %v1013_v5  ;;  %v1043_v30 = vld [vmem:[%s1260_s0 + $0x4c] ss:$12 sps:$4 sm:$0xff]   ;;  %v1046_v32 = vld [vmem:[%s1260_s0 + $0x48] ss:$12 sps:$4 sm:$0xff]   ;;  %v1047_v33 = vld [vmem:[%s1260_s0 + $0x50] ss:$12 sps:$4 sm:$0xff]  }
   0xc   :  { %904 = vmatprep.subr.bf16.mxu0 %v1014_v6  ;;  %995 = vmatprep.subr.bf16.mxu1 %v1014_v6  ;;  %v1045_v31 = vld [vmem:[%s1260_s0 + $0x38] ss:$12 sps:$4 sm:$0xff]   ;;  %v1050_v35 = vld [vmem:[%s1260_s0 + $0x68] ss:$12 sps:$4 sm:$0xff]   ;;  %v1051_v36 = vld [vmem:[%s1260_s0 + $0x60] ss:$12 sps:$4 sm:$0xff]  }
   0xd   :  { %v1048_v34 = vld [vmem:[%s1260_s0 + $0x64] ss:$12 sps:$4 sm:$0xff]   ;;  %v1052_v37 = vld [vmem:[%s1260_s0 + $0x80] ss:$12 sps:$4 sm:$0xff]   ;;  %v1053_v38 = vld [vmem:[%s1260_s0 + $0x7c] ss:$12 sps:$4 sm:$0xff]  }
   0xe   :  { %v1055_v39 = vld [vmem:[%s1260_s0 + $0x98] ss:$12 sps:$4 sm:$0xff]   ;;  %v1057_v41 = vld [vmem:[%s1260_s0 + $0xb0] ss:$12 sps:$4 sm:$0xff]  }
   0xf   :  { %905 = vmatpush3.bf16.msra.mxu0 %v1015_v7  ;;  %1003 = vmatpush3.bf16.msra.mxu1 %v1015_v7  ;;  %v1056_v40 = vld [vmem:[%s1260_s0 + $0x78] ss:$12 sps:$4 sm:$0xff]  }
  0x10   :  { %906 = vmatprep.subr.bf16.mxu0 %v1016_v8  ;;  %996 = vmatprep.subr.bf16.mxu1 %v1016_v8 }
  0x13   :  { %907 = vmatpush3.bf16.msra.mxu0 %v1017_v9  ;;  %1004 = vmatpush3.bf16.msra.mxu1 %v1017_v9 }
  0x14   :  { %908 = vmatprep.subr.bf16.mxu0 %v1018_v10  ;;  %997 = vmatprep.subr.bf16.mxu1 %v1018_v10 }
  0x17   :  { %909 = vmatpush3.bf16.msra.mxu0 %v1019_v13  ;;  %1005 = vmatpush3.bf16.msra.mxu1 %v1019_v13 }
  0x18   :  { %910 = vmatprep.subr.bf16.mxu0 %v1020_v14  ;;  %998 = vmatprep.subr.bf16.mxu1 %v1020_v14 }
  0x1b   :  { %911 = vmatpush3.bf16.msra.mxu0 %v1021_v15  ;;  %1006 = vmatpush3.bf16.msra.mxu1 %v1021_v15 }
  0x1c   :  { %912 = vmatprep.subr.bf16.mxu0 %v1022_v16  ;;  %999 = vmatprep.subr.bf16.mxu1 %v1022_v16 }
  0x1f   :  { %913 = vmatpush3.bf16.msra.mxu0 %v1023_v17  ;;  %1007 = vmatpush3.bf16.msra.mxu1 %v1023_v17 }
  0x20   :  { %972 = vmatprep.subr.bf16.mxu1 %v1030_v19 }
  0x22   :  { %405 = vmatmul.mubr.bf16.vlgmr.msra.gmra.mrb[0].mxu0 %v1024_v18  ;;  %453 = vmatmul.mubr.bf16.vlgmr.msra.gmra.mrb[0].mxu1 %v1027_v20 }
  0x23   :  { %973 = vmatpush3.bf16.msra.mxu1 %v1030_v19  ;;  %412 = vmatprep.mubr.bf16.mxu0 %v1031_v21 }
  0x24   :  { %460 = vmatprep.mubr.bf16.mxu1 %v1033_v22  ;;  %974 = vmatprep.subr.bf16.mxu1 %v1037_v23 }
  0x27   :  { %975 = vmatpush3.bf16.msra.mxu1 %v1037_v23 }
  0x2a   :  { %413 = vmatmul.mubr.bf16.gmra.mrb[4].mxu0 %v1035_v24  ;;  %461 = vmatmul.mubr.bf16.gmra.mrb[4].mxu1 %v1036_v25 }
  0x2b   :  { %420 = vmatprep.mubr.bf16.mxu0 %v1038_v26  ;;  %976 = vmatprep.mubr.msk.bf16.mxu1 %vm347_vm0, %v1040_v27 }
  0x32   :  { %421 = vmatmul.mubr.bf16.gmra.mrb[8].mxu0 %v1041_v28  ;;  %977 = vmatmul.mubr.msk.bf16.vlgmr.msra.gmra.mrb[8].mxu1 %vm347_vm0, %v1042_v29 }
  0x33   :  { %428 = vmatprep.mubr.bf16.mxu0 %v1043_v30  ;;  %980 = vmatprep.mubr.msk.bf16.mxu1 %vm347_vm0, %v1045_v31 }
  0x3a   :  { %429 = vmatmul.mubr.bf16.gmra.mrb[12].mxu0 %v1046_v32  ;;  %981 = vmatmul.mubr.msk.bf16.gmra.mrb[12].mxu1 %vm347_vm0, %v1047_v33 }
  0x3b   :  { %436 = vmatprep.mubr.bf16.mxu0 %v1048_v34  ;;  %984 = vmatprep.mubr.msk.bf16.mxu1 %vm347_vm0, %v1050_v35 }
  0x42   :  { %437 = vmatmul.mubr.bf16.gmra.mrb[16].mxu0 %v1051_v36  ;;  %985 = vmatmul.mubr.msk.bf16.gmra.mrb[16].mxu1 %vm347_vm0, %v1052_v37 }
  0x43   :  { %444 = vmatprep.mubr.bf16.mxu0 %v1053_v38  ;;  %988 = vmatprep.mubr.msk.bf16.mxu1 %vm347_vm0, %v1055_v39 }
  0x4a   :  { %445 = vmatmul.mubr.bf16.gmra.mrb[20].mxu0 %v1056_v40  ;;  %989 = vmatmul.mubr.msk.bf16.gmra.mrb[20].mxu1 %vm347_vm0, %v1057_v41 }
  0xf5   :  { %v914_v42 = vpop.f32.mrb[0].mxu0  ;;  %v950_v43 = vpop.f32.mrb[0].mxu1 }
  0xf6   :  { %v915_v44 = vpop.f32.mrb[1].mxu0  ;;  %v951_v45 = vpop.f32.mrb[1].mxu1 }
  0xf7   :  { %v916_v46 = vadd.f32 %v915_v44, %v914_v42  ;;  %v917_v47 = vpop.f32.mrb[2].mxu0  ;;  %v1217_v48 = vadd.f32 %v951_v45, %v950_v43  ;;  %v953_v49 = vpop.f32.mrb[2].mxu1 }
  0xf8   :  { %v918_v50 = vpop.f32.mrb[3].mxu0  ;;  %v954_v51 = vpop.f32.mrb[3].mxu1 }
  0xf9   :  { %v919_v52 = vadd.f32 %v918_v50, %v917_v47  ;;  %v1219_v53 = vadd.f32 %v954_v51, %v953_v49 }
  0xfd   :  { %v920_v54 = vpop.f32.mrb[4].mxu0  ;;  %v956_v55 = vpop.f32.mrb[4].mxu1 }
  0xfe   :  { %v921_v56 = vpop.f32.mrb[5].mxu0  ;;  %v957_v57 = vpop.f32.mrb[5].mxu1 }
  0xff   :  { %v922_v58 = vadd.f32 %v921_v56, %v920_v54  ;;  %v923_v59 = vpop.f32.mrb[6].mxu0  ;;  %v1221_v60 = vadd.f32 %v957_v57, %v956_v55  ;;  %v959_v61 = vpop.f32.mrb[6].mxu1 }
 0x100   :  { %v924_v62 = vpop.f32.mrb[7].mxu0  ;;  %v960_v63 = vpop.f32.mrb[7].mxu1 }
 0x101   :  { %v925_v0 = vadd.f32 %v924_v62, %v923_v59  ;;  %v1223_v1 = vadd.f32 %v960_v63, %v959_v61 }
 0x105   :  { %v926_v2 = vpop.f32.mrb[8].mxu0  ;;  %v978_v3 = vpop.f32.mrb[8].mxu1 }
 0x106   :  { %v512_v4 = vadd.f32 %v978_v3, %v922_v58  ;;  %v927_v5 = vpop.f32.mrb[9].mxu0  ;;  %v503_v6 = vpop.f32.mrb[9].mxu1 }
 0x107   :  { %v928_v7 = vadd.f32 %v927_v5, %v926_v2  ;;  %v504_v8 = vadd.f32 %v916_v46, %v503_v6  ;;  %v929_v9 = vpop.f32.mrb[10].mxu0  ;;  %v979_v10 = vpop.f32.mrb[10].mxu1 }
 0x108   :  { %v515_v11 = vadd.f32 %v979_v10, %v925_v0  ;;  %v930_v12 = vpop.f32.mrb[11].mxu0  ;;  %v506_v13 = vpop.f32.mrb[11].mxu1  ;;  %v721_v21 = vmul.f32 %v512_v4, %v512_v4 }
 0x109   :  { %v931_v14 = vadd.f32 %v930_v12, %v929_v9  ;;  %v507_v15 = vadd.f32 %v919_v52, %v506_v13  ;;  %v719_v17 = vmul.f32 %v504_v8, %v504_v8 }
 0x10a   :  { %v859_v16 = vpack.c.bf16 %v515_v11, %v512_v4  ;;  %v722_v26 = vmul.f32 %v515_v11, %v515_v11 }
 0x10b   :  { %v854_v18 = vpack.c.bf16 %v507_v15, %v504_v8  ;;  %v697_v19 = vadd.f32 %v507_v15, %v504_v8  ;;  %v720_v20 = vmul.f32 %v507_v15, %v507_v15 }
 0x10c   :  { %891 = vst [vmem:[%s1261_s2 + $0x8] sm:$0xff] %v859_v16  }
 0x10d   :  { %855 = vst [vmem:[%s1261_s2] sm:$0xff] %v854_v18   ;;  %v698_v22 = vadd.f32 %v697_v19, %v512_v4  ;;  %v735_v23 = vadd.f32 %v720_v20, %v719_v17  ;;  %v932_v24 = vpop.f32.mrb[12].mxu0  ;;  %v982_v25 = vpop.f32.mrb[12].mxu1 }
 0x10e   :  { %v933_v27 = vpop.f32.mrb[13].mxu0  ;;  %v519_v28 = vpop.f32.mrb[13].mxu1 }
 0x10f   :  { %v736_v29 = vadd.f32 %v735_v23, %v721_v21  ;;  %v934_v30 = vadd.f32 %v933_v27, %v932_v24  ;;  %v520_v31 = vadd.f32 %v928_v7, %v519_v28  ;;  %v699_v32 = vadd.f32 %v698_v22, %v515_v11  ;;  %v935_v33 = vpop.f32.mrb[14].mxu0  ;;  %v983_v34 = vpop.f32.mrb[14].mxu1 }
 0x110   :  { %v936_v35 = vpop.f32.mrb[15].mxu0  ;;  %v522_v36 = vpop.f32.mrb[15].mxu1 }
 0x111   :  { %v528_v37 = vadd.f32 %v982_v25, %v934_v30  ;;  %v700_v38 = vadd.f32 %v699_v32, %v520_v31  ;;  %v723_v39 = vmul.f32 %v520_v31, %v520_v31  ;;  %v737_v40 = vadd.f32 %v736_v29, %v722_v26 }
 0x112   :  { %v937_v41 = vadd.f32 %v936_v35, %v935_v33  ;;  %v523_v42 = vadd.f32 %v931_v14, %v522_v36 }
 0x113   :  { %v738_v43 = vadd.f32 %v737_v40, %v723_v39  ;;  %v725_v51 = vmul.f32 %v528_v37, %v528_v37 }
 0x114   :  { %v531_v44 = vadd.f32 %v983_v34, %v937_v41  ;;  %v864_v45 = vpack.c.bf16 %v523_v42, %v520_v31  ;;  %v701_v46 = vadd.f32 %v700_v38, %v523_v42  ;;  %v724_v47 = vmul.f32 %v523_v42, %v523_v42 }
 0x115   :  { %v938_v49 = vpop.f32.mrb[16].mxu0  ;;  %v986_v50 = vpop.f32.mrb[16].mxu1 }
 0x116   :  { %v869_v52 = vpack.c.bf16 %v531_v44, %v528_v37  ;;  %892 = vst [vmem:[%s1261_s2 + $0x10] sm:$0xff] %v864_v45   ;;  %v702_v54 = vadd.f32 %v701_v46, %v528_v37  ;;  %v739_v55 = vadd.f32 %v738_v43, %v724_v47  ;;  %v939_v56 = vpop.f32.mrb[17].mxu0  ;;  %v535_v57 = vpop.f32.mrb[17].mxu1  ;;  %v726_v62 = vmul.f32 %v531_v44, %v531_v44 }
 0x117   :  { %v940_v58 = vadd.f32 %v939_v56, %v938_v49  ;;  %v941_v59 = vpop.f32.mrb[18].mxu0  ;;  %v987_v61 = vpop.f32.mrb[18].mxu1 }
 0x118   :  { %893 = vst [vmem:[%s1261_s2 + $0x18] sm:$0xff] %v869_v52   ;;  %v740_v63 = vadd.f32 %v739_v55, %v725_v51  ;;  %v942_v0 = vpop.f32.mrb[19].mxu0  ;;  %v703_v2 = vadd.f32 %v702_v54, %v531_v44  ;;  %v538_v3 = vpop.f32.mrb[19].mxu1 }
 0x119   :  { %v943_v4 = vadd.f32 %v942_v0, %v941_v59  ;;  %v536_v5 = vadd.f32 %v940_v58, %v535_v57 }
 0x11a   :  { %v741_v6 = vadd.f32 %v740_v63, %v726_v62 }
 0x11b   :  { %v704_v7 = vadd.f32 %v703_v2, %v536_v5  ;;  %v727_v8 = vmul.f32 %v536_v5, %v536_v5  ;;  %v539_v9 = vadd.f32 %v943_v4, %v538_v3 }
 0x11d   :  { %v742_v10 = vadd.f32 %v741_v6, %v727_v8  ;;  %v874_v11 = vpack.c.bf16 %v539_v9, %v536_v5  ;;  %v705_v12 = vadd.f32 %v704_v7, %v539_v9  ;;  %v728_v13 = vmul.f32 %v539_v9, %v539_v9  ;;  %v944_v14 = vpop.f32.mrb[20].mxu0  ;;  %v990_v15 = vpop.f32.mrb[20].mxu1 }
 0x11e   :  { %v560_v16 = vadd.f32 %v990_v15, %v1221_v60  ;;  %v945_v17 = vpop.f32.mrb[21].mxu0  ;;  %v551_v18 = vpop.f32.mrb[21].mxu1 }
 0x11f   :  { %894 = vst [vmem:[%s1261_s2 + $0x20] sm:$0xff] %v874_v11   ;;  %v743_v19 = vadd.f32 %v742_v10, %v728_v13  ;;  %v946_v20 = vadd.f32 %v945_v17, %v944_v14  ;;  %v552_v21 = vadd.f32 %v1217_v48, %v551_v18  ;;  %v947_v22 = vpop.f32.mrb[22].mxu0  ;;  %v991_v23 = vpop.f32.mrb[22].mxu1 }
 0x120   :  { %v563_v24 = vadd.f32 %v991_v23, %v1223_v1  ;;  %v948_v25 = vpop.f32.mrb[23].mxu0  ;;  %v554_v26 = vpop.f32.mrb[23].mxu1  ;;  %v733_v41 = vmul.f32 %v560_v16, %v560_v16 }
 0x121   :  { %v544_v27 = vadd.f32 %v986_v50, %v946_v20  ;;  %v949_v28 = vadd.f32 %v948_v25, %v947_v22  ;;  %v555_v60 = vadd.f32 %v1219_v53, %v554_v26  ;;  %v731_v1 = vmul.f32 %v552_v21, %v552_v21 }
 0x122   :  { %v889_v29 = vpack.c.bf16 %v563_v24, %v560_v16  ;;  %v734_v44 = vmul.f32 %v563_v24, %v563_v24 }
 0x123   :  { %v706_v30 = vadd.f32 %v705_v12, %v544_v27  ;;  %v729_v31 = vmul.f32 %v544_v27, %v544_v27  ;;  %v547_v32 = vadd.f32 %v987_v61, %v949_v28  ;;  %v884_v33 = vpack.c.bf16 %v555_v60, %v552_v21 }
 0x124   :  { %897 = vst [vmem:[%s1261_s2 + $0x38] sm:$0xff] %v889_v29   ;;  %v732_v39 = vmul.f32 %v555_v60, %v555_v60 }
 0x125   :  { %v744_v48 = vadd.f32 %v743_v19, %v729_v31  ;;  %v879_v34 = vpack.c.bf16 %v547_v32, %v544_v27  ;;  %v707_v35 = vadd.f32 %v706_v30, %v547_v32  ;;  %v730_v36 = vmul.f32 %v547_v32, %v547_v32  ;;  %896 = vst [vmem:[%s1261_s2 + $0x30] sm:$0xff] %v884_v33  }
 0x127   :  { %895 = vst [vmem:[%s1261_s2 + $0x28] sm:$0xff] %v879_v34   ;;  %v745_v53 = vadd.f32 %v744_v48, %v730_v36  ;;  %v708_v37 = vadd.f32 %v707_v35, %v552_v21 }
 0x129   :  { %v709_v38 = vadd.f32 %v708_v37, %v555_v60  ;;  %v746_v40 = vadd.f32 %v745_v53, %v731_v1 }
 0x12b   :  { %v710_v42 = vadd.f32 %v709_v38, %v560_v16  ;;  %v747_v43 = vadd.f32 %v746_v40, %v732_v39 }
 0x12d   :  { %v711_v45 = vadd.f32 %v710_v42, %v563_v24  ;;  %v748_v46 = vadd.f32 %v747_v43, %v733_v41 }
 0x12f   :  { %v712_v47 = vrot.slane %v711_v45, 4  ;;  %v749_v49 = vadd.f32 %v748_v46, %v734_v44 }
 0x131   :  { %v713_v50 = vadd.f32 %v712_v47, %v711_v45  ;;  %v750_v51 = vrot.slane %v749_v49, 4 }
 0x133   :  { %v714_v52 = vrot.slane %v713_v50, 2  ;;  %v751_v54 = vadd.f32 %v750_v51, %v749_v49 }
 0x135   :  { %v715_v55 = vadd.f32 %v714_v52, %v713_v50  ;;  %v752_v56 = vrot.slane %v751_v54, 2 }
 0x137   :  { %v716_v57 = vrot.slane %v715_v55, 1  ;;  %v753_v58 = vadd.f32 %v752_v56, %v751_v54 }
 0x139   :  { %v717_v59 = vadd.f32 %v716_v57, %v715_v55  ;;  %v754_v61 = vrot.slane %v753_v58, 1 }
 0x13b   :  { %718 = vst [vmem:[%s1262_s3] sm:$0x1] %v717_v59  ;;  %v755_v62 = vadd.f32 %v754_v61, %v753_v58 }
 0x13d   :  { %756 = vst [vmem:[%s1263_s4] sm:$0x1] %v755_v62 }

// kernel: wgan_generator_forward.14
= control target key start
LH: loop header
LB: loop body
LE: loop exit
PB: predicated region body
PF: predicated region fallthrough
CT: control target
= control target key end

     0   :  { %s422_s0 = inlined_call_operand.vmem [shape: bf16[128,128], index: 0, kind: input, shape index: {}]   ;;  %s423_s1 = inlined_call_operand.vmem [shape: f32[1,128], index: 1, kind: input, shape index: {}]   ;;  %s424_s2 = inlined_call_operand.vmem [shape: f32[1,128], index: 2, kind: input, shape index: {}]   ;;  %s425_s3 = inlined_call_operand.vmem [shape: bf16[128,128], index: 3, kind: output, shape index: {}]  }
   0x1   :  { %v227_v0 = vld [vmem:[%s422_s0] sm:$0xff]   ;;  %v298_v4 = vld [vmem:[%s422_s0 + $0x8] sm:$0xff]   ;;  %v299_v5 = vld [vmem:[%s422_s0 + $0x10] sm:$0xff]  }
   0x2   :  { %v338_v1 = vld [vmem:[%s423_s1] ss:$0 sm:$0xff]  ;;  %v228_v2 = vunpack.c.l.bf16 %v227_v0  ;;  %v229_v3 = vunpack.c.h.bf16 %v227_v0  ;;  %v300_v6 = vld [vmem:[%s422_s0 + $0x18] sm:$0xff]   ;;  %v232_v8 = vunpack.c.l.bf16 %v298_v4  ;;  %v233_v9 = vunpack.c.h.bf16 %v298_v4  ;;  %v302_v33 = vld [vmem:[%s422_s0 + $0x28] sm:$0xff]  }
   0x3   :  { %v352_v7 = vld [vmem:[%s424_s2] ss:$0 sm:$0xff]  ;;  %v236_v10 = vunpack.c.l.bf16 %v299_v5  ;;  %v237_v11 = vunpack.c.h.bf16 %v299_v5  ;;  %v240_v14 = vunpack.c.l.bf16 %v300_v6  ;;  %v241_v15 = vunpack.c.h.bf16 %v300_v6  ;;  %v303_v38 = vld [vmem:[%s422_s0 + $0x30] sm:$0xff]   ;;  %v304_v43 = vld [vmem:[%s422_s0 + $0x38] sm:$0xff]  }
   0x4   :  { %v53_v12 = vmul.f32 %v228_v2, %v338_v1  ;;  %v54_v13 = vmul.f32 %v229_v3, %v338_v1  ;;  %v55_v16 = vmul.f32 %v232_v8, %v338_v1  ;;  %v56_v17 = vmul.f32 %v233_v9, %v338_v1  ;;  %v301_v28 = vld [vmem:[%s422_s0 + $0x20] sm:$0xff]  }
   0x5   :  { %v57_v18 = vmul.f32 %v236_v10, %v338_v1  ;;  %v58_v19 = vmul.f32 %v237_v11, %v338_v1  ;;  %v59_v22 = vmul.f32 %v240_v14, %v338_v1  ;;  %v60_v23 = vmul.f32 %v241_v15, %v338_v1 }
   0x6   :  { %v76_v20 = vadd.f32 %v352_v7, %v53_v12  ;;  %v77_v21 = vadd.f32 %v352_v7, %v54_v13  ;;  %v78_v24 = vadd.f32 %v352_v7, %v55_v16  ;;  %v79_v25 = vadd.f32 %v352_v7, %v56_v17 }
   0x7   :  { %v80_v26 = vadd.f32 %v352_v7, %v57_v18  ;;  %v81_v27 = vadd.f32 %v352_v7, %v58_v19  ;;  %v82_v31 = vadd.f32 %v352_v7, %v59_v22  ;;  %v83_v32 = vadd.f32 %v352_v7, %v60_v23 }
   0x8   :  { %v92_v29 = vmax.f32 %v76_v20, 0.0  ;;  %v93_v30 = vmax.f32 %v77_v21, 0.0  ;;  %v94_v34 = vmax.f32 %v78_v24, 0.0  ;;  %v95_v35 = vmax.f32 %v79_v25, 0.0 }
   0x9   :  { %v96_v36 = vmax.f32 %v80_v26, 0.0  ;;  %v97_v37 = vmax.f32 %v81_v27, 0.0  ;;  %v98_v40 = vmax.f32 %v82_v31, 0.0  ;;  %v99_v41 = vmax.f32 %v83_v32, 0.0 }
   0xa   :  { %v261_v39 = vpack.c.bf16 %v93_v30, %v92_v29  ;;  %v244_v42 = vunpack.c.l.bf16 %v301_v28  ;;  %v266_v44 = vpack.c.bf16 %v95_v35, %v94_v34  ;;  %v245_v46 = vunpack.c.h.bf16 %v301_v28 }
   0xb   :  { %v271_v45 = vpack.c.bf16 %v97_v37, %v96_v36  ;;  %v248_v47 = vunpack.c.l.bf16 %v302_v33  ;;  %v276_v48 = vpack.c.bf16 %v99_v41, %v98_v40  ;;  %v249_v50 = vunpack.c.h.bf16 %v302_v33 }
   0xc   :  { %262 = vst [vmem:[%s425_s3] sm:$0xff] %v261_v39   ;;  %v61_v49 = vmul.f32 %v244_v42, %v338_v1  ;;  %v252_v51 = vunpack.c.l.bf16 %v303_v38  ;;  %305 = vst [vmem:[%s425_s3 + $0x8] sm:$0xff] %v266_v44   ;;  %v62_v52 = vmul.f32 %v245_v46, %v338_v1  ;;  %v253_v54 = vunpack.c.h.bf16 %v303_v38 }
   0xd   :  { %306 = vst [vmem:[%s425_s3 + $0x10] sm:$0xff] %v271_v45   ;;  %v63_v53 = vmul.f32 %v248_v47, %v338_v1  ;;  %v256_v55 = vunpack.c.l.bf16 %v304_v43  ;;  %307 = vst [vmem:[%s425_s3 + $0x18] sm:$0xff] %v276_v48   ;;  %v64_v57 = vmul.f32 %v249_v50, %v338_v1  ;;  %v257_v59 = vunpack.c.h.bf16 %v304_v43 }
   0xe   :  { %v84_v56 = vadd.f32 %v352_v7, %v61_v49  ;;  %v65_v58 = vmul.f32 %v252_v51, %v338_v1  ;;  %v85_v60 = vadd.f32 %v352_v7, %v62_v52  ;;  %v66_v62 = vmul.f32 %v253_v54, %v338_v1 }
   0xf   :  { %v86_v61 = vadd.f32 %v352_v7, %v63_v53  ;;  %v67_v63 = vmul.f32 %v256_v55, %v338_v1  ;;  %v87_v2 = vadd.f32 %v352_v7, %v64_v57  ;;  %v68_v4 = vmul.f32 %v257_v59, %v338_v1 }
  0x10   :  { %v100_v0 = vmax.f32 %v84_v56, 0.0  ;;  %v88_v3 = vadd.f32 %v352_v7, %v65_v58  ;;  %v101_v5 = vmax.f32 %v85_v60, 0.0  ;;  %v89_v8 = vadd.f32 %v352_v7, %v66_v62 }
  0x11   :  { %v102_v6 = vmax.f32 %v86_v61, 0.0  ;;  %v90_v9 = vadd.f32 %v352_v7, %v67_v63  ;;  %v103_v10 = vmax.f32 %v87_v2, 0.0  ;;  %v91_v12 = vadd.f32 %v352_v7, %v68_v4 }
  0x12   :  { %v104_v11 = vmax.f32 %v88_v3, 0.0  ;;  %v281_v13 = vpack.c.bf16 %v101_v5, %v100_v0  ;;  %v105_v14 = vmax.f32 %v89_v8, 0.0 }
  0x13   :  { %v106_v15 = vmax.f32 %v90_v9, 0.0  ;;  %v286_v16 = vpack.c.bf16 %v103_v10, %v102_v6  ;;  %v107_v17 = vmax.f32 %v91_v12, 0.0 }
  0x14   :  { %308 = vst [vmem:[%s425_s3 + $0x20] sm:$0xff] %v281_v13   ;;  %v291_v1 = vpack.c.bf16 %v105_v14, %v104_v11 }
  0x15   :  { %309 = vst [vmem:[%s425_s3 + $0x28] sm:$0xff] %v286_v16   ;;  %v296_v18 = vpack.c.bf16 %v107_v17, %v106_v15 }
  0x16   :  { %310 = vst [vmem:[%s425_s3 + $0x30] sm:$0xff] %v291_v1  }
  0x17   :  { %311 = vst [vmem:[%s425_s3 + $0x38] sm:$0xff] %v296_v18  }

// kernel: wgan_generator_forward.15
= control target key start
LH: loop header
LB: loop body
LE: loop exit
PB: predicated region body
PF: predicated region fallthrough
CT: control target
= control target key end

     0   :  { %v2236_v0 = vmov 0   ;;  %vm571_vm0 = vcmask 130048   ;;  %s2807_s1 = inlined_call_operand.vmem [shape: bf16[144,128], index: 1, kind: input, shape index: {}]   ;;  %s2808_s0 = inlined_call_operand.vmem [shape: bf16[512,144], index: 0, kind: input, shape index: {}]   ;;  %s2809_s2 = inlined_call_operand.vmem [shape: bf16[512,128], index: 2, kind: output, shape index: {0}]   ;;  %s2810_s3 = inlined_call_operand.vmem [shape: f32[1,1,128], index: 3, kind: output, shape index: {1}]   ;;  %s2811_s4 = inlined_call_operand.vmem [shape: f32[1,1,128], index: 4, kind: output, shape index: {2}]  }
   0x1   :  { %668 = vmatprep.subr.bf16.mxu0 %v2236_v0  ;;  %v2131_v1 = vld [vmem:[%s2807_s1] sm:$0xff]   ;;  %2112 = vmatprep.subr.bf16.mxu1 %v2236_v0  ;;  %v2132_v2 = vld [vmem:[%s2807_s1 + $0x8] sm:$0xff]   ;;  %v2133_v3 = vld [vmem:[%s2807_s1 + $0x10] sm:$0xff]  }
   0x2   :  { %669 = vmatpush1.bf16.msra.mxu0 %v2131_v1  ;;  %2121 = vmatpush1.bf16.msra.mxu1 %v2131_v1  ;;  %v2134_v4 = vld [vmem:[%s2807_s1 + $0x18] sm:$0xff]   ;;  %v2142_v5 = vld [vmem:[%s2808_s0 + $0x4] ss:$8 sps:$4 sm:$0xff]   ;;  %v2137_v9 = vld [vmem:[%s2807_s1 + $0x30] sm:$0xff]  }
   0x3   :  { %670 = vmatprep.subr.bf16.mxu0 %v2236_v0  ;;  %2113 = vmatprep.subr.bf16.mxu1 %v2236_v0  ;;  %v2135_v6 = vld [vmem:[%s2807_s1 + $0x20] sm:$0xff]   ;;  %v2136_v7 = vld [vmem:[%s2807_s1 + $0x28] sm:$0xff]   ;;  %v2138_v10 = vld [vmem:[%s2807_s1 + $0x38] sm:$0xff]  }
   0x4   :  { %1761 = vmatprep.mubr.msk.bf16.mxu0 %vm571_vm0, %v2142_v5  ;;  %v2166_v8 = vld [vmem:[%s2808_s0 + $0x104] ss:$8 sps:$4 sm:$0xff]   ;;  %v2140_v12 = vld [vmem:[%s2808_s0] ss:$8 sps:$4 sm:$0xff]   ;;  %v2143_v13 = vld [vmem:[%s2808_s0 + $0x14] ss:$8 sps:$4 sm:$0xff]  }
   0x5   :  { %1777 = vmatprep.mubr.msk.bf16.mxu1 %vm571_vm0, %v2166_v8  ;;  %v2139_v11 = vld [vmem:[%s2807_s1 + $0x40] sm:$0xff]   ;;  %v2170_v15 = vld [vmem:[%s2808_s0 + $0x114] ss:$8 sps:$4 sm:$0xff]   ;;  %v2145_v16 = vld [vmem:[%s2808_s0 + $0x10] ss:$8 sps:$4 sm:$0xff]  }
   0x6   :  { %671 = vmatpush1.bf16.msra.mxu0 %v2132_v2  ;;  %2122 = vmatpush1.bf16.msra.mxu1 %v2132_v2  ;;  %v2164_v14 = vld [vmem:[%s2808_s0 + $0x100] ss:$8 sps:$4 sm:$0xff]   ;;  %v2146_v17 = vld [vmem:[%s2808_s0 + $0x24] ss:$8 sps:$4 sm:$0xff]   ;;  %v2172_v18 = vld [vmem:[%s2808_s0 + $0x110] ss:$8 sps:$4 sm:$0xff]  }
   0x7   :  { %672 = vmatprep.subr.bf16.mxu0 %v2236_v0  ;;  %2114 = vmatprep.subr.bf16.mxu1 %v2236_v0  ;;  %v2176_v19 = vld [vmem:[%s2808_s0 + $0x124] ss:$8 sps:$4 sm:$0xff]   ;;  %v2148_v20 = vld [vmem:[%s2808_s0 + $0x20] ss:$8 sps:$4 sm:$0xff]   ;;  %v2149_v21 = vld [vmem:[%s2808_s0 + $0x34] ss:$8 sps:$4 sm:$0xff]  }
   0x8   :  { %v2178_v22 = vld [vmem:[%s2808_s0 + $0x120] ss:$8 sps:$4 sm:$0xff]   ;;  %v2182_v23 = vld [vmem:[%s2808_s0 + $0x134] ss:$8 sps:$4 sm:$0xff]   ;;  %v2151_v24 = vld [vmem:[%s2808_s0 + $0x30] ss:$8 sps:$4 sm:$0xff]  }
   0x9   :  { %v2184_v25 = vld [vmem:[%s2808_s0 + $0x130] ss:$8 sps:$4 sm:$0xff]   ;;  %v2152_v26 = vld [vmem:[%s2808_s0 + $0x44] ss:$8 sps:$4 sm:$0xff]   ;;  %v2154_v28 = vld [vmem:[%s2808_s0 + $0x40] ss:$8 sps:$4 sm:$0xff]  }
   0xa   :  { %673 = vmatpush1.bf16.msra.mxu0 %v2133_v3  ;;  %2123 = vmatpush1.bf16.msra.mxu1 %v2133_v3  ;;  %v2188_v27 = vld [vmem:[%s2808_s0 + $0x144] ss:$8 sps:$4 sm:$0xff]   ;;  %v2190_v29 = vld [vmem:[%s2808_s0 + $0x140] ss:$8 sps:$4 sm:$0xff]   ;;  %v2155_v30 = vld [vmem:[%s2808_s0 + $0x54] ss:$8 sps:$4 sm:$0xff]  }
   0xb   :  { %674 = vmatprep.subr.bf16.mxu0 %v2236_v0  ;;  %2115 = vmatprep.subr.bf16.mxu1 %v2236_v0  ;;  %v2194_v31 = vld [vmem:[%s2808_s0 + $0x154] ss:$8 sps:$4 sm:$0xff]   ;;  %v2157_v32 = vld [vmem:[%s2808_s0 + $0x50] ss:$8 sps:$4 sm:$0xff]   ;;  %v2158_v34 = vld [vmem:[%s2808_s0 + $0x64] ss:$8 sps:$4 sm:$0xff]  }
   0xc   :  { %v2196_v33 = vld [vmem:[%s2808_s0 + $0x150] ss:$8 sps:$4 sm:$0xff]   ;;  %v2200_v35 = vld [vmem:[%s2808_s0 + $0x164] ss:$8 sps:$4 sm:$0xff]   ;;  %v2160_v36 = vld [vmem:[%s2808_s0 + $0x60] ss:$8 sps:$4 sm:$0xff]  }
   0xd   :  { %v2202_v37 = vld [vmem:[%s2808_s0 + $0x160] ss:$8 sps:$4 sm:$0xff]   ;;  %v2161_v38 = vld [vmem:[%s2808_s0 + $0x74] ss:$8 sps:$4 sm:$0xff]   ;;  %v2163_v40 = vld [vmem:[%s2808_s0 + $0x70] ss:$8 sps:$4 sm:$0xff]  }
   0xe   :  { %675 = vmatpush1.bf16.msra.mxu0 %v2134_v4  ;;  %2124 = vmatpush1.bf16.msra.mxu1 %v2134_v4  ;;  %v2206_v39 = vld [vmem:[%s2808_s0 + $0x174] ss:$8 sps:$4 sm:$0xff]   ;;  %v2208_v41 = vld [vmem:[%s2808_s0 + $0x170] ss:$8 sps:$4 sm:$0xff]   ;;  %v2167_v42 = vld [vmem:[%s2808_s0 + $0x84] ss:$8 sps:$4 sm:$0xff]  }
   0xf   :  { %676 = vmatprep.subr.bf16.mxu0 %v2236_v0  ;;  %2116 = vmatprep.subr.bf16.mxu1 %v2236_v0  ;;  %v2212_v43 = vld [vmem:[%s2808_s0 + $0x184] ss:$8 sps:$4 sm:$0xff]   ;;  %v2169_v44 = vld [vmem:[%s2808_s0 + $0x80] ss:$8 sps:$4 sm:$0xff]   ;;  %v2173_v46 = vld [vmem:[%s2808_s0 + $0x94] ss:$8 sps:$4 sm:$0xff]  }
  0x10   :  { %v2214_v45 = vld [vmem:[%s2808_s0 + $0x180] ss:$8 sps:$4 sm:$0xff]   ;;  %v2215_v47 = vld [vmem:[%s2808_s0 + $0x194] ss:$8 sps:$4 sm:$0xff]   ;;  %v2175_v48 = vld [vmem:[%s2808_s0 + $0x90] ss:$8 sps:$4 sm:$0xff]  }
  0x11   :  { %v2217_v49 = vld [vmem:[%s2808_s0 + $0x190] ss:$8 sps:$4 sm:$0xff]   ;;  %v2179_v50 = vld [vmem:[%s2808_s0 + $0xa4] ss:$8 sps:$4 sm:$0xff]   ;;  %v2181_v52 = vld [vmem:[%s2808_s0 + $0xa0] ss:$8 sps:$4 sm:$0xff]  }
  0x12   :  { %677 = vmatpush1.bf16.msra.mxu0 %v2135_v6  ;;  %2125 = vmatpush1.bf16.msra.mxu1 %v2135_v6  ;;  %v2218_v51 = vld [vmem:[%s2808_s0 + $0x1a4] ss:$8 sps:$4 sm:$0xff]   ;;  %v2220_v53 = vld [vmem:[%s2808_s0 + $0x1a0] ss:$8 sps:$4 sm:$0xff]   ;;  %v2185_v54 = vld [vmem:[%s2808_s0 + $0xb4] ss:$8 sps:$4 sm:$0xff]  }
  0x13   :  { %678 = vmatprep.subr.bf16.mxu0 %v2236_v0  ;;  %2117 = vmatprep.subr.bf16.mxu1 %v2236_v0  ;;  %v2221_v55 = vld [vmem:[%s2808_s0 + $0x1b4] ss:$8 sps:$4 sm:$0xff]   ;;  %v2187_v56 = vld [vmem:[%s2808_s0 + $0xb0] ss:$8 sps:$4 sm:$0xff]   ;;  %v2191_v58 = vld [vmem:[%s2808_s0 + $0xc4] ss:$8 sps:$4 sm:$0xff]  }
  0x14   :  { %v2223_v57 = vld [vmem:[%s2808_s0 + $0x1b0] ss:$8 sps:$4 sm:$0xff]   ;;  %v2224_v59 = vld [vmem:[%s2808_s0 + $0x1c4] ss:$8 sps:$4 sm:$0xff]   ;;  %v2193_v60 = vld [vmem:[%s2808_s0 + $0xc0] ss:$8 sps:$4 sm:$0xff]  }
  0x15   :  { %v2226_v61 = vld [vmem:[%s2808_s0 + $0x1c0] ss:$8 sps:$4 sm:$0xff]   ;;  %v2197_v62 = vld [vmem:[%s2808_s0 + $0xd4] ss:$8 sps:$4 sm:$0xff]   ;;  %v2229_v1 = vld [vmem:[%s2808_s0 + $0x1d0] ss:$8 sps:$4 sm:$0xff]  }
  0x16   :  { %679 = vmatpush1.bf16.msra.mxu0 %v2136_v7  ;;  %2126 = vmatpush1.bf16.msra.mxu1 %v2136_v7  ;;  %v2227_v63 = vld [vmem:[%s2808_s0 + $0x1d4] ss:$8 sps:$4 sm:$0xff]   ;;  %v2203_v2 = vld [vmem:[%s2808_s0 + $0xe4] ss:$8 sps:$4 sm:$0xff]   ;;  %v2205_v4 = vld [vmem:[%s2808_s0 + $0xe0] ss:$8 sps:$4 sm:$0xff]  }
  0x17   :  { %680 = vmatprep.subr.bf16.mxu0 %v2236_v0  ;;  %2118 = vmatprep.subr.bf16.mxu1 %v2236_v0  ;;  %v2230_v3 = vld [vmem:[%s2808_s0 + $0x1e4] ss:$8 sps:$4 sm:$0xff]   ;;  %v2232_v5 = vld [vmem:[%s2808_s0 + $0x1e0] ss:$8 sps:$4 sm:$0xff]   ;;  %v2209_v6 = vld [vmem:[%s2808_s0 + $0xf4] ss:$8 sps:$4 sm:$0xff]  }
  0x18   :  { %v2233_v7 = vld [vmem:[%s2808_s0 + $0x1f4] ss:$8 sps:$4 sm:$0xff]   ;;  %v2211_v8 = vld [vmem:[%s2808_s0 + $0xf0] ss:$8 sps:$4 sm:$0xff]  }
  0x1a   :  { %681 = vmatpush1.bf16.msra.mxu0 %v2137_v9  ;;  %2127 = vmatpush1.bf16.msra.mxu1 %v2137_v9  ;;  %v2235_v9 = vld [vmem:[%s2808_s0 + $0x1f0] ss:$8 sps:$4 sm:$0xff]  }
  0x1b   :  { %682 = vmatprep.subr.bf16.mxu0 %v2236_v0  ;;  %2119 = vmatprep.subr.bf16.mxu1 %v2236_v0 }
  0x1e   :  { %683 = vmatpush1.bf16.msra.mxu0 %v2138_v10  ;;  %2128 = vmatpush1.bf16.msra.mxu1 %v2138_v10 }
  0x1f   :  { %684 = vmatprep.subr.bf16.mxu0 %v2236_v0  ;;  %2120 = vmatprep.subr.bf16.mxu1 %v2236_v0  ;;  %v2199_v0 = vld [vmem:[%s2808_s0 + $0xd0] ss:$8 sps:$4 sm:$0xff]  }
  0x22   :  { %685 = vmatpush1.bf16.msra.mxu0 %v2139_v11  ;;  %2129 = vmatpush1.bf16.msra.mxu1 %v2139_v11 }
  0x25   :  { %701 = vmatmul.mubr.bf16.vlgmr.msra.gmra.mrb[0].mxu0 %v2140_v12  ;;  %829 = vmatmul.mubr.bf16.vlgmr.msra.gmra.mrb[0].mxu1 %v2164_v14 }
  0x26   :  { %1762 = vmatprep.mubr.msk.bf16.mxu0 %vm571_vm0, %v2143_v13  ;;  %1778 = vmatprep.mubr.msk.bf16.mxu1 %vm571_vm0, %v2170_v15 }
  0x2d   :  { %709 = vmatmul.mubr.bf16.gmra.mrb[4].mxu0 %v2145_v16  ;;  %837 = vmatmul.mubr.bf16.gmra.mrb[4].mxu1 %v2172_v18 }
  0x2e   :  { %1763 = vmatprep.mubr.msk.bf16.mxu0 %vm571_vm0, %v2146_v17  ;;  %1779 = vmatprep.mubr.msk.bf16.mxu1 %vm571_vm0, %v2176_v19 }
  0x35   :  { %717 = vmatmul.mubr.bf16.gmra.mrb[8].mxu0 %v2148_v20  ;;  %845 = vmatmul.mubr.bf16.gmra.mrb[8].mxu1 %v2178_v22 }
  0x36   :  { %1764 = vmatprep.mubr.msk.bf16.mxu0 %vm571_vm0, %v2149_v21  ;;  %1780 = vmatprep.mubr.msk.bf16.mxu1 %vm571_vm0, %v2182_v23 }
  0x3d   :  { %725 = vmatmul.mubr.bf16.gmra.mrb[12].mxu0 %v2151_v24  ;;  %853 = vmatmul.mubr.bf16.gmra.mrb[12].mxu1 %v2184_v25 }
  0x3e   :  { %1765 = vmatprep.mubr.msk.bf16.mxu0 %vm571_vm0, %v2152_v26  ;;  %1781 = vmatprep.mubr.msk.bf16.mxu1 %vm571_vm0, %v2188_v27 }
  0x45   :  { %733 = vmatmul.mubr.bf16.gmra.mrb[16].mxu0 %v2154_v28  ;;  %861 = vmatmul.mubr.bf16.gmra.mrb[16].mxu1 %v2190_v29 }
  0x46   :  { %1766 = vmatprep.mubr.msk.bf16.mxu0 %vm571_vm0, %v2155_v30  ;;  %1782 = vmatprep.mubr.msk.bf16.mxu1 %vm571_vm0, %v2194_v31 }
  0x4d   :  { %741 = vmatmul.mubr.bf16.gmra.mrb[20].mxu0 %v2157_v32  ;;  %869 = vmatmul.mubr.bf16.gmra.mrb[20].mxu1 %v2196_v33 }
  0x4e   :  { %1767 = vmatprep.mubr.msk.bf16.mxu0 %vm571_vm0, %v2158_v34  ;;  %1783 = vmatprep.mubr.msk.bf16.mxu1 %vm571_vm0, %v2200_v35 }
  0x55   :  { %749 = vmatmul.mubr.bf16.gmra.mrb[24].mxu0 %v2160_v36  ;;  %877 = vmatmul.mubr.bf16.gmra.mrb[24].mxu1 %v2202_v37 }
  0x56   :  { %1768 = vmatprep.mubr.msk.bf16.mxu0 %vm571_vm0, %v2161_v38  ;;  %1784 = vmatprep.mubr.msk.bf16.mxu1 %vm571_vm0, %v2206_v39 }
  0x5d   :  { %757 = vmatmul.mubr.bf16.gmra.mrb[28].mxu0 %v2163_v40  ;;  %885 = vmatmul.mubr.bf16.gmra.mrb[28].mxu1 %v2208_v41 }
  0x5e   :  { %1769 = vmatprep.mubr.msk.bf16.mxu0 %vm571_vm0, %v2167_v42  ;;  %1785 = vmatprep.mubr.msk.bf16.mxu1 %vm571_vm0, %v2212_v43 }
  0x65   :  { %765 = vmatmul.mubr.bf16.gmra.mrb[32].mxu0 %v2169_v44  ;;  %893 = vmatmul.mubr.bf16.gmra.mrb[32].mxu1 %v2214_v45 }
  0x66   :  { %1770 = vmatprep.mubr.msk.bf16.mxu0 %vm571_vm0, %v2173_v46  ;;  %1786 = vmatprep.mubr.msk.bf16.mxu1 %vm571_vm0, %v2215_v47 }
  0x6d   :  { %773 = vmatmul.mubr.bf16.gmra.mrb[36].mxu0 %v2175_v48  ;;  %901 = vmatmul.mubr.bf16.gmra.mrb[36].mxu1 %v2217_v49 }
  0x6e   :  { %1771 = vmatprep.mubr.msk.bf16.mxu0 %vm571_vm0, %v2179_v50  ;;  %1787 = vmatprep.mubr.msk.bf16.mxu1 %vm571_vm0, %v2218_v51 }
  0x75   :  { %781 = vmatmul.mubr.bf16.gmra.mrb[40].mxu0 %v2181_v52  ;;  %909 = vmatmul.mubr.bf16.gmra.mrb[40].mxu1 %v2220_v53 }
  0x76   :  { %1772 = vmatprep.mubr.msk.bf16.mxu0 %vm571_vm0, %v2185_v54  ;;  %1788 = vmatprep.mubr.msk.bf16.mxu1 %vm571_vm0, %v2221_v55 }
  0x7d   :  { %789 = vmatmul.mubr.bf16.gmra.mrb[44].mxu0 %v2187_v56  ;;  %917 = vmatmul.mubr.bf16.gmra.mrb[44].mxu1 %v2223_v57 }
  0x7e   :  { %1773 = vmatprep.mubr.msk.bf16.mxu0 %vm571_vm0, %v2191_v58  ;;  %1789 = vmatprep.mubr.msk.bf16.mxu1 %vm571_vm0, %v2224_v59 }
  0x85   :  { %797 = vmatmul.mubr.bf16.gmra.mrb[48].mxu0 %v2193_v60  ;;  %925 = vmatmul.mubr.bf16.gmra.mrb[48].mxu1 %v2226_v61 }
  0x86   :  { %1774 = vmatprep.mubr.msk.bf16.mxu0 %vm571_vm0, %v2197_v62  ;;  %1790 = vmatprep.mubr.msk.bf16.mxu1 %vm571_vm0, %v2227_v63 }
  0x8d   :  { %805 = vmatmul.mubr.bf16.gmra.mrb[52].mxu0 %v2199_v0  ;;  %933 = vmatmul.mubr.bf16.gmra.mrb[52].mxu1 %v2229_v1 }
  0x8e   :  { %1775 = vmatprep.mubr.msk.bf16.mxu0 %vm571_vm0, %v2203_v2  ;;  %1791 = vmatprep.mubr.msk.bf16.mxu1 %vm571_vm0, %v2230_v3 }
  0x95   :  { %813 = vmatmul.mubr.bf16.gmra.mrb[56].mxu0 %v2205_v4  ;;  %941 = vmatmul.mubr.bf16.gmra.mrb[56].mxu1 %v2232_v5 }
  0x96   :  { %1776 = vmatprep.mubr.msk.bf16.mxu0 %vm571_vm0, %v2209_v6  ;;  %1792 = vmatprep.mubr.msk.bf16.mxu1 %vm571_vm0, %v2233_v7 }
  0x9d   :  { %821 = vmatmul.mubr.bf16.gmra.mrb[60].mxu0 %v2211_v8  ;;  %949 = vmatmul.mubr.bf16.gmra.mrb[60].mxu1 %v2235_v9 }
  0xf8   :  { %v702_v10 = vpop.f32.mrb[0].mxu0  ;;  %v2513_v11 = vpop.f32.mrb[0].mxu1 }
  0xf9   :  { %v704_v12 = vpop.f32.mrb[1].mxu0  ;;  %v832_v13 = vpop.f32.mrb[1].mxu1  ;;  %v1542_v14 = vmul.f32 %v702_v10, %v702_v10 }
  0xfa   :  { %v705_v15 = vpop.f32.mrb[2].mxu0  ;;  %v2515_v16 = vpop.f32.mrb[2].mxu1 }
  0xfb   :  { %v1924_v17 = vpack.c.bf16 %v705_v15, %v702_v10  ;;  %v1472_v18 = vadd.f32 %v705_v15, %v702_v10  ;;  %v1543_v19 = vmul.f32 %v705_v15, %v705_v15  ;;  %v707_v20 = vpop.f32.mrb[3].mxu0  ;;  %v2004_v21 = vpack.c.bf16 %v2515_v16, %v2513_v11  ;;  %v835_v22 = vpop.f32.mrb[3].mxu1 }
  0xfd   :  { %1925 = vst [vmem:[%s2809_s2] sm:$0xff] %v1924_v17   ;;  %v1606_v23 = vadd.f32 %v1543_v19, %v1542_v14  ;;  %2096 = vst [vmem:[%s2809_s2 + $0x80] sm:$0xff] %v2004_v21  }
 0x100   :  { %v710_v24 = vpop.f32.mrb[4].mxu0  ;;  %v2525_v25 = vpop.f32.mrb[4].mxu1 }
 0x101   :  { %v1473_v26 = vadd.f32 %v1472_v18, %v710_v24  ;;  %v1544_v27 = vmul.f32 %v710_v24, %v710_v24  ;;  %v712_v28 = vpop.f32.mrb[5].mxu0  ;;  %v840_v29 = vpop.f32.mrb[5].mxu1 }
 0x102   :  { %v713_v30 = vpop.f32.mrb[6].mxu0  ;;  %v2527_v31 = vpop.f32.mrb[6].mxu1 }
 0x103   :  { %v1607_v32 = vadd.f32 %v1606_v23, %v1544_v27  ;;  %v1929_v33 = vpack.c.bf16 %v713_v30, %v710_v24  ;;  %v1474_v34 = vadd.f32 %v1473_v26, %v713_v30  ;;  %v1545_v35 = vmul.f32 %v713_v30, %v713_v30  ;;  %v715_v36 = vpop.f32.mrb[7].mxu0  ;;  %v843_v37 = vpop.f32.mrb[7].mxu1 }
 0x104   :  { %v2009_v38 = vpack.c.bf16 %v2527_v31, %v2525_v25 }
 0x105   :  { %2081 = vst [vmem:[%s2809_s2 + $0x8] sm:$0xff] %v1929_v33   ;;  %v1608_v39 = vadd.f32 %v1607_v32, %v1545_v35 }
 0x106   :  { %2097 = vst [vmem:[%s2809_s2 + $0x88] sm:$0xff] %v2009_v38  }
 0x108   :  { %v718_v40 = vpop.f32.mrb[8].mxu0  ;;  %v2537_v41 = vpop.f32.mrb[8].mxu1 }
 0x109   :  { %v1475_v42 = vadd.f32 %v1474_v34, %v718_v40  ;;  %v1546_v43 = vmul.f32 %v718_v40, %v718_v40  ;;  %v720_v44 = vpop.f32.mrb[9].mxu0  ;;  %v848_v45 = vpop.f32.mrb[9].mxu1 }
 0x10a   :  { %v721_v46 = vpop.f32.mrb[10].mxu0  ;;  %v2539_v47 = vpop.f32.mrb[10].mxu1 }
 0x10b   :  { %v1609_v48 = vadd.f32 %v1608_v39, %v1546_v43  ;;  %v1934_v49 = vpack.c.bf16 %v721_v46, %v718_v40  ;;  %v1476_v50 = vadd.f32 %v1475_v42, %v721_v46  ;;  %v1547_v51 = vmul.f32 %v721_v46, %v721_v46  ;;  %v723_v52 = vpop.f32.mrb[11].mxu0  ;;  %v851_v53 = vpop.f32.mrb[11].mxu1 }
 0x10c   :  { %v2014_v54 = vpack.c.bf16 %v2539_v47, %v2537_v41 }
 0x10d   :  { %2082 = vst [vmem:[%s2809_s2 + $0x10] sm:$0xff] %v1934_v49   ;;  %v1610_v55 = vadd.f32 %v1609_v48, %v1547_v51 }
 0x10e   :  { %2098 = vst [vmem:[%s2809_s2 + $0x90] sm:$0xff] %v2014_v54  }
 0x110   :  { %v726_v56 = vpop.f32.mrb[12].mxu0  ;;  %v2549_v57 = vpop.f32.mrb[12].mxu1 }
 0x111   :  { %v1477_v58 = vadd.f32 %v1476_v50, %v726_v56  ;;  %v1548_v59 = vmul.f32 %v726_v56, %v726_v56  ;;  %v728_v60 = vpop.f32.mrb[13].mxu0  ;;  %v856_v61 = vpop.f32.mrb[13].mxu1 }
 0x112   :  { %v729_v62 = vpop.f32.mrb[14].mxu0  ;;  %v2551_v63 = vpop.f32.mrb[14].mxu1 }
 0x113   :  { %v1611_v0 = vadd.f32 %v1610_v55, %v1548_v59  ;;  %v1939_v1 = vpack.c.bf16 %v729_v62, %v726_v56  ;;  %v1478_v2 = vadd.f32 %v1477_v58, %v729_v62  ;;  %v1549_v3 = vmul.f32 %v729_v62, %v729_v62  ;;  %v731_v4 = vpop.f32.mrb[15].mxu0  ;;  %v859_v5 = vpop.f32.mrb[15].mxu1 }
 0x114   :  { %v2019_v6 = vpack.c.bf16 %v2551_v63, %v2549_v57 }
 0x115   :  { %2083 = vst [vmem:[%s2809_s2 + $0x18] sm:$0xff] %v1939_v1   ;;  %v1612_v7 = vadd.f32 %v1611_v0, %v1549_v3 }
 0x116   :  { %2099 = vst [vmem:[%s2809_s2 + $0x98] sm:$0xff] %v2019_v6  }
 0x118   :  { %v734_v8 = vpop.f32.mrb[16].mxu0  ;;  %v2561_v9 = vpop.f32.mrb[16].mxu1 }
 0x119   :  { %v1479_v10 = vadd.f32 %v1478_v2, %v734_v8  ;;  %v1550_v12 = vmul.f32 %v734_v8, %v734_v8  ;;  %v736_v13 = vpop.f32.mrb[17].mxu0  ;;  %v864_v14 = vpop.f32.mrb[17].mxu1 }
 0x11a   :  { %v737_v15 = vpop.f32.mrb[18].mxu0  ;;  %v2563_v17 = vpop.f32.mrb[18].mxu1 }
 0x11b   :  { %v1613_v18 = vadd.f32 %v1612_v7, %v1550_v12  ;;  %v1944_v19 = vpack.c.bf16 %v737_v15, %v734_v8  ;;  %v1480_v20 = vadd.f32 %v1479_v10, %v737_v15  ;;  %v1551_v21 = vmul.f32 %v737_v15, %v737_v15  ;;  %v739_v22 = vpop.f32.mrb[19].mxu0  ;;  %v867_v23 = vpop.f32.mrb[19].mxu1 }
 0x11c   :  { %v2024_v24 = vpack.c.bf16 %v2563_v17, %v2561_v9 }
 0x11d   :  { %2084 = vst [vmem:[%s2809_s2 + $0x20] sm:$0xff] %v1944_v19   ;;  %v1614_v26 = vadd.f32 %v1613_v18, %v1551_v21 }
 0x11e   :  { %2100 = vst [vmem:[%s2809_s2 + $0xa0] sm:$0xff] %v2024_v24  }
 0x120   :  { %v742_v27 = vpop.f32.mrb[20].mxu0  ;;  %v2573_v28 = vpop.f32.mrb[20].mxu1 }
 0x121   :  { %v1481_v29 = vadd.f32 %v1480_v20, %v742_v27  ;;  %v1552_v30 = vmul.f32 %v742_v27, %v742_v27  ;;  %v744_v32 = vpop.f32.mrb[21].mxu0  ;;  %v872_v33 = vpop.f32.mrb[21].mxu1 }
 0x122   :  { %v745_v34 = vpop.f32.mrb[22].mxu0  ;;  %v2575_v35 = vpop.f32.mrb[22].mxu1 }
 0x123   :  { %v1615_v36 = vadd.f32 %v1614_v26, %v1552_v30  ;;  %v1949_v37 = vpack.c.bf16 %v745_v34, %v742_v27  ;;  %v1482_v38 = vadd.f32 %v1481_v29, %v745_v34  ;;  %v1553_v39 = vmul.f32 %v745_v34, %v745_v34  ;;  %v747_v40 = vpop.f32.mrb[23].mxu0  ;;  %v875_v42 = vpop.f32.mrb[23].mxu1 }
 0x124   :  { %v2029_v43 = vpack.c.bf16 %v2575_v35, %v2573_v28 }
 0x125   :  { %2085 = vst [vmem:[%s2809_s2 + $0x28] sm:$0xff] %v1949_v37   ;;  %v1616_v44 = vadd.f32 %v1615_v36, %v1553_v39 }
 0x126   :  { %2101 = vst [vmem:[%s2809_s2 + $0xa8] sm:$0xff] %v2029_v43  }
 0x128   :  { %v750_v45 = vpop.f32.mrb[24].mxu0  ;;  %v2585_v46 = vpop.f32.mrb[24].mxu1 }
 0x129   :  { %v1483_v48 = vadd.f32 %v1482_v38, %v750_v45  ;;  %v1554_v49 = vmul.f32 %v750_v45, %v750_v45  ;;  %v752_v50 = vpop.f32.mrb[25].mxu0  ;;  %v880_v51 = vpop.f32.mrb[25].mxu1 }
 0x12a   :  { %v753_v52 = vpop.f32.mrb[26].mxu0  ;;  %v2587_v53 = vpop.f32.mrb[26].mxu1 }
 0x12b   :  { %v1617_v54 = vadd.f32 %v1616_v44, %v1554_v49  ;;  %v1954_v55 = vpack.c.bf16 %v753_v52, %v750_v45  ;;  %v1484_v56 = vadd.f32 %v1483_v48, %v753_v52  ;;  %v1555_v58 = vmul.f32 %v753_v52, %v753_v52  ;;  %v755_v59 = vpop.f32.mrb[27].mxu0  ;;  %v883_v60 = vpop.f32.mrb[27].mxu1 }
 0x12c   :  { %v2034_v61 = vpack.c.bf16 %v2587_v53, %v2585_v46 }
 0x12d   :  { %2086 = vst [vmem:[%s2809_s2 + $0x30] sm:$0xff] %v1954_v55   ;;  %v1618_v62 = vadd.f32 %v1617_v54, %v1555_v58 }
 0x12e   :  { %2102 = vst [vmem:[%s2809_s2 + $0xb0] sm:$0xff] %v2034_v61  }
 0x130   :  { %v758_v0 = vpop.f32.mrb[28].mxu0  ;;  %v2597_v1 = vpop.f32.mrb[28].mxu1 }
 0x131   :  { %v1485_v2 = vadd.f32 %v1484_v56, %v758_v0  ;;  %v1556_v3 = vmul.f32 %v758_v0, %v758_v0  ;;  %v760_v4 = vpop.f32.mrb[29].mxu0  ;;  %v888_v5 = vpop.f32.mrb[29].mxu1 }
 0x132   :  { %v761_v6 = vpop.f32.mrb[30].mxu0  ;;  %v2599_v7 = vpop.f32.mrb[30].mxu1 }
 0x133   :  { %v1619_v8 = vadd.f32 %v1618_v62, %v1556_v3  ;;  %v1959_v10 = vpack.c.bf16 %v761_v6, %v758_v0  ;;  %v1486_v12 = vadd.f32 %v1485_v2, %v761_v6  ;;  %v1557_v13 = vmul.f32 %v761_v6, %v761_v6  ;;  %v763_v14 = vpop.f32.mrb[31].mxu0  ;;  %v891_v15 = vpop.f32.mrb[31].mxu1 }
 0x134   :  { %v2039_v18 = vpack.c.bf16 %v2599_v7, %v2597_v1 }
 0x135   :  { %2087 = vst [vmem:[%s2809_s2 + $0x38] sm:$0xff] %v1959_v10   ;;  %v1620_v19 = vadd.f32 %v1619_v8, %v1557_v13 }
 0x136   :  { %2103 = vst [vmem:[%s2809_s2 + $0xb8] sm:$0xff] %v2039_v18  }
 0x138   :  { %v766_v20 = vpop.f32.mrb[32].mxu0  ;;  %v2609_v21 = vpop.f32.mrb[32].mxu1 }
 0x139   :  { %v1487_v22 = vadd.f32 %v1486_v12, %v766_v20  ;;  %v1558_v23 = vmul.f32 %v766_v20, %v766_v20  ;;  %v768_v24 = vpop.f32.mrb[33].mxu0  ;;  %v896_v26 = vpop.f32.mrb[33].mxu1 }
 0x13a   :  { %v769_v27 = vpop.f32.mrb[34].mxu0  ;;  %v2611_v29 = vpop.f32.mrb[34].mxu1 }
 0x13b   :  { %v1621_v30 = vadd.f32 %v1620_v19, %v1558_v23  ;;  %v1964_v32 = vpack.c.bf16 %v769_v27, %v766_v20  ;;  %v1488_v33 = vadd.f32 %v1487_v22, %v769_v27  ;;  %v1559_v34 = vmul.f32 %v769_v27, %v769_v27  ;;  %v771_v36 = vpop.f32.mrb[35].mxu0  ;;  %v899_v37 = vpop.f32.mrb[35].mxu1 }
 0x13c   :  { %v2044_v38 = vpack.c.bf16 %v2611_v29, %v2609_v21 }
 0x13d   :  { %2088 = vst [vmem:[%s2809_s2 + $0x40] sm:$0xff] %v1964_v32   ;;  %v1622_v39 = vadd.f32 %v1621_v30, %v1559_v34 }
 0x13e   :  { %2104 = vst [vmem:[%s2809_s2 + $0xc0] sm:$0xff] %v2044_v38  }
 0x140   :  { %v774_v40 = vpop.f32.mrb[36].mxu0  ;;  %v2621_v42 = vpop.f32.mrb[36].mxu1 }
 0x141   :  { %v1489_v43 = vadd.f32 %v1488_v33, %v774_v40  ;;  %v1560_v44 = vmul.f32 %v774_v40, %v774_v40  ;;  %v776_v45 = vpop.f32.mrb[37].mxu0  ;;  %v904_v48 = vpop.f32.mrb[37].mxu1 }
 0x142   :  { %v777_v49 = vpop.f32.mrb[38].mxu0  ;;  %v2623_v50 = vpop.f32.mrb[38].mxu1 }
 0x143   :  { %v1623_v51 = vadd.f32 %v1622_v39, %v1560_v44  ;;  %v1969_v52 = vpack.c.bf16 %v777_v49, %v774_v40  ;;  %v1490_v54 = vadd.f32 %v1489_v43, %v777_v49  ;;  %v1561_v55 = vmul.f32 %v777_v49, %v777_v49  ;;  %v779_v56 = vpop.f32.mrb[39].mxu0  ;;  %v907_v58 = vpop.f32.mrb[39].mxu1 }
 0x144   :  { %v2049_v59 = vpack.c.bf16 %v2623_v50, %v2621_v42 }
 0x145   :  { %2089 = vst [vmem:[%s2809_s2 + $0x48] sm:$0xff] %v1969_v52   ;;  %v1624_v60 = vadd.f32 %v1623_v51, %v1561_v55 }
 0x146   :  { %2105 = vst [vmem:[%s2809_s2 + $0xc8] sm:$0xff] %v2049_v59  }
 0x148   :  { %v782_v61 = vpop.f32.mrb[40].mxu0  ;;  %v2633_v62 = vpop.f32.mrb[40].mxu1 }
 0x149   :  { %v1491_v0 = vadd.f32 %v1490_v54, %v782_v61  ;;  %v1562_v2 = vmul.f32 %v782_v61, %v782_v61  ;;  %v784_v3 = vpop.f32.mrb[41].mxu0  ;;  %v912_v4 = vpop.f32.mrb[41].mxu1 }
 0x14a   :  { %v785_v5 = vpop.f32.mrb[42].mxu0  ;;  %v2635_v6 = vpop.f32.mrb[42].mxu1 }
 0x14b   :  { %v1625_v8 = vadd.f32 %v1624_v60, %v1562_v2  ;;  %v1974_v10 = vpack.c.bf16 %v785_v5, %v782_v61  ;;  %v1492_v12 = vadd.f32 %v1491_v0, %v785_v5  ;;  %v1563_v13 = vmul.f32 %v785_v5, %v785_v5  ;;  %v787_v14 = vpop.f32.mrb[43].mxu0  ;;  %v915_v15 = vpop.f32.mrb[43].mxu1 }
 0x14c   :  { %v2054_v18 = vpack.c.bf16 %v2635_v6, %v2633_v62 }
 0x14d   :  { %2090 = vst [vmem:[%s2809_s2 + $0x50] sm:$0xff] %v1974_v10   ;;  %v1626_v19 = vadd.f32 %v1625_v8, %v1563_v13 }
 0x14e   :  { %2106 = vst [vmem:[%s2809_s2 + $0xd0] sm:$0xff] %v2054_v18  }
 0x150   :  { %v790_v20 = vpop.f32.mrb[44].mxu0  ;;  %v2645_v22 = vpop.f32.mrb[44].mxu1 }
 0x151   :  { %v1493_v23 = vadd.f32 %v1492_v12, %v790_v20  ;;  %v1564_v24 = vmul.f32 %v790_v20, %v790_v20  ;;  %v792_v26 = vpop.f32.mrb[45].mxu0  ;;  %v920_v27 = vpop.f32.mrb[45].mxu1 }
 0x152   :  { %v793_v30 = vpop.f32.mrb[46].mxu0  ;;  %v2647_v32 = vpop.f32.mrb[46].mxu1 }
 0x153   :  { %v1627_v33 = vadd.f32 %v1626_v19, %v1564_v24  ;;  %v1979_v34 = vpack.c.bf16 %v793_v30, %v790_v20  ;;  %v1494_v36 = vadd.f32 %v1493_v23, %v793_v30  ;;  %v1565_v37 = vmul.f32 %v793_v30, %v793_v30  ;;  %v795_v38 = vpop.f32.mrb[47].mxu0  ;;  %v923_v39 = vpop.f32.mrb[47].mxu1 }
 0x154   :  { %v2059_v40 = vpack.c.bf16 %v2647_v32, %v2645_v22 }
 0x155   :  { %2091 = vst [vmem:[%s2809_s2 + $0x58] sm:$0xff] %v1979_v34   ;;  %v1628_v43 = vadd.f32 %v1627_v33, %v1565_v37 }
 0x156   :  { %2107 = vst [vmem:[%s2809_s2 + $0xd8] sm:$0xff] %v2059_v40  }
 0x158   :  { %v798_v44 = vpop.f32.mrb[48].mxu0  ;;  %v2657_v45 = vpop.f32.mrb[48].mxu1 }
 0x159   :  { %v1495_v48 = vadd.f32 %v1494_v36, %v798_v44  ;;  %v1566_v49 = vmul.f32 %v798_v44, %v798_v44  ;;  %v800_v51 = vpop.f32.mrb[49].mxu0  ;;  %v928_v52 = vpop.f32.mrb[49].mxu1 }
 0x15a   :  { %v801_v54 = vpop.f32.mrb[50].mxu0  ;;  %v2659_v55 = vpop.f32.mrb[50].mxu1 }
 0x15b   :  { %v1629_v56 = vadd.f32 %v1628_v43, %v1566_v49  ;;  %v1984_v58 = vpack.c.bf16 %v801_v54, %v798_v44  ;;  %v1496_v59 = vadd.f32 %v1495_v48, %v801_v54  ;;  %v1567_v60 = vmul.f32 %v801_v54, %v801_v54  ;;  %v803_v61 = vpop.f32.mrb[51].mxu0  ;;  %v931_v0 = vpop.f32.mrb[51].mxu1 }
 0x15c   :  { %v2064_v2 = vpack.c.bf16 %v2659_v55, %v2657_v45 }
 0x15d   :  { %2092 = vst [vmem:[%s2809_s2 + $0x60] sm:$0xff] %v1984_v58   ;;  %v1630_v3 = vadd.f32 %v1629_v56, %v1567_v60 }
 0x15e   :  { %2108 = vst [vmem:[%s2809_s2 + $0xe0] sm:$0xff] %v2064_v2  }
 0x160   :  { %v806_v4 = vpop.f32.mrb[52].mxu0  ;;  %v2669_v5 = vpop.f32.mrb[52].mxu1 }
 0x161   :  { %v1497_v8 = vadd.f32 %v1496_v59, %v806_v4  ;;  %v1568_v10 = vmul.f32 %v806_v4, %v806_v4  ;;  %v808_v12 = vpop.f32.mrb[53].mxu0  ;;  %v936_v13 = vpop.f32.mrb[53].mxu1 }
 0x162   :  { %v809_v14 = vpop.f32.mrb[54].mxu0  ;;  %v2671_v15 = vpop.f32.mrb[54].mxu1 }
 0x163   :  { %v1631_v18 = vadd.f32 %v1630_v3, %v1568_v10  ;;  %v1989_v19 = vpack.c.bf16 %v809_v14, %v806_v4  ;;  %v1498_v20 = vadd.f32 %v1497_v8, %v809_v14  ;;  %v1569_v23 = vmul.f32 %v809_v14, %v809_v14  ;;  %v811_v24 = vpop.f32.mrb[55].mxu0  ;;  %v939_v26 = vpop.f32.mrb[55].mxu1 }
 0x164   :  { %v2069_v27 = vpack.c.bf16 %v2671_v15, %v2669_v5 }
 0x165   :  { %2093 = vst [vmem:[%s2809_s2 + $0x68] sm:$0xff] %v1989_v19   ;;  %v1632_v30 = vadd.f32 %v1631_v18, %v1569_v23  ;;  %v1574_v23 = vmul.f32 %v2513_v11, %v2513_v11 }
 0x166   :  { %2109 = vst [vmem:[%s2809_s2 + $0xe8] sm:$0xff] %v2069_v27   ;;  %v1575_v27 = vmul.f32 %v2515_v16, %v2515_v16 }
 0x168   :  { %v814_v33 = vpop.f32.mrb[56].mxu0  ;;  %v2681_v34 = vpop.f32.mrb[56].mxu1 }
 0x169   :  { %v1499_v36 = vadd.f32 %v1498_v20, %v814_v33  ;;  %v1570_v37 = vmul.f32 %v814_v33, %v814_v33  ;;  %v816_v38 = vpop.f32.mrb[57].mxu0  ;;  %v944_v39 = vpop.f32.mrb[57].mxu1 }
 0x16a   :  { %v817_v40 = vpop.f32.mrb[58].mxu0  ;;  %v2683_v43 = vpop.f32.mrb[58].mxu1 }
 0x16b   :  { %v1633_v44 = vadd.f32 %v1632_v30, %v1570_v37  ;;  %v1994_v48 = vpack.c.bf16 %v817_v40, %v814_v33  ;;  %v1500_v49 = vadd.f32 %v1499_v36, %v817_v40  ;;  %v1571_v51 = vmul.f32 %v817_v40, %v817_v40  ;;  %v819_v52 = vpop.f32.mrb[59].mxu0  ;;  %v947_v54 = vpop.f32.mrb[59].mxu1 }
 0x16c   :  { %v2074_v56 = vpack.c.bf16 %v2683_v43, %v2681_v34  ;;  %v1576_v36 = vmul.f32 %v2525_v25, %v2525_v25 }
 0x16d   :  { %2094 = vst [vmem:[%s2809_s2 + $0x70] sm:$0xff] %v1994_v48   ;;  %v1634_v58 = vadd.f32 %v1633_v44, %v1571_v51  ;;  %v1578_v44 = vmul.f32 %v2537_v41, %v2537_v41 }
 0x16e   :  { %2110 = vst [vmem:[%s2809_s2 + $0xf0] sm:$0xff] %v2074_v56  }
 0x170   :  { %v822_v59 = vpop.f32.mrb[60].mxu0  ;;  %v2693_v60 = vpop.f32.mrb[60].mxu1 }
 0x171   :  { %v1501_v61 = vadd.f32 %v1500_v49, %v822_v59  ;;  %v1572_v0 = vmul.f32 %v822_v59, %v822_v59  ;;  %v824_v2 = vpop.f32.mrb[61].mxu0  ;;  %v952_v3 = vpop.f32.mrb[61].mxu1 }
 0x172   :  { %v825_v4 = vpop.f32.mrb[62].mxu0  ;;  %v2695_v8 = vpop.f32.mrb[62].mxu1 }
 0x173   :  { %v1635_v10 = vadd.f32 %v1634_v58, %v1572_v0  ;;  %v1999_v12 = vpack.c.bf16 %v825_v4, %v822_v59  ;;  %v1502_v13 = vadd.f32 %v1501_v61, %v825_v4  ;;  %v1573_v14 = vmul.f32 %v825_v4, %v825_v4  ;;  %v827_v18 = vpop.f32.mrb[63].mxu0  ;;  %v955_v19 = vpop.f32.mrb[63].mxu1 }
 0x174   :  { %v2079_v20 = vpack.c.bf16 %v2695_v8, %v2693_v60 }
 0x175   :  { %2095 = vst [vmem:[%s2809_s2 + $0x78] sm:$0xff] %v1999_v12   ;;  %v1503_v24 = vadd.f32 %v1502_v13, %v2513_v11  ;;  %v1636_v26 = vadd.f32 %v1635_v10, %v1573_v14  ;;  %v1577_v11 = vmul.f32 %v2527_v31, %v2527_v31 }
 0x176   :  { %2111 = vst [vmem:[%s2809_s2 + $0xf8] sm:$0xff] %v2079_v20  }
 0x177   :  { %v1504_v30 = vadd.f32 %v1503_v24, %v2515_v16  ;;  %v1637_v33 = vadd.f32 %v1636_v26, %v1574_v23  ;;  %v1579_v16 = vmul.f32 %v2539_v47, %v2539_v47 }
 0x179   :  { %v1505_v37 = vadd.f32 %v1504_v30, %v2525_v25  ;;  %v1638_v38 = vadd.f32 %v1637_v33, %v1575_v27  ;;  %v1580_v25 = vmul.f32 %v2549_v57, %v2549_v57  ;;  %v1590_v30 = vmul.f32 %v2609_v21, %v2609_v21 }
 0x17b   :  { %v1506_v39 = vadd.f32 %v1505_v37, %v2527_v31  ;;  %v1639_v40 = vadd.f32 %v1638_v38, %v1576_v36  ;;  %v1581_v31 = vmul.f32 %v2551_v63, %v2551_v63  ;;  %v1591_v37 = vmul.f32 %v2611_v29, %v2611_v29 }
 0x17d   :  { %v1507_v48 = vadd.f32 %v1506_v39, %v2537_v41  ;;  %v1640_v49 = vadd.f32 %v1639_v40, %v1577_v11  ;;  %v1582_v41 = vmul.f32 %v2561_v9, %v2561_v9  ;;  %v1592_v11 = vmul.f32 %v2621_v42, %v2621_v42 }
 0x17e   :  { %v1593_v40 = vmul.f32 %v2623_v50, %v2623_v50 }
 0x17f   :  { %v1508_v51 = vadd.f32 %v1507_v48, %v2539_v47  ;;  %v1641_v52 = vadd.f32 %v1640_v49, %v1578_v44  ;;  %v1583_v47 = vmul.f32 %v2563_v17, %v2563_v17  ;;  %v1594_v48 = vmul.f32 %v2633_v62, %v2633_v62 }
 0x181   :  { %v1509_v54 = vadd.f32 %v1508_v51, %v2549_v57  ;;  %v1642_v56 = vadd.f32 %v1641_v52, %v1579_v16  ;;  %v1584_v57 = vmul.f32 %v2573_v28, %v2573_v28  ;;  %v1595_v16 = vmul.f32 %v2635_v6, %v2635_v6 }
 0x182   :  { %v1596_v52 = vmul.f32 %v2645_v22, %v2645_v22 }
 0x183   :  { %v1510_v58 = vadd.f32 %v1509_v54, %v2551_v63  ;;  %v1643_v59 = vadd.f32 %v1642_v56, %v1580_v25  ;;  %v1585_v63 = vmul.f32 %v2575_v35, %v2575_v35  ;;  %v1597_v54 = vmul.f32 %v2647_v32, %v2647_v32 }
 0x185   :  { %v1644_v61 = vadd.f32 %v1643_v59, %v1581_v31  ;;  %v1511_v0 = vadd.f32 %v1510_v58, %v2561_v9  ;;  %v1586_v9 = vmul.f32 %v2585_v46, %v2585_v46  ;;  %v1598_v31 = vmul.f32 %v2657_v45, %v2657_v45 }
 0x186   :  { %v1599_v59 = vmul.f32 %v2659_v55, %v2659_v55 }
 0x187   :  { %v1512_v2 = vadd.f32 %v1511_v0, %v2563_v17  ;;  %v1645_v3 = vadd.f32 %v1644_v61, %v1582_v41  ;;  %v1587_v17 = vmul.f32 %v2587_v53, %v2587_v53  ;;  %v1600_v61 = vmul.f32 %v2669_v5, %v2669_v5 }
 0x189   :  { %v1513_v4 = vadd.f32 %v1512_v2, %v2573_v28  ;;  %v1646_v10 = vadd.f32 %v1645_v3, %v1583_v47  ;;  %v1588_v28 = vmul.f32 %v2597_v1, %v2597_v1  ;;  %v1601_v47 = vmul.f32 %v2671_v15, %v2671_v15 }
 0x18a   :  { %v1602_v3 = vmul.f32 %v2681_v34, %v2681_v34 }
 0x18b   :  { %v1514_v12 = vadd.f32 %v1513_v4, %v2575_v35  ;;  %v1647_v13 = vadd.f32 %v1646_v10, %v1584_v57  ;;  %v1589_v35 = vmul.f32 %v2599_v7, %v2599_v7  ;;  %v1603_v4 = vmul.f32 %v2683_v43, %v2683_v43 }
 0x18d   :  { %v1515_v14 = vadd.f32 %v1514_v12, %v2585_v46  ;;  %v1648_v18 = vadd.f32 %v1647_v13, %v1585_v63  ;;  %v1605_v13 = vmul.f32 %v2695_v8, %v2695_v8 }
 0x18f   :  { %v1516_v19 = vadd.f32 %v1515_v14, %v2587_v53  ;;  %v1649_v20 = vadd.f32 %v1648_v18, %v1586_v9 }
 0x191   :  { %v1517_v23 = vadd.f32 %v1516_v19, %v2597_v1  ;;  %v1650_v24 = vadd.f32 %v1649_v20, %v1587_v17 }
 0x193   :  { %v1518_v26 = vadd.f32 %v1517_v23, %v2599_v7  ;;  %v1651_v27 = vadd.f32 %v1650_v24, %v1588_v28 }
 0x195   :  { %v1519_v46 = vadd.f32 %v1518_v26, %v2609_v21  ;;  %v1652_v33 = vadd.f32 %v1651_v27, %v1589_v35 }
 0x197   :  { %v1653_v53 = vadd.f32 %v1652_v33, %v1590_v30  ;;  %v1520_v36 = vadd.f32 %v1519_v46, %v2611_v29 }
 0x199   :  { %v1654_v1 = vadd.f32 %v1653_v53, %v1591_v37  ;;  %v1521_v38 = vadd.f32 %v1520_v36, %v2621_v42 }
 0x19b   :  { %v1655_v7 = vadd.f32 %v1654_v1, %v1592_v11  ;;  %v1522_v39 = vadd.f32 %v1521_v38, %v2623_v50 }
 0x19d   :  { %v1656_v21 = vadd.f32 %v1655_v7, %v1593_v40  ;;  %v1523_v44 = vadd.f32 %v1522_v39, %v2633_v62 }
 0x19f   :  { %v1657_v49 = vadd.f32 %v1656_v21, %v1594_v48  ;;  %v1524_v29 = vadd.f32 %v1523_v44, %v2635_v6 }
 0x1a1   :  { %v1658_v51 = vadd.f32 %v1657_v49, %v1595_v16  ;;  %v1525_v42 = vadd.f32 %v1524_v29, %v2645_v22 }
 0x1a3   :  { %v1659_v25 = vadd.f32 %v1658_v51, %v1596_v52  ;;  %v1526_v50 = vadd.f32 %v1525_v42, %v2647_v32 }
 0x1a5   :  { %v1660_v56 = vadd.f32 %v1659_v25, %v1597_v54  ;;  %v1527_v62 = vadd.f32 %v1526_v50, %v2657_v45 }
 0x1a7   :  { %v1661_v58 = vadd.f32 %v1660_v56, %v1598_v31  ;;  %v1528_v6 = vadd.f32 %v1527_v62, %v2659_v55 }
 0x1a9   :  { %v1662_v41 = vadd.f32 %v1661_v58, %v1599_v59  ;;  %v1529_v22 = vadd.f32 %v1528_v6, %v2669_v5  ;;  %v1604_v5 = vmul.f32 %v2693_v60, %v2693_v60 }
 0x1ab   :  { %v1663_v0 = vadd.f32 %v1662_v41, %v1600_v61  ;;  %v1530_v32 = vadd.f32 %v1529_v22, %v2671_v15 }
 0x1ad   :  { %v1664_v2 = vadd.f32 %v1663_v0, %v1601_v47  ;;  %v1531_v45 = vadd.f32 %v1530_v32, %v2681_v34 }
 0x1af   :  { %v1665_v57 = vadd.f32 %v1664_v2, %v1602_v3  ;;  %v1532_v55 = vadd.f32 %v1531_v45, %v2683_v43 }
 0x1b1   :  { %v1666_v10 = vadd.f32 %v1665_v57, %v1603_v4  ;;  %v1533_v63 = vadd.f32 %v1532_v55, %v2693_v60 }
 0x1b3   :  { %v1667_v12 = vadd.f32 %v1666_v10, %v1604_v5  ;;  %v1534_v15 = vadd.f32 %v1533_v63, %v2695_v8 }
 0x1b5   :  { %v1535_v9 = vrot.slane %v1534_v15, 4  ;;  %v1668_v34 = vadd.f32 %v1667_v12, %v1605_v13 }
 0x1b7   :  { %v1536_v14 = vadd.f32 %v1535_v9, %v1534_v15  ;;  %v1669_v18 = vrot.slane %v1668_v34, 4 }
 0x1b9   :  { %v1537_v17 = vrot.slane %v1536_v14, 2  ;;  %v1670_v19 = vadd.f32 %v1669_v18, %v1668_v34 }
 0x1bb   :  { %v1538_v20 = vadd.f32 %v1537_v17, %v1536_v14  ;;  %v1671_v43 = vrot.slane %v1670_v19, 2 }
 0x1bd   :  { %v1539_v28 = vrot.slane %v1538_v20, 1  ;;  %v1672_v23 = vadd.f32 %v1671_v43, %v1670_v19 }
 0x1bf   :  { %v1540_v24 = vadd.f32 %v1539_v28, %v1538_v20  ;;  %v1673_v35 = vrot.slane %v1672_v23, 1 }
 0x1c1   :  { %1541 = vst [vmem:[%s2810_s3] sm:$0x1] %v1540_v24  ;;  %v1674_v60 = vadd.f32 %v1673_v35, %v1672_v23 }
 0x1c3   :  { %1675 = vst [vmem:[%s2811_s4] sm:$0x1] %v1674_v60 }

// kernel: tile.58
= control target key start
LH: loop header
LB: loop body
LE: loop exit
PB: predicated region body
PF: predicated region fallthrough
CT: control target
= control target key end

     0   :  { %s22_s0 = inlined_call_operand.vmem [shape: f32[8], index: 0, kind: input, shape index: {}]   ;;  %s23_s1 = inlined_call_operand.vmem [shape: f32[4,8], index: 1, kind: output, shape index: {}]  }
   0x1   :  { %v4_v0 = vld [vmem:[%s22_s0] ss:$0 sm:$0xff] }
   0x2   :  { %5 = vst [vmem:[%s23_s1] sm:$0xf] %v4_v0 }

// kernel: tile.59
= control target key start
LH: loop header
LB: loop body
LE: loop exit
PB: predicated region body
PF: predicated region fallthrough
CT: control target
= control target key end

     0   :  { %vm7_vm0 = vcmask 64512   ;;  %s37_s8 = smov 8   ;;  %s38_s9 = smov 16   ;;  %vm13_vm1 = vcmask 261312   ;;  %vm19_vm2 = vcmask 195712   ;;  %vm25_vm3 = vcmask 130112   ;;  %s55_s0 = inlined_call_operand.vmem [shape: f32[4,8], index: 0, kind: input, shape index: {}]   ;;  %s56_s1 = inlined_call_operand.vmem [shape: f32[32], index: 1, kind: output, shape index: {}]  }
   0x1   :  { %v4_v0 = vld [vmem:[%s55_s0] sm:$0xf]  ;;  %s36_s0 = smov 24  }
   0x2   :  { %5 = vst [vmem:[#allocation1] sm:$0xf] %v4_v0 }
   0x9   :  { %v10_v1 = vld [vmem:[#allocation1 + $0x3] sm:$0x1]   ;;  %v22_v2 = vld [vmem:[#allocation1 + $0x1] sm:$0x1]   ;;  %v6_v3 = vld [vmem:[#allocation1] sm:$0x1]  }
   0xa   :  { %11 = vrot.lane.b32.xlu0 %v10_v1, %s36_s0  ;;  %23 = vrot.lane.b32.xlu1 %v22_v2, %s37_s8  ;;  %v16_v4 = vld [vmem:[#allocation1 + $0x2] sm:$0x1]   ;;  %8 = vst.msk [vmem:[#allocation0] sm:$0x1] %vm7_vm0, %v6_v3  }
   0xe   :  { %17 = vrot.lane.b32.xlu0 %v16_v4, %s38_s9 }
  0x7c   :  { %v12_v5 = vpop.permute.xlu0 %11   ;;  %v24_v6 = vpop.permute.xlu1 %23  }
  0x7d   :  { %14 = vst.msk [vmem:[#allocation0] sm:$0x1] %vm13_vm1, %v12_v5  }
  0x80   :  { %v18_v7 = vpop.permute.xlu0 %17  }
  0x81   :  { %20 = vst.msk [vmem:[#allocation0] sm:$0x1] %vm19_vm2, %v18_v7  }
  0x82   :  { %26 = vst.msk [vmem:[#allocation0] sm:$0x1] %vm25_vm3, %v24_v6  }
  0x89   :  { %v30_v8 = vld [vmem:[#allocation0] sm:$0x1] }
  0x8a   :  { %32 = vst [vmem:[%s56_s1] sm:$0x1] %v30_v8 }

// kernel: wgan_generator_forward.16
= control target key start
LH: loop header
LB: loop body
LE: loop exit
PB: predicated region body
PF: predicated region fallthrough
CT: control target
= control target key end

     0   :  { %s1502_s0 = inlined_call_operand.vmem [shape: bf16[512,128], index: 0, kind: input, shape index: {}]   ;;  %s1503_s1 = inlined_call_operand.vmem [shape: f32[1,128], index: 1, kind: input, shape index: {}]   ;;  %s1504_s2 = inlined_call_operand.vmem [shape: f32[1,128], index: 2, kind: input, shape index: {}]   ;;  %s1505_s3 = inlined_call_operand.vmem [shape: bf16[512,128], index: 3, kind: output, shape index: {}]  }
   0x1   :  { %v803_v0 = vld [vmem:[%s1502_s0] sm:$0xff]   ;;  %v1090_v4 = vld [vmem:[%s1502_s0 + $0x8] sm:$0xff]   ;;  %v1091_v5 = vld [vmem:[%s1502_s0 + $0x10] sm:$0xff]  }
   0x2   :  { %v1178_v1 = vld [vmem:[%s1503_s1] ss:$0 sm:$0xff]  ;;  %v804_v2 = vunpack.c.l.bf16 %v803_v0  ;;  %v805_v3 = vunpack.c.h.bf16 %v803_v0  ;;  %v1092_v6 = vld [vmem:[%s1502_s0 + $0x18] sm:$0xff]   ;;  %v808_v8 = vunpack.c.l.bf16 %v1090_v4  ;;  %v809_v9 = vunpack.c.h.bf16 %v1090_v4  ;;  %v1094_v33 = vld [vmem:[%s1502_s0 + $0x28] sm:$0xff]  }
   0x3   :  { %v1192_v7 = vld [vmem:[%s1504_s2] ss:$0 sm:$0xff]  ;;  %v812_v10 = vunpack.c.l.bf16 %v1091_v5  ;;  %v813_v11 = vunpack.c.h.bf16 %v1091_v5  ;;  %v816_v14 = vunpack.c.l.bf16 %v1092_v6  ;;  %v817_v15 = vunpack.c.h.bf16 %v1092_v6  ;;  %v1095_v38 = vld [vmem:[%s1502_s0 + $0x30] sm:$0xff]   ;;  %v1096_v43 = vld [vmem:[%s1502_s0 + $0x38] sm:$0xff]  }
   0x4   :  { %v149_v12 = vmul.f32 %v804_v2, %v1178_v1  ;;  %v150_v13 = vmul.f32 %v805_v3, %v1178_v1  ;;  %v151_v16 = vmul.f32 %v808_v8, %v1178_v1  ;;  %v152_v17 = vmul.f32 %v809_v9, %v1178_v1  ;;  %v1093_v28 = vld [vmem:[%s1502_s0 + $0x20] sm:$0xff]  }
   0x5   :  { %v153_v18 = vmul.f32 %v812_v10, %v1178_v1  ;;  %v154_v19 = vmul.f32 %v813_v11, %v1178_v1  ;;  %v155_v22 = vmul.f32 %v816_v14, %v1178_v1  ;;  %v156_v23 = vmul.f32 %v817_v15, %v1178_v1  ;;  %v1097_v0 = vld [vmem:[%s1502_s0 + $0x40] sm:$0xff]   ;;  %v1098_v11 = vld [vmem:[%s1502_s0 + $0x48] sm:$0xff]  }
   0x6   :  { %v220_v20 = vadd.f32 %v1192_v7, %v149_v12  ;;  %v221_v21 = vadd.f32 %v1192_v7, %v150_v13  ;;  %v222_v24 = vadd.f32 %v1192_v7, %v151_v16  ;;  %v223_v25 = vadd.f32 %v1192_v7, %v152_v17  ;;  %v1099_v16 = vld [vmem:[%s1502_s0 + $0x50] sm:$0xff]  }
   0x7   :  { %v224_v26 = vadd.f32 %v1192_v7, %v153_v18  ;;  %v225_v27 = vadd.f32 %v1192_v7, %v154_v19  ;;  %v226_v31 = vadd.f32 %v1192_v7, %v155_v22  ;;  %v227_v32 = vadd.f32 %v1192_v7, %v156_v23 }
   0x8   :  { %v284_v29 = vmax.f32 %v220_v20, 0.0  ;;  %v285_v30 = vmax.f32 %v221_v21, 0.0  ;;  %v286_v34 = vmax.f32 %v222_v24, 0.0  ;;  %v287_v35 = vmax.f32 %v223_v25, 0.0  ;;  %v1100_v25 = vld [vmem:[%s1502_s0 + $0x58] sm:$0xff]  }
   0x9   :  { %v288_v36 = vmax.f32 %v224_v26, 0.0  ;;  %v289_v37 = vmax.f32 %v225_v27, 0.0  ;;  %v290_v40 = vmax.f32 %v226_v31, 0.0  ;;  %v291_v41 = vmax.f32 %v227_v32, 0.0 }
   0xa   :  { %v933_v39 = vpack.c.bf16 %v285_v30, %v284_v29  ;;  %v820_v42 = vunpack.c.l.bf16 %v1093_v28  ;;  %v938_v44 = vpack.c.bf16 %v287_v35, %v286_v34  ;;  %v821_v46 = vunpack.c.h.bf16 %v1093_v28 }
   0xb   :  { %v943_v45 = vpack.c.bf16 %v289_v37, %v288_v36  ;;  %v824_v47 = vunpack.c.l.bf16 %v1094_v33  ;;  %v948_v48 = vpack.c.bf16 %v291_v41, %v290_v40  ;;  %v825_v50 = vunpack.c.h.bf16 %v1094_v33 }
   0xc   :  { %934 = vst [vmem:[%s1505_s3] sm:$0xff] %v933_v39   ;;  %v157_v49 = vmul.f32 %v820_v42, %v1178_v1  ;;  %v828_v51 = vunpack.c.l.bf16 %v1095_v38  ;;  %1121 = vst [vmem:[%s1505_s3 + $0x8] sm:$0xff] %v938_v44   ;;  %v158_v52 = vmul.f32 %v821_v46, %v1178_v1  ;;  %v829_v54 = vunpack.c.h.bf16 %v1095_v38  ;;  %v1101_v38 = vld [vmem:[%s1502_s0 + $0x60] sm:$0xff]  }
   0xd   :  { %1122 = vst [vmem:[%s1505_s3 + $0x10] sm:$0xff] %v943_v45   ;;  %v159_v53 = vmul.f32 %v824_v47, %v1178_v1  ;;  %v832_v55 = vunpack.c.l.bf16 %v1096_v43  ;;  %1123 = vst [vmem:[%s1505_s3 + $0x18] sm:$0xff] %v948_v48   ;;  %v160_v57 = vmul.f32 %v825_v50, %v1178_v1  ;;  %v833_v59 = vunpack.c.h.bf16 %v1096_v43 }
   0xe   :  { %v228_v56 = vadd.f32 %v1192_v7, %v157_v49  ;;  %v161_v58 = vmul.f32 %v828_v51, %v1178_v1  ;;  %v229_v60 = vadd.f32 %v1192_v7, %v158_v52  ;;  %v162_v62 = vmul.f32 %v829_v54, %v1178_v1  ;;  %v1102_v51 = vld [vmem:[%s1502_s0 + $0x68] sm:$0xff]  }
   0xf   :  { %v230_v61 = vadd.f32 %v1192_v7, %v159_v53  ;;  %v163_v63 = vmul.f32 %v832_v55, %v1178_v1  ;;  %v231_v3 = vadd.f32 %v1192_v7, %v160_v57  ;;  %v164_v5 = vmul.f32 %v833_v59, %v1178_v1 }
  0x10   :  { %v292_v2 = vmax.f32 %v228_v56, 0.0  ;;  %v232_v4 = vadd.f32 %v1192_v7, %v161_v58  ;;  %v293_v6 = vmax.f32 %v229_v60, 0.0  ;;  %v233_v9 = vadd.f32 %v1192_v7, %v162_v62  ;;  %v1103_v60 = vld [vmem:[%s1502_s0 + $0x70] sm:$0xff]  }
  0x11   :  { %v294_v8 = vmax.f32 %v230_v61, 0.0  ;;  %v234_v10 = vadd.f32 %v1192_v7, %v163_v63  ;;  %v295_v12 = vmax.f32 %v231_v3, 0.0  ;;  %v235_v14 = vadd.f32 %v1192_v7, %v164_v5 }
  0x12   :  { %v296_v13 = vmax.f32 %v232_v4, 0.0  ;;  %v836_v15 = vunpack.c.l.bf16 %v1097_v0  ;;  %v953_v17 = vpack.c.bf16 %v293_v6, %v292_v2  ;;  %v297_v18 = vmax.f32 %v233_v9, 0.0  ;;  %v1104_v2 = vld [vmem:[%s1502_s0 + $0x78] sm:$0xff]  }
  0x13   :  { %v298_v19 = vmax.f32 %v234_v10, 0.0  ;;  %v837_v20 = vunpack.c.h.bf16 %v1097_v0  ;;  %v958_v21 = vpack.c.bf16 %v295_v12, %v294_v8  ;;  %v299_v22 = vmax.f32 %v235_v14, 0.0  ;;  %v1105_v12 = vld [vmem:[%s1502_s0 + $0x80] sm:$0xff]  }
  0x14   :  { %v165_v23 = vmul.f32 %v836_v15, %v1178_v1  ;;  %v840_v24 = vunpack.c.l.bf16 %v1098_v11  ;;  %1124 = vst [vmem:[%s1505_s3 + $0x20] sm:$0xff] %v953_v17   ;;  %v963_v26 = vpack.c.bf16 %v297_v18, %v296_v13  ;;  %v841_v28 = vunpack.c.h.bf16 %v1098_v11 }
  0x15   :  { %v166_v27 = vmul.f32 %v837_v20, %v1178_v1  ;;  %v844_v29 = vunpack.c.l.bf16 %v1099_v16  ;;  %1125 = vst [vmem:[%s1505_s3 + $0x28] sm:$0xff] %v958_v21   ;;  %v968_v30 = vpack.c.bf16 %v299_v22, %v298_v19  ;;  %v845_v33 = vunpack.c.h.bf16 %v1099_v16 }
  0x16   :  { %v236_v31 = vadd.f32 %v1192_v7, %v165_v23  ;;  %v167_v32 = vmul.f32 %v840_v24, %v1178_v1  ;;  %1126 = vst [vmem:[%s1505_s3 + $0x30] sm:$0xff] %v963_v26   ;;  %v168_v35 = vmul.f32 %v841_v28, %v1178_v1  ;;  %v848_v37 = vunpack.c.l.bf16 %v1100_v25 }
  0x17   :  { %v237_v34 = vadd.f32 %v1192_v7, %v166_v27  ;;  %v169_v36 = vmul.f32 %v844_v29, %v1178_v1  ;;  %1127 = vst [vmem:[%s1505_s3 + $0x38] sm:$0xff] %v968_v30   ;;  %v170_v41 = vmul.f32 %v845_v33, %v1178_v1  ;;  %v849_v42 = vunpack.c.h.bf16 %v1100_v25  ;;  %v1106_v29 = vld [vmem:[%s1502_s0 + $0x88] sm:$0xff]  }
  0x18   :  { %v300_v39 = vmax.f32 %v236_v31, 0.0  ;;  %v238_v40 = vadd.f32 %v1192_v7, %v167_v32  ;;  %v239_v44 = vadd.f32 %v1192_v7, %v168_v35  ;;  %v171_v46 = vmul.f32 %v848_v37, %v1178_v1 }
  0x19   :  { %v301_v43 = vmax.f32 %v237_v34, 0.0  ;;  %v240_v45 = vadd.f32 %v1192_v7, %v169_v36  ;;  %v241_v48 = vadd.f32 %v1192_v7, %v170_v41  ;;  %v172_v49 = vmul.f32 %v849_v42, %v1178_v1  ;;  %v1107_v34 = vld [vmem:[%s1502_s0 + $0x90] sm:$0xff]  }
  0x1a   :  { %v302_v47 = vmax.f32 %v238_v40, 0.0  ;;  %v852_v50 = vunpack.c.l.bf16 %v1101_v38  ;;  %v303_v53 = vmax.f32 %v239_v44, 0.0  ;;  %v242_v55 = vadd.f32 %v1192_v7, %v171_v46 }
  0x1b   :  { %v973_v52 = vpack.c.bf16 %v301_v43, %v300_v39  ;;  %v304_v54 = vmax.f32 %v240_v45, 0.0  ;;  %v305_v56 = vmax.f32 %v241_v48, 0.0  ;;  %v243_v57 = vadd.f32 %v1192_v7, %v172_v49  ;;  %v1108_v43 = vld [vmem:[%s1502_s0 + $0x98] sm:$0xff]  }
  0x1c   :  { %v853_v58 = vunpack.c.h.bf16 %v1101_v38  ;;  %v173_v59 = vmul.f32 %v852_v50, %v1178_v1  ;;  %v978_v61 = vpack.c.bf16 %v303_v53, %v302_v47  ;;  %v306_v62 = vmax.f32 %v242_v55, 0.0 }
  0x1d   :  { %1128 = vst [vmem:[%s1505_s3 + $0x40] sm:$0xff] %v973_v52   ;;  %v856_v63 = vunpack.c.l.bf16 %v1102_v51  ;;  %v857_v0 = vunpack.c.h.bf16 %v1102_v51  ;;  %v983_v3 = vpack.c.bf16 %v305_v56, %v304_v54  ;;  %v307_v4 = vmax.f32 %v243_v57, 0.0  ;;  %v1109_v56 = vld [vmem:[%s1502_s0 + $0xa0] sm:$0xff]  }
  0x1e   :  { %v174_v5 = vmul.f32 %v853_v58, %v1178_v1  ;;  %v244_v6 = vadd.f32 %v1192_v7, %v173_v59  ;;  %1129 = vst [vmem:[%s1505_s3 + $0x48] sm:$0xff] %v978_v61   ;;  %v860_v10 = vunpack.c.l.bf16 %v1103_v60  ;;  %v861_v11 = vunpack.c.h.bf16 %v1103_v60 }
  0x1f   :  { %v175_v8 = vmul.f32 %v856_v63, %v1178_v1  ;;  %v176_v9 = vmul.f32 %v857_v0, %v1178_v1  ;;  %1130 = vst [vmem:[%s1505_s3 + $0x50] sm:$0xff] %v983_v3   ;;  %v988_v13 = vpack.c.bf16 %v307_v4, %v306_v62  ;;  %v864_v16 = vunpack.c.l.bf16 %v1104_v2 }
  0x20   :  { %v245_v14 = vadd.f32 %v1192_v7, %v174_v5  ;;  %v308_v15 = vmax.f32 %v244_v6, 0.0  ;;  %v177_v19 = vmul.f32 %v860_v10, %v1178_v1  ;;  %v178_v20 = vmul.f32 %v861_v11, %v1178_v1 }
  0x21   :  { %v246_v17 = vadd.f32 %v1192_v7, %v175_v8  ;;  %v247_v18 = vadd.f32 %v1192_v7, %v176_v9  ;;  %1131 = vst [vmem:[%s1505_s3 + $0x58] sm:$0xff] %v988_v13   ;;  %v865_v22 = vunpack.c.h.bf16 %v1104_v2  ;;  %v179_v23 = vmul.f32 %v864_v16, %v1178_v1  ;;  %v1110_v2 = vld [vmem:[%s1502_s0 + $0xa8] sm:$0xff]   ;;  %v1111_v16 = vld [vmem:[%s1502_s0 + $0xb0] sm:$0xff]  }
  0x22   :  { %v309_v21 = vmax.f32 %v245_v14, 0.0  ;;  %v868_v24 = vunpack.c.l.bf16 %v1105_v12  ;;  %v248_v27 = vadd.f32 %v1192_v7, %v177_v19  ;;  %v249_v28 = vadd.f32 %v1192_v7, %v178_v20 }
  0x23   :  { %v310_v25 = vmax.f32 %v246_v17, 0.0  ;;  %v311_v26 = vmax.f32 %v247_v18, 0.0  ;;  %v180_v31 = vmul.f32 %v865_v22, %v1178_v1  ;;  %v250_v32 = vadd.f32 %v1192_v7, %v179_v23 }
  0x24   :  { %v993_v30 = vpack.c.bf16 %v309_v21, %v308_v15  ;;  %v869_v33 = vunpack.c.h.bf16 %v1105_v12  ;;  %v312_v36 = vmax.f32 %v248_v27, 0.0  ;;  %v313_v37 = vmax.f32 %v249_v28, 0.0  ;;  %v1112_v21 = vld [vmem:[%s1502_s0 + $0xb8] sm:$0xff]  }
  0x25   :  { %v998_v35 = vpack.c.bf16 %v311_v26, %v310_v25  ;;  %v181_v38 = vmul.f32 %v868_v24, %v1178_v1  ;;  %v251_v39 = vadd.f32 %v1192_v7, %v180_v31  ;;  %v314_v40 = vmax.f32 %v250_v32, 0.0 }
  0x26   :  { %1132 = vst [vmem:[%s1505_s3 + $0x60] sm:$0xff] %v993_v30   ;;  %v182_v41 = vmul.f32 %v869_v33, %v1178_v1  ;;  %v872_v42 = vunpack.c.l.bf16 %v1106_v29  ;;  %v1003_v44 = vpack.c.bf16 %v313_v37, %v312_v36  ;;  %v873_v46 = vunpack.c.h.bf16 %v1106_v29 }
  0x27   :  { %1133 = vst [vmem:[%s1505_s3 + $0x68] sm:$0xff] %v998_v35   ;;  %v252_v45 = vadd.f32 %v1192_v7, %v181_v38  ;;  %v876_v47 = vunpack.c.l.bf16 %v1107_v34  ;;  %v315_v48 = vmax.f32 %v251_v39, 0.0  ;;  %v877_v51 = vunpack.c.h.bf16 %v1107_v34  ;;  %v1113_v34 = vld [vmem:[%s1502_s0 + $0xc0] sm:$0xff]  }
  0x28   :  { %v253_v49 = vadd.f32 %v1192_v7, %v182_v41  ;;  %v183_v50 = vmul.f32 %v872_v42, %v1178_v1  ;;  %1134 = vst [vmem:[%s1505_s3 + $0x70] sm:$0xff] %v1003_v44   ;;  %v184_v53 = vmul.f32 %v873_v46, %v1178_v1  ;;  %v880_v55 = vunpack.c.l.bf16 %v1108_v43 }
  0x29   :  { %v316_v52 = vmax.f32 %v252_v45, 0.0  ;;  %v185_v54 = vmul.f32 %v876_v47, %v1178_v1  ;;  %v1008_v57 = vpack.c.bf16 %v315_v48, %v314_v40  ;;  %v186_v60 = vmul.f32 %v877_v51, %v1178_v1  ;;  %v1114_v47 = vld [vmem:[%s1502_s0 + $0xc8] sm:$0xff]  }
  0x2a   :  { %v317_v58 = vmax.f32 %v253_v49, 0.0  ;;  %v254_v59 = vadd.f32 %v1192_v7, %v183_v50  ;;  %v255_v61 = vadd.f32 %v1192_v7, %v184_v53  ;;  %v881_v63 = vunpack.c.h.bf16 %v1108_v43 }
  0x2b   :  { %v256_v62 = vadd.f32 %v1192_v7, %v185_v54  ;;  %v187_v0 = vmul.f32 %v880_v55, %v1178_v1  ;;  %1135 = vst [vmem:[%s1505_s3 + $0x78] sm:$0xff] %v1008_v57   ;;  %v257_v5 = vadd.f32 %v1192_v7, %v186_v60  ;;  %v884_v6 = vunpack.c.l.bf16 %v1109_v56 }
  0x2c   :  { %v1013_v3 = vpack.c.bf16 %v317_v58, %v316_v52  ;;  %v318_v4 = vmax.f32 %v254_v59, 0.0  ;;  %v319_v8 = vmax.f32 %v255_v61, 0.0  ;;  %v188_v10 = vmul.f32 %v881_v63, %v1178_v1  ;;  %v1115_v52 = vld [vmem:[%s1502_s0 + $0xd0] sm:$0xff]   ;;  %v1116_v61 = vld [vmem:[%s1502_s0 + $0xd8] sm:$0xff]  }
  0x2d   :  { %v320_v9 = vmax.f32 %v256_v62, 0.0  ;;  %v258_v11 = vadd.f32 %v1192_v7, %v187_v0  ;;  %v321_v12 = vmax.f32 %v257_v5, 0.0  ;;  %v885_v13 = vunpack.c.h.bf16 %v1109_v56 }
  0x2e   :  { %1136 = vst [vmem:[%s1505_s3 + $0x80] sm:$0xff] %v1013_v3   ;;  %v189_v14 = vmul.f32 %v884_v6, %v1178_v1  ;;  %v888_v15 = vunpack.c.l.bf16 %v1110_v2  ;;  %v1018_v17 = vpack.c.bf16 %v319_v8, %v318_v4  ;;  %v259_v18 = vadd.f32 %v1192_v7, %v188_v10 }
  0x2f   :  { %v322_v19 = vmax.f32 %v258_v11, 0.0  ;;  %v889_v20 = vunpack.c.h.bf16 %v1110_v2  ;;  %v1023_v22 = vpack.c.bf16 %v321_v12, %v320_v9  ;;  %v190_v23 = vmul.f32 %v885_v13, %v1178_v1  ;;  %v1117_v12 = vld [vmem:[%s1502_s0 + $0xe0] sm:$0xff]  }
  0x30   :  { %v260_v24 = vadd.f32 %v1192_v7, %v189_v14  ;;  %v191_v25 = vmul.f32 %v888_v15, %v1178_v1  ;;  %1137 = vst [vmem:[%s1505_s3 + $0x88] sm:$0xff] %v1018_v17   ;;  %v323_v26 = vmax.f32 %v259_v18, 0.0  ;;  %v892_v28 = vunpack.c.l.bf16 %v1111_v16 }
  0x31   :  { %v192_v27 = vmul.f32 %v889_v20, %v1178_v1  ;;  %v893_v29 = vunpack.c.h.bf16 %v1111_v16  ;;  %1138 = vst [vmem:[%s1505_s3 + $0x90] sm:$0xff] %v1023_v22   ;;  %v261_v30 = vadd.f32 %v1192_v7, %v190_v23  ;;  %v896_v33 = vunpack.c.l.bf16 %v1112_v21 }
  0x32   :  { %v324_v31 = vmax.f32 %v260_v24, 0.0  ;;  %v262_v32 = vadd.f32 %v1192_v7, %v191_v25  ;;  %v1028_v35 = vpack.c.bf16 %v323_v26, %v322_v19  ;;  %v193_v37 = vmul.f32 %v892_v28, %v1178_v1 }
  0x33   :  { %v263_v36 = vadd.f32 %v1192_v7, %v192_v27  ;;  %v194_v38 = vmul.f32 %v893_v29, %v1178_v1  ;;  %v325_v39 = vmax.f32 %v261_v30, 0.0  ;;  %v897_v41 = vunpack.c.h.bf16 %v1112_v21  ;;  %v1118_v21 = vld [vmem:[%s1502_s0 + $0xe8] sm:$0xff]  }
  0x34   :  { %v326_v40 = vmax.f32 %v262_v32, 0.0  ;;  %v195_v42 = vmul.f32 %v896_v33, %v1178_v1  ;;  %1139 = vst [vmem:[%s1505_s3 + $0x98] sm:$0xff] %v1028_v35   ;;  %v264_v44 = vadd.f32 %v1192_v7, %v193_v37  ;;  %v900_v46 = vunpack.c.l.bf16 %v1113_v34 }
  0x35   :  { %v327_v43 = vmax.f32 %v263_v36, 0.0  ;;  %v265_v45 = vadd.f32 %v1192_v7, %v194_v38  ;;  %v1033_v48 = vpack.c.bf16 %v325_v39, %v324_v31  ;;  %v196_v49 = vmul.f32 %v897_v41, %v1178_v1  ;;  %v1120_v39 = vld [vmem:[%s1502_s0 + $0xf8] sm:$0xff]  }
  0x36   :  { %v266_v50 = vadd.f32 %v1192_v7, %v195_v42  ;;  %v901_v51 = vunpack.c.h.bf16 %v1113_v34  ;;  %v328_v54 = vmax.f32 %v264_v44, 0.0  ;;  %v197_v56 = vmul.f32 %v900_v46, %v1178_v1  ;;  %v1119_v34 = vld [vmem:[%s1502_s0 + $0xf0] sm:$0xff]  }
  0x37   :  { %v1038_v53 = vpack.c.bf16 %v327_v43, %v326_v40  ;;  %v329_v55 = vmax.f32 %v265_v45, 0.0  ;;  %1140 = vst [vmem:[%s1505_s3 + $0xa0] sm:$0xff] %v1033_v48   ;;  %v267_v57 = vadd.f32 %v1192_v7, %v196_v49  ;;  %v904_v60 = vunpack.c.l.bf16 %v1114_v47 }
  0x38   :  { %v330_v58 = vmax.f32 %v266_v50, 0.0  ;;  %v198_v59 = vmul.f32 %v901_v51, %v1178_v1  ;;  %v268_v63 = vadd.f32 %v1192_v7, %v197_v56  ;;  %v905_v0 = vunpack.c.h.bf16 %v1114_v47 }
  0x39   :  { %1141 = vst [vmem:[%s1505_s3 + $0xa8] sm:$0xff] %v1038_v53   ;;  %v1043_v62 = vpack.c.bf16 %v329_v55, %v328_v54  ;;  %v908_v2 = vunpack.c.l.bf16 %v1115_v52  ;;  %v331_v3 = vmax.f32 %v267_v57, 0.0  ;;  %v199_v5 = vmul.f32 %v904_v60, %v1178_v1 }
  0x3a   :  { %v269_v4 = vadd.f32 %v1192_v7, %v198_v59  ;;  %v909_v6 = vunpack.c.h.bf16 %v1115_v52  ;;  %v332_v8 = vmax.f32 %v268_v63, 0.0  ;;  %v200_v9 = vmul.f32 %v905_v0, %v1178_v1 }
  0x3b   :  { %1142 = vst [vmem:[%s1505_s3 + $0xb0] sm:$0xff] %v1043_v62   ;;  %v201_v10 = vmul.f32 %v908_v2, %v1178_v1  ;;  %v912_v11 = vunpack.c.l.bf16 %v1116_v61  ;;  %v1048_v13 = vpack.c.bf16 %v331_v3, %v330_v58  ;;  %v270_v15 = vadd.f32 %v1192_v7, %v199_v5 }
  0x3c   :  { %v333_v14 = vmax.f32 %v269_v4, 0.0  ;;  %v202_v16 = vmul.f32 %v909_v6, %v1178_v1  ;;  %v271_v17 = vadd.f32 %v1192_v7, %v200_v9  ;;  %v913_v19 = vunpack.c.h.bf16 %v1116_v61 }
  0x3d   :  { %v272_v18 = vadd.f32 %v1192_v7, %v201_v10  ;;  %v203_v20 = vmul.f32 %v912_v11, %v1178_v1  ;;  %1143 = vst [vmem:[%s1505_s3 + $0xb8] sm:$0xff] %v1048_v13   ;;  %v334_v23 = vmax.f32 %v270_v15, 0.0  ;;  %v916_v25 = vunpack.c.l.bf16 %v1117_v12 }
  0x3e   :  { %v1053_v22 = vpack.c.bf16 %v333_v14, %v332_v8  ;;  %v273_v24 = vadd.f32 %v1192_v7, %v202_v16  ;;  %v335_v26 = vmax.f32 %v271_v17, 0.0  ;;  %v204_v28 = vmul.f32 %v913_v19, %v1178_v1 }
  0x3f   :  { %v336_v27 = vmax.f32 %v272_v18, 0.0  ;;  %v274_v29 = vadd.f32 %v1192_v7, %v203_v20  ;;  %v917_v31 = vunpack.c.h.bf16 %v1117_v12  ;;  %v205_v32 = vmul.f32 %v916_v25, %v1178_v1 }
  0x40   :  { %1144 = vst [vmem:[%s1505_s3 + $0xc0] sm:$0xff] %v1053_v22   ;;  %v337_v30 = vmax.f32 %v273_v24, 0.0  ;;  %v920_v33 = vunpack.c.l.bf16 %v1118_v21  ;;  %v1058_v35 = vpack.c.bf16 %v335_v26, %v334_v23  ;;  %v275_v36 = vadd.f32 %v1192_v7, %v204_v28 }
  0x41   :  { %v338_v37 = vmax.f32 %v274_v29, 0.0  ;;  %v921_v38 = vunpack.c.h.bf16 %v1118_v21  ;;  %v206_v41 = vmul.f32 %v917_v31, %v1178_v1  ;;  %v276_v42 = vadd.f32 %v1192_v7, %v205_v32 }
  0x42   :  { %v1063_v40 = vpack.c.bf16 %v337_v30, %v336_v27  ;;  %v207_v43 = vmul.f32 %v920_v33, %v1178_v1  ;;  %1145 = vst [vmem:[%s1505_s3 + $0xc8] sm:$0xff] %v1058_v35   ;;  %v339_v44 = vmax.f32 %v275_v36, 0.0  ;;  %v924_v46 = vunpack.c.l.bf16 %v1119_v34 }
  0x43   :  { %v208_v45 = vmul.f32 %v921_v38, %v1178_v1  ;;  %v925_v47 = vunpack.c.h.bf16 %v1119_v34  ;;  %v277_v48 = vadd.f32 %v1192_v7, %v206_v41  ;;  %v340_v49 = vmax.f32 %v276_v42, 0.0 }
  0x44   :  { %1146 = vst [vmem:[%s1505_s3 + $0xd0] sm:$0xff] %v1063_v40   ;;  %v278_v50 = vadd.f32 %v1192_v7, %v207_v43  ;;  %v928_v51 = vunpack.c.l.bf16 %v1120_v39  ;;  %v1068_v52 = vpack.c.bf16 %v339_v44, %v338_v37  ;;  %v209_v54 = vmul.f32 %v924_v46, %v1178_v1 }
  0x45   :  { %v279_v53 = vadd.f32 %v1192_v7, %v208_v45  ;;  %v210_v55 = vmul.f32 %v925_v47, %v1178_v1  ;;  %v341_v56 = vmax.f32 %v277_v48, 0.0  ;;  %v929_v58 = vunpack.c.h.bf16 %v1120_v39 }
  0x46   :  { %v342_v57 = vmax.f32 %v278_v50, 0.0  ;;  %v211_v59 = vmul.f32 %v928_v51, %v1178_v1  ;;  %1147 = vst [vmem:[%s1505_s3 + $0xd8] sm:$0xff] %v1068_v52   ;;  %v280_v61 = vadd.f32 %v1192_v7, %v209_v54 }
  0x47   :  { %v343_v60 = vmax.f32 %v279_v53, 0.0  ;;  %v281_v62 = vadd.f32 %v1192_v7, %v210_v55  ;;  %v1073_v63 = vpack.c.bf16 %v341_v56, %v340_v49  ;;  %v212_v0 = vmul.f32 %v929_v58, %v1178_v1 }
  0x48   :  { %v282_v2 = vadd.f32 %v1192_v7, %v211_v59  ;;  %v344_v4 = vmax.f32 %v280_v61, 0.0 }
  0x49   :  { %v1078_v3 = vpack.c.bf16 %v343_v60, %v342_v57  ;;  %v345_v5 = vmax.f32 %v281_v62, 0.0  ;;  %1148 = vst [vmem:[%s1505_s3 + $0xe0] sm:$0xff] %v1073_v63   ;;  %v283_v6 = vadd.f32 %v1192_v7, %v212_v0 }
  0x4a   :  { %v346_v8 = vmax.f32 %v282_v2, 0.0 }
  0x4b   :  { %1149 = vst [vmem:[%s1505_s3 + $0xe8] sm:$0xff] %v1078_v3   ;;  %v1083_v9 = vpack.c.bf16 %v345_v5, %v344_v4  ;;  %v347_v10 = vmax.f32 %v283_v6, 0.0 }
  0x4d   :  { %1150 = vst [vmem:[%s1505_s3 + $0xf0] sm:$0xff] %v1083_v9   ;;  %v1088_v1 = vpack.c.bf16 %v347_v10, %v346_v8 }
  0x4f   :  { %1151 = vst [vmem:[%s1505_s3 + $0xf8] sm:$0xff] %v1088_v1  }

// kernel: wgan_generator_forward.17
= control target key start
LH: loop header
LB: loop body
LE: loop exit
PB: predicated region body
PF: predicated region fallthrough
CT: control target
= control target key end

     0   :  { %vm1460_vm0 = vcmask 588800   ;;  %vm1845_vm1 = vcmask 1043456   ;;  %s6820_s1 = inlined_call_operand.vmem [shape: bf16[72,128], index: 1, kind: input, shape index: {}]   ;;  %s6821_s0 = inlined_call_operand.vmem [shape: bf16[2048,72], index: 0, kind: input, shape index: {}]   ;;  %s6822_s2 = inlined_call_operand.vmem [shape: f32[2048,128], index: 2, kind: output, shape index: {}]  }
   0x1   :  { %v4865_v0 = vld [vmem:[%s6820_s1] sm:$0xff]   ;;  %v4866_v1 = vld [vmem:[%s6820_s1 + $0x8] sm:$0xff]   ;;  %v4867_v2 = vld [vmem:[%s6820_s1 + $0x10] sm:$0xff]  }
   0x2   :  { %4587 = vmatprep.subr.bf16.mxu0 %v4865_v0  ;;  %4853 = vmatprep.subr.bf16.mxu1 %v4865_v0  ;;  %v4870_v3 = vld [vmem:[%s6821_s0] sm:$0xff]   ;;  %v4868_v5 = vld [vmem:[%s6820_s1 + $0x18] sm:$0xff]   ;;  %v4872_v8 = vld [vmem:[%s6821_s0 + $0x8] sm:$0xff]  }
   0x3   :  { %4588 = vmatpush3.bf16.msra.mxu0 %v4865_v0  ;;  %4858 = vmatpush3.bf16.msra.mxu1 %v4865_v0  ;;  %v4871_v4 = vld [vmem:[%s6821_s0 + $0x200] sm:$0xff]   ;;  %v4873_v9 = vld [vmem:[%s6821_s0 + $0x208] sm:$0xff]   ;;  %v4874_v10 = vld [vmem:[%s6821_s0 + $0x10] sm:$0xff]  }
   0x4   :  { %4589 = vmatprep.subr.bf16.mxu0 %v4866_v1  ;;  %4854 = vmatprep.subr.bf16.mxu1 %v4866_v1  ;;  %v4869_v6 = vld [vmem:[%s6820_s1 + $0x20] ss:$0 sps:$4 sm:$0xff]   ;;  %v4875_v11 = vld [vmem:[%s6821_s0 + $0x210] sm:$0xff]   ;;  %v4876_v12 = vld [vmem:[%s6821_s0 + $0x18] sm:$0xff]  }
   0x5   :  { %4597 = vmatprep.mubr.msk.bf16.mxu0 %vm1460_vm0, %v4870_v3  ;;  %4725 = vmatprep.mubr.msk.bf16.mxu1 %vm1460_vm0, %v4871_v4  ;;  %v1847_v7 = vsel %vm1845_vm1, %v4869_v6, 0  ;;  %v4877_v13 = vld [vmem:[%s6821_s0 + $0x218] sm:$0xff]   ;;  %v4878_v14 = vld [vmem:[%s6821_s0 + $0x20] sm:$0xff]   ;;  %v4880_v16 = vld [vmem:[%s6821_s0 + $0x28] sm:$0xff]  }
   0x6   :  { %v4879_v15 = vld [vmem:[%s6821_s0 + $0x220] sm:$0xff]   ;;  %v4881_v17 = vld [vmem:[%s6821_s0 + $0x228] sm:$0xff]   ;;  %v4882_v18 = vld [vmem:[%s6821_s0 + $0x30] sm:$0xff]  }
   0x7   :  { %4590 = vmatpush3.bf16.msra.mxu0 %v4866_v1  ;;  %4859 = vmatpush3.bf16.msra.mxu1 %v4866_v1  ;;  %v4883_v19 = vld [vmem:[%s6821_s0 + $0x230] sm:$0xff]   ;;  %v4884_v20 = vld [vmem:[%s6821_s0 + $0x38] sm:$0xff]   ;;  %v4886_v22 = vld [vmem:[%s6821_s0 + $0x40] sm:$0xff]  }
   0x8   :  { %4591 = vmatprep.subr.bf16.mxu0 %v4867_v2  ;;  %4855 = vmatprep.subr.bf16.mxu1 %v4867_v2  ;;  %v4885_v21 = vld [vmem:[%s6821_s0 + $0x238] sm:$0xff]   ;;  %v4887_v23 = vld [vmem:[%s6821_s0 + $0x240] sm:$0xff]   ;;  %v4888_v24 = vld [vmem:[%s6821_s0 + $0x48] sm:$0xff]  }
   0x9   :  { %v4889_v25 = vld [vmem:[%s6821_s0 + $0x248] sm:$0xff]   ;;  %v4890_v26 = vld [vmem:[%s6821_s0 + $0x50] sm:$0xff]   ;;  %v4892_v28 = vld [vmem:[%s6821_s0 + $0x58] sm:$0xff]  }
   0xa   :  { %v4891_v27 = vld [vmem:[%s6821_s0 + $0x250] sm:$0xff]   ;;  %v4893_v29 = vld [vmem:[%s6821_s0 + $0x258] sm:$0xff]   ;;  %v4894_v30 = vld [vmem:[%s6821_s0 + $0x60] sm:$0xff]  }
   0xb   :  { %4592 = vmatpush3.bf16.msra.mxu0 %v4867_v2  ;;  %4860 = vmatpush3.bf16.msra.mxu1 %v4867_v2  ;;  %v4895_v31 = vld [vmem:[%s6821_s0 + $0x260] sm:$0xff]   ;;  %v4896_v32 = vld [vmem:[%s6821_s0 + $0x68] sm:$0xff]   ;;  %v4898_v34 = vld [vmem:[%s6821_s0 + $0x70] sm:$0xff]  }
   0xc   :  { %4593 = vmatprep.subr.bf16.mxu0 %v4868_v5  ;;  %4856 = vmatprep.subr.bf16.mxu1 %v4868_v5  ;;  %v4897_v33 = vld [vmem:[%s6821_s0 + $0x268] sm:$0xff]   ;;  %v4899_v35 = vld [vmem:[%s6821_s0 + $0x270] sm:$0xff]   ;;  %v4900_v36 = vld [vmem:[%s6821_s0 + $0x78] sm:$0xff]  }
   0xd   :  { %v4901_v37 = vld [vmem:[%s6821_s0 + $0x278] sm:$0xff]   ;;  %v4902_v38 = vld [vmem:[%s6821_s0 + $0x80] sm:$0xff]   ;;  %v4904_v40 = vld [vmem:[%s6821_s0 + $0x88] sm:$0xff]  }
   0xe   :  { %v4903_v39 = vld [vmem:[%s6821_s0 + $0x280] sm:$0xff]   ;;  %v4905_v41 = vld [vmem:[%s6821_s0 + $0x288] sm:$0xff]   ;;  %v4906_v42 = vld [vmem:[%s6821_s0 + $0x90] sm:$0xff]  }
   0xf   :  { %4594 = vmatpush3.bf16.msra.mxu0 %v4868_v5  ;;  %4861 = vmatpush3.bf16.msra.mxu1 %v4868_v5  ;;  %v4907_v43 = vld [vmem:[%s6821_s0 + $0x290] sm:$0xff]   ;;  %v4908_v44 = vld [vmem:[%s6821_s0 + $0x98] sm:$0xff]   ;;  %v4910_v46 = vld [vmem:[%s6821_s0 + $0xa0] sm:$0xff]  }
  0x10   :  { %4863 = vmatprep.subr.msk.bf16.mxu0 %vm1845_vm1, %v4869_v6  ;;  %4864 = vmatprep.subr.msk.bf16.mxu1 %vm1845_vm1, %v4869_v6  ;;  %v4909_v45 = vld [vmem:[%s6821_s0 + $0x298] sm:$0xff]   ;;  %v4911_v47 = vld [vmem:[%s6821_s0 + $0x2a0] sm:$0xff]   ;;  %v4912_v48 = vld [vmem:[%s6821_s0 + $0xa8] sm:$0xff]  }
  0x11   :  { %v4913_v49 = vld [vmem:[%s6821_s0 + $0x2a8] sm:$0xff]   ;;  %v4914_v50 = vld [vmem:[%s6821_s0 + $0xb0] sm:$0xff]   ;;  %v4916_v52 = vld [vmem:[%s6821_s0 + $0xb8] sm:$0xff]  }
  0x12   :  { %v4915_v51 = vld [vmem:[%s6821_s0 + $0x2b0] sm:$0xff]   ;;  %v4917_v53 = vld [vmem:[%s6821_s0 + $0x2b8] sm:$0xff]   ;;  %v4918_v54 = vld [vmem:[%s6821_s0 + $0xc0] sm:$0xff]  }
  0x13   :  { %4596 = vmatpush3.bf16.msra.mxu0 %v1847_v7  ;;  %4862 = vmatpush3.bf16.msra.mxu1 %v1847_v7  ;;  %v4919_v55 = vld [vmem:[%s6821_s0 + $0x2c0] sm:$0xff]   ;;  %v4920_v56 = vld [vmem:[%s6821_s0 + $0xc8] sm:$0xff]   ;;  %v4922_v58 = vld [vmem:[%s6821_s0 + $0xd0] sm:$0xff]  }
  0x14   :  { %v4921_v57 = vld [vmem:[%s6821_s0 + $0x2c8] sm:$0xff]   ;;  %v4923_v59 = vld [vmem:[%s6821_s0 + $0x2d0] sm:$0xff]   ;;  %v4924_v60 = vld [vmem:[%s6821_s0 + $0xd8] sm:$0xff]  }
  0x15   :  { %v4925_v61 = vld [vmem:[%s6821_s0 + $0x2d8] sm:$0xff]   ;;  %v4926_v62 = vld [vmem:[%s6821_s0 + $0xe0] sm:$0xff]   ;;  %v4928_v0 = vld [vmem:[%s6821_s0 + $0xe8] sm:$0xff]  }
  0x16   :  { %4598 = vmatmul.mubr.msk.bf16.vlgmr.msra.gmra.mrb[0].mxu0 %vm1460_vm0, %v4872_v8  ;;  %4726 = vmatmul.mubr.msk.bf16.vlgmr.msra.gmra.mrb[0].mxu1 %vm1460_vm0, %v4873_v9  ;;  %v4927_v63 = vld [vmem:[%s6821_s0 + $0x2e0] sm:$0xff]   ;;  %v4929_v1 = vld [vmem:[%s6821_s0 + $0x2e8] sm:$0xff]   ;;  %v4930_v2 = vld [vmem:[%s6821_s0 + $0xf0] sm:$0xff]  }
  0x17   :  { %4601 = vmatprep.mubr.msk.bf16.mxu0 %vm1460_vm0, %v4874_v10  ;;  %4729 = vmatprep.mubr.msk.bf16.mxu1 %vm1460_vm0, %v4875_v11  ;;  %v4931_v3 = vld [vmem:[%s6821_s0 + $0x2f0] sm:$0xff]   ;;  %v4932_v4 = vld [vmem:[%s6821_s0 + $0xf8] sm:$0xff]   ;;  %v4934_v6 = vld [vmem:[%s6821_s0 + $0x100] sm:$0xff]  }
  0x18   :  { %v4933_v5 = vld [vmem:[%s6821_s0 + $0x2f8] sm:$0xff]   ;;  %v4935_v7 = vld [vmem:[%s6821_s0 + $0x300] sm:$0xff]   ;;  %v4936_v8 = vld [vmem:[%s6821_s0 + $0x108] sm:$0xff]  }
  0x19   :  { %v4937_v9 = vld [vmem:[%s6821_s0 + $0x308] sm:$0xff]   ;;  %v4938_v10 = vld [vmem:[%s6821_s0 + $0x110] sm:$0xff]  }
  0x1a   :  { %v4939_v11 = vld [vmem:[%s6821_s0 + $0x310] sm:$0xff]  }
  0x1e   :  { %4602 = vmatmul.mubr.msk.bf16.gmra.mrb[4].mxu0 %vm1460_vm0, %v4876_v12  ;;  %4730 = vmatmul.mubr.msk.bf16.gmra.mrb[4].mxu1 %vm1460_vm0, %v4877_v13  ;;  %v4940_v12 = vld [vmem:[%s6821_s0 + $0x118] sm:$0xff]  }
  0x1f   :  { %4605 = vmatprep.mubr.msk.bf16.mxu0 %vm1460_vm0, %v4878_v14  ;;  %4733 = vmatprep.mubr.msk.bf16.mxu1 %vm1460_vm0, %v4879_v15  ;;  %v4941_v13 = vld [vmem:[%s6821_s0 + $0x318] sm:$0xff]   ;;  %v4942_v14 = vld [vmem:[%s6821_s0 + $0x120] sm:$0xff]  }
  0x20   :  { %v4943_v15 = vld [vmem:[%s6821_s0 + $0x320] sm:$0xff]  }
  0x26   :  { %4606 = vmatmul.mubr.msk.bf16.gmra.mrb[8].mxu0 %vm1460_vm0, %v4880_v16  ;;  %4734 = vmatmul.mubr.msk.bf16.gmra.mrb[8].mxu1 %vm1460_vm0, %v4881_v17  ;;  %v4944_v16 = vld [vmem:[%s6821_s0 + $0x128] sm:$0xff]  }
  0x27   :  { %4609 = vmatprep.mubr.msk.bf16.mxu0 %vm1460_vm0, %v4882_v18  ;;  %4737 = vmatprep.mubr.msk.bf16.mxu1 %vm1460_vm0, %v4883_v19  ;;  %v4945_v17 = vld [vmem:[%s6821_s0 + $0x328] sm:$0xff]   ;;  %v4946_v18 = vld [vmem:[%s6821_s0 + $0x130] sm:$0xff]  }
  0x28   :  { %v4947_v19 = vld [vmem:[%s6821_s0 + $0x330] sm:$0xff]  }
  0x2e   :  { %4610 = vmatmul.mubr.msk.bf16.gmra.mrb[12].mxu0 %vm1460_vm0, %v4884_v20  ;;  %4738 = vmatmul.mubr.msk.bf16.gmra.mrb[12].mxu1 %vm1460_vm0, %v4885_v21  ;;  %v4948_v20 = vld [vmem:[%s6821_s0 + $0x138] sm:$0xff]  }
  0x2f   :  { %4613 = vmatprep.mubr.msk.bf16.mxu0 %vm1460_vm0, %v4886_v22  ;;  %4741 = vmatprep.mubr.msk.bf16.mxu1 %vm1460_vm0, %v4887_v23  ;;  %v4949_v21 = vld [vmem:[%s6821_s0 + $0x338] sm:$0xff]   ;;  %v4950_v22 = vld [vmem:[%s6821_s0 + $0x140] sm:$0xff]  }
  0x30   :  { %v4951_v23 = vld [vmem:[%s6821_s0 + $0x340] sm:$0xff]  }
  0x36   :  { %4614 = vmatmul.mubr.msk.bf16.gmra.mrb[16].mxu0 %vm1460_vm0, %v4888_v24  ;;  %4742 = vmatmul.mubr.msk.bf16.gmra.mrb[16].mxu1 %vm1460_vm0, %v4889_v25  ;;  %v4952_v24 = vld [vmem:[%s6821_s0 + $0x148] sm:$0xff]  }
  0x37   :  { %4617 = vmatprep.mubr.msk.bf16.mxu0 %vm1460_vm0, %v4890_v26  ;;  %4745 = vmatprep.mubr.msk.bf16.mxu1 %vm1460_vm0, %v4891_v27  ;;  %v4953_v25 = vld [vmem:[%s6821_s0 + $0x348] sm:$0xff]   ;;  %v4954_v26 = vld [vmem:[%s6821_s0 + $0x150] sm:$0xff]  }
  0x38   :  { %v4955_v27 = vld [vmem:[%s6821_s0 + $0x350] sm:$0xff]  }
  0x3e   :  { %4618 = vmatmul.mubr.msk.bf16.gmra.mrb[20].mxu0 %vm1460_vm0, %v4892_v28  ;;  %4746 = vmatmul.mubr.msk.bf16.gmra.mrb[20].mxu1 %vm1460_vm0, %v4893_v29  ;;  %v4956_v28 = vld [vmem:[%s6821_s0 + $0x158] sm:$0xff]  }
  0x3f   :  { %4621 = vmatprep.mubr.msk.bf16.mxu0 %vm1460_vm0, %v4894_v30  ;;  %4749 = vmatprep.mubr.msk.bf16.mxu1 %vm1460_vm0, %v4895_v31  ;;  %v4957_v29 = vld [vmem:[%s6821_s0 + $0x358] sm:$0xff]   ;;  %v4958_v30 = vld [vmem:[%s6821_s0 + $0x160] sm:$0xff]  }
  0x40   :  { %v4959_v31 = vld [vmem:[%s6821_s0 + $0x360] sm:$0xff]  }
  0x46   :  { %4622 = vmatmul.mubr.msk.bf16.gmra.mrb[24].mxu0 %vm1460_vm0, %v4896_v32  ;;  %4750 = vmatmul.mubr.msk.bf16.gmra.mrb[24].mxu1 %vm1460_vm0, %v4897_v33  ;;  %v4960_v32 = vld [vmem:[%s6821_s0 + $0x168] sm:$0xff]  }
  0x47   :  { %4625 = vmatprep.mubr.msk.bf16.mxu0 %vm1460_vm0, %v4898_v34  ;;  %4753 = vmatprep.mubr.msk.bf16.mxu1 %vm1460_vm0, %v4899_v35  ;;  %v4961_v33 = vld [vmem:[%s6821_s0 + $0x368] sm:$0xff]   ;;  %v4962_v34 = vld [vmem:[%s6821_s0 + $0x170] sm:$0xff]  }
  0x48   :  { %v4963_v35 = vld [vmem:[%s6821_s0 + $0x370] sm:$0xff]  }
  0x4e   :  { %4626 = vmatmul.mubr.msk.bf16.gmra.mrb[28].mxu0 %vm1460_vm0, %v4900_v36  ;;  %4754 = vmatmul.mubr.msk.bf16.gmra.mrb[28].mxu1 %vm1460_vm0, %v4901_v37  ;;  %v4964_v36 = vld [vmem:[%s6821_s0 + $0x178] sm:$0xff]  }
  0x4f   :  { %4629 = vmatprep.mubr.msk.bf16.mxu0 %vm1460_vm0, %v4902_v38  ;;  %4757 = vmatprep.mubr.msk.bf16.mxu1 %vm1460_vm0, %v4903_v39  ;;  %v4965_v37 = vld [vmem:[%s6821_s0 + $0x378] sm:$0xff]   ;;  %v4966_v38 = vld [vmem:[%s6821_s0 + $0x180] sm:$0xff]  }
  0x50   :  { %v4967_v39 = vld [vmem:[%s6821_s0 + $0x380] sm:$0xff]  }
  0x56   :  { %4630 = vmatmul.mubr.msk.bf16.gmra.mrb[32].mxu0 %vm1460_vm0, %v4904_v40  ;;  %4758 = vmatmul.mubr.msk.bf16.gmra.mrb[32].mxu1 %vm1460_vm0, %v4905_v41  ;;  %v4968_v40 = vld [vmem:[%s6821_s0 + $0x188] sm:$0xff]  }
  0x57   :  { %4633 = vmatprep.mubr.msk.bf16.mxu0 %vm1460_vm0, %v4906_v42  ;;  %4761 = vmatprep.mubr.msk.bf16.mxu1 %vm1460_vm0, %v4907_v43  ;;  %v4969_v41 = vld [vmem:[%s6821_s0 + $0x388] sm:$0xff]   ;;  %v4970_v42 = vld [vmem:[%s6821_s0 + $0x190] sm:$0xff]  }
  0x58   :  { %v4971_v43 = vld [vmem:[%s6821_s0 + $0x390] sm:$0xff]  }
  0x5e   :  { %4634 = vmatmul.mubr.msk.bf16.gmra.mrb[36].mxu0 %vm1460_vm0, %v4908_v44  ;;  %4762 = vmatmul.mubr.msk.bf16.gmra.mrb[36].mxu1 %vm1460_vm0, %v4909_v45  ;;  %v4972_v44 = vld [vmem:[%s6821_s0 + $0x198] sm:$0xff]  }
  0x5f   :  { %4637 = vmatprep.mubr.msk.bf16.mxu0 %vm1460_vm0, %v4910_v46  ;;  %4765 = vmatprep.mubr.msk.bf16.mxu1 %vm1460_vm0, %v4911_v47  ;;  %v4973_v45 = vld [vmem:[%s6821_s0 + $0x398] sm:$0xff]   ;;  %v4974_v46 = vld [vmem:[%s6821_s0 + $0x1a0] sm:$0xff]  }
  0x60   :  { %v4975_v47 = vld [vmem:[%s6821_s0 + $0x3a0] sm:$0xff]  }
  0x66   :  { %4638 = vmatmul.mubr.msk.bf16.gmra.mrb[40].mxu0 %vm1460_vm0, %v4912_v48  ;;  %4766 = vmatmul.mubr.msk.bf16.gmra.mrb[40].mxu1 %vm1460_vm0, %v4913_v49  ;;  %v4976_v48 = vld [vmem:[%s6821_s0 + $0x1a8] sm:$0xff]  }
  0x67   :  { %4641 = vmatprep.mubr.msk.bf16.mxu0 %vm1460_vm0, %v4914_v50  ;;  %4769 = vmatprep.mubr.msk.bf16.mxu1 %vm1460_vm0, %v4915_v51  ;;  %v4977_v49 = vld [vmem:[%s6821_s0 + $0x3a8] sm:$0xff]   ;;  %v4978_v50 = vld [vmem:[%s6821_s0 + $0x1b0] sm:$0xff]  }
  0x68   :  { %v4979_v51 = vld [vmem:[%s6821_s0 + $0x3b0] sm:$0xff]  }
  0x6e   :  { %4642 = vmatmul.mubr.msk.bf16.gmra.mrb[44].mxu0 %vm1460_vm0, %v4916_v52  ;;  %4770 = vmatmul.mubr.msk.bf16.gmra.mrb[44].mxu1 %vm1460_vm0, %v4917_v53 }
  0x6f   :  { %4645 = vmatprep.mubr.msk.bf16.mxu0 %vm1460_vm0, %v4918_v54  ;;  %4773 = vmatprep.mubr.msk.bf16.mxu1 %vm1460_vm0, %v4919_v55 }
  0x76   :  { %4646 = vmatmul.mubr.msk.bf16.gmra.mrb[48].mxu0 %vm1460_vm0, %v4920_v56  ;;  %4774 = vmatmul.mubr.msk.bf16.gmra.mrb[48].mxu1 %vm1460_vm0, %v4921_v57  ;;  %v4980_v56 = vld [vmem:[%s6821_s0 + $0x1b8] sm:$0xff]  }
  0x77   :  { %4649 = vmatprep.mubr.msk.bf16.mxu0 %vm1460_vm0, %v4922_v58  ;;  %4777 = vmatprep.mubr.msk.bf16.mxu1 %vm1460_vm0, %v4923_v59  ;;  %v4981_v57 = vld [vmem:[%s6821_s0 + $0x3b8] sm:$0xff]  }
  0x7e   :  { %4650 = vmatmul.mubr.msk.bf16.gmra.mrb[52].mxu0 %vm1460_vm0, %v4924_v60  ;;  %4778 = vmatmul.mubr.msk.bf16.gmra.mrb[52].mxu1 %vm1460_vm0, %v4925_v61  ;;  %v4982_v60 = vld [vmem:[%s6821_s0 + $0x1c0] sm:$0xff]  }
  0x7f   :  { %4653 = vmatprep.mubr.msk.bf16.mxu0 %vm1460_vm0, %v4926_v62  ;;  %4781 = vmatprep.mubr.msk.bf16.mxu1 %vm1460_vm0, %v4927_v63  ;;  %v4983_v61 = vld [vmem:[%s6821_s0 + $0x3c0] sm:$0xff]  }
  0x86   :  { %4654 = vmatmul.mubr.msk.bf16.gmra.mrb[56].mxu0 %vm1460_vm0, %v4928_v0  ;;  %4782 = vmatmul.mubr.msk.bf16.gmra.mrb[56].mxu1 %vm1460_vm0, %v4929_v1 }
  0x87   :  { %4657 = vmatprep.mubr.msk.bf16.mxu0 %vm1460_vm0, %v4930_v2  ;;  %4785 = vmatprep.mubr.msk.bf16.mxu1 %vm1460_vm0, %v4931_v3 }
  0x8e   :  { %4658 = vmatmul.mubr.msk.bf16.gmra.mrb[60].mxu0 %vm1460_vm0, %v4932_v4  ;;  %4786 = vmatmul.mubr.msk.bf16.gmra.mrb[60].mxu1 %vm1460_vm0, %v4933_v5  ;;  %v4984_v4 = vld [vmem:[%s6821_s0 + $0x1c8] sm:$0xff]  }
  0x8f   :  { %4661 = vmatprep.mubr.msk.bf16.mxu0 %vm1460_vm0, %v4934_v6  ;;  %4789 = vmatprep.mubr.msk.bf16.mxu1 %vm1460_vm0, %v4935_v7  ;;  %v4985_v5 = vld [vmem:[%s6821_s0 + $0x3c8] sm:$0xff]  }
  0x96   :  { %4662 = vmatmul.mubr.msk.bf16.gmra.mrb[64].mxu0 %vm1460_vm0, %v4936_v8  ;;  %4790 = vmatmul.mubr.msk.bf16.gmra.mrb[64].mxu1 %vm1460_vm0, %v4937_v9  ;;  %v4986_v8 = vld [vmem:[%s6821_s0 + $0x1d0] sm:$0xff]  }
  0x97   :  { %4665 = vmatprep.mubr.msk.bf16.mxu0 %vm1460_vm0, %v4938_v10  ;;  %4793 = vmatprep.mubr.msk.bf16.mxu1 %vm1460_vm0, %v4939_v11  ;;  %v4987_v9 = vld [vmem:[%s6821_s0 + $0x3d0] sm:$0xff]  }
  0x9e   :  { %4666 = vmatmul.mubr.msk.bf16.gmra.mrb[68].mxu0 %vm1460_vm0, %v4940_v12  ;;  %4794 = vmatmul.mubr.msk.bf16.gmra.mrb[68].mxu1 %vm1460_vm0, %v4941_v13 }
  0x9f   :  { %4669 = vmatprep.mubr.msk.bf16.mxu0 %vm1460_vm0, %v4942_v14  ;;  %4797 = vmatprep.mubr.msk.bf16.mxu1 %vm1460_vm0, %v4943_v15 }
  0xa6   :  { %4670 = vmatmul.mubr.msk.bf16.gmra.mrb[72].mxu0 %vm1460_vm0, %v4944_v16  ;;  %4798 = vmatmul.mubr.msk.bf16.gmra.mrb[72].mxu1 %vm1460_vm0, %v4945_v17 }
  0xa7   :  { %4673 = vmatprep.mubr.msk.bf16.mxu0 %vm1460_vm0, %v4946_v18  ;;  %4801 = vmatprep.mubr.msk.bf16.mxu1 %vm1460_vm0, %v4947_v19 }
  0xae   :  { %4674 = vmatmul.mubr.msk.bf16.gmra.mrb[76].mxu0 %vm1460_vm0, %v4948_v20  ;;  %4802 = vmatmul.mubr.msk.bf16.gmra.mrb[76].mxu1 %vm1460_vm0, %v4949_v21 }
  0xaf   :  { %4677 = vmatprep.mubr.msk.bf16.mxu0 %vm1460_vm0, %v4950_v22  ;;  %4805 = vmatprep.mubr.msk.bf16.mxu1 %vm1460_vm0, %v4951_v23  ;;  %v4988_v23 = vld [vmem:[%s6821_s0 + $0x1d8] sm:$0xff]  }
  0xb6   :  { %4678 = vmatmul.mubr.msk.bf16.gmra.mrb[80].mxu0 %vm1460_vm0, %v4952_v24  ;;  %4806 = vmatmul.mubr.msk.bf16.gmra.mrb[80].mxu1 %vm1460_vm0, %v4953_v25  ;;  %v4989_v24 = vld [vmem:[%s6821_s0 + $0x3d8] sm:$0xff]  }
  0xb7   :  { %4681 = vmatprep.mubr.msk.bf16.mxu0 %vm1460_vm0, %v4954_v26  ;;  %4809 = vmatprep.mubr.msk.bf16.mxu1 %vm1460_vm0, %v4955_v27 }
  0xbe   :  { %4682 = vmatmul.mubr.msk.bf16.gmra.mrb[84].mxu0 %vm1460_vm0, %v4956_v28  ;;  %4810 = vmatmul.mubr.msk.bf16.gmra.mrb[84].mxu1 %vm1460_vm0, %v4957_v29  ;;  %v4990_v28 = vld [vmem:[%s6821_s0 + $0x1e0] sm:$0xff]  }
  0xbf   :  { %4685 = vmatprep.mubr.msk.bf16.mxu0 %vm1460_vm0, %v4958_v30  ;;  %4813 = vmatprep.mubr.msk.bf16.mxu1 %vm1460_vm0, %v4959_v31  ;;  %v4991_v29 = vld [vmem:[%s6821_s0 + $0x3e0] sm:$0xff]  }
  0xc6   :  { %4686 = vmatmul.mubr.msk.bf16.gmra.mrb[88].mxu0 %vm1460_vm0, %v4960_v32  ;;  %4814 = vmatmul.mubr.msk.bf16.gmra.mrb[88].mxu1 %vm1460_vm0, %v4961_v33 }
  0xc7   :  { %4689 = vmatprep.mubr.msk.bf16.mxu0 %vm1460_vm0, %v4962_v34  ;;  %4817 = vmatprep.mubr.msk.bf16.mxu1 %vm1460_vm0, %v4963_v35 }
  0xce   :  { %4690 = vmatmul.mubr.msk.bf16.gmra.mrb[92].mxu0 %vm1460_vm0, %v4964_v36  ;;  %4818 = vmatmul.mubr.msk.bf16.gmra.mrb[92].mxu1 %vm1460_vm0, %v4965_v37 }
  0xcf   :  { %4693 = vmatprep.mubr.msk.bf16.mxu0 %vm1460_vm0, %v4966_v38  ;;  %4821 = vmatprep.mubr.msk.bf16.mxu1 %vm1460_vm0, %v4967_v39 }
  0xd6   :  { %4694 = vmatmul.mubr.msk.bf16.gmra.mrb[96].mxu0 %vm1460_vm0, %v4968_v40  ;;  %4822 = vmatmul.mubr.msk.bf16.gmra.mrb[96].mxu1 %vm1460_vm0, %v4969_v41 }
  0xd7   :  { %4697 = vmatprep.mubr.msk.bf16.mxu0 %vm1460_vm0, %v4970_v42  ;;  %4825 = vmatprep.mubr.msk.bf16.mxu1 %vm1460_vm0, %v4971_v43  ;;  %v4992_v43 = vld [vmem:[%s6821_s0 + $0x1e8] sm:$0xff]  }
  0xde   :  { %4698 = vmatmul.mubr.msk.bf16.gmra.mrb[100].mxu0 %vm1460_vm0, %v4972_v44  ;;  %4826 = vmatmul.mubr.msk.bf16.gmra.mrb[100].mxu1 %vm1460_vm0, %v4973_v45  ;;  %v4993_v44 = vld [vmem:[%s6821_s0 + $0x3e8] sm:$0xff]  }
  0xdf   :  { %4701 = vmatprep.mubr.msk.bf16.mxu0 %vm1460_vm0, %v4974_v46  ;;  %4829 = vmatprep.mubr.msk.bf16.mxu1 %vm1460_vm0, %v4975_v47 }
  0xe6   :  { %4702 = vmatmul.mubr.msk.bf16.gmra.mrb[104].mxu0 %vm1460_vm0, %v4976_v48  ;;  %4830 = vmatmul.mubr.msk.bf16.gmra.mrb[104].mxu1 %vm1460_vm0, %v4977_v49  ;;  %v4994_v48 = vld [vmem:[%s6821_s0 + $0x1f0] sm:$0xff]  }
  0xe7   :  { %4705 = vmatprep.mubr.msk.bf16.mxu0 %vm1460_vm0, %v4978_v50  ;;  %4833 = vmatprep.mubr.msk.bf16.mxu1 %vm1460_vm0, %v4979_v51  ;;  %v4995_v49 = vld [vmem:[%s6821_s0 + $0x3f0] sm:$0xff]  }
  0xe9   :  { %v4599_v52 = vpop.f32.mrb[0].mxu0  ;;  %v4727_v53 = vpop.f32.mrb[0].mxu1 }
  0xea   :  { %4998 = vtanh.f32 %v4599_v52  ;;  %v1883_v54 = vpop.f32.mrb[1].mxu0  ;;  %v2395_v55 = vpop.f32.mrb[1].mxu1 }
  0xeb   :  { %5000 = vtanh.f32 %v4727_v53  ;;  %v4600_v58 = vpop.f32.mrb[2].mxu0  ;;  %v4728_v59 = vpop.f32.mrb[2].mxu1 }
  0xec   :  { %5002 = vtanh.f32 %v1883_v54  ;;  %v1886_v62 = vpop.f32.mrb[3].mxu0  ;;  %v2398_v63 = vpop.f32.mrb[3].mxu1 }
  0xed   :  { %5004 = vtanh.f32 %v2395_v55 }
  0xee   :  { %5006 = vtanh.f32 %v4600_v58  ;;  %4706 = vmatmul.mubr.msk.bf16.gmra.mrb[108].mxu0 %vm1460_vm0, %v4980_v56  ;;  %4834 = vmatmul.mubr.msk.bf16.gmra.mrb[108].mxu1 %vm1460_vm0, %v4981_v57 }
  0xef   :  { %5008 = vtanh.f32 %v4728_v59  ;;  %4709 = vmatprep.mubr.msk.bf16.mxu0 %vm1460_vm0, %v4982_v60  ;;  %4837 = vmatprep.mubr.msk.bf16.mxu1 %vm1460_vm0, %v4983_v61 }
  0xf0   :  { %5010 = vtanh.f32 %v1886_v62 }
  0xf1   :  { %5012 = vtanh.f32 %v2398_v63  ;;  %v4603_v0 = vpop.f32.mrb[4].mxu0  ;;  %v4731_v1 = vpop.f32.mrb[4].mxu1  ;;  %v4996_v63 = vld [vmem:[%s6821_s0 + $0x1f8] sm:$0xff]  }
  0xf2   :  { %5014 = vtanh.f32 %v4603_v0  ;;  %v1899_v2 = vpop.f32.mrb[5].mxu0  ;;  %v2411_v3 = vpop.f32.mrb[5].mxu1  ;;  %v4997_v0 = vld [vmem:[%s6821_s0 + $0x3f8] sm:$0xff]  }
  0xf3   :  { %5016 = vtanh.f32 %v4731_v1  ;;  %v4604_v6 = vpop.f32.mrb[6].mxu0  ;;  %v4732_v7 = vpop.f32.mrb[6].mxu1 }
  0xf4   :  { %v4999_v10 = vpop.eup %4998  ;;  %5018 = vtanh.f32 %v1899_v2  ;;  %v1902_v11 = vpop.f32.mrb[7].mxu0 }
  0xf5   :  { %v2414_v12 = vpop.f32.mrb[7].mxu1  ;;  %v5001_v13 = vpop.eup %5000  ;;  %3935 = vst [vmem:[%s6822_s2 + $0x10] sm:$0xff] %v4999_v10  ;;  %5020 = vtanh.f32 %v2411_v3 }
  0xf6   :  { %v5003_v14 = vpop.eup %5002  ;;  %4063 = vst [vmem:[%s6822_s2 + $0x410] sm:$0xff] %v5001_v13  ;;  %5022 = vtanh.f32 %v4604_v6  ;;  %4710 = vmatmul.mubr.msk.bf16.gmra.mrb[112].mxu0 %vm1460_vm0, %v4984_v4  ;;  %4838 = vmatmul.mubr.msk.bf16.gmra.mrb[112].mxu1 %vm1460_vm0, %v4985_v5 }
  0xf7   :  { %v5005_v15 = vpop.eup %5004  ;;  %3933 = vst [vmem:[%s6822_s2] sm:$0xff] %v5003_v14  ;;  %5024 = vtanh.f32 %v4732_v7  ;;  %4713 = vmatprep.mubr.msk.bf16.mxu0 %vm1460_vm0, %v4986_v8  ;;  %4841 = vmatprep.mubr.msk.bf16.mxu1 %vm1460_vm0, %v4987_v9 }
  0xf8   :  { %v5007_v16 = vpop.eup %5006  ;;  %4061 = vst [vmem:[%s6822_s2 + $0x400] sm:$0xff] %v5005_v15  ;;  %5026 = vtanh.f32 %v1902_v11 }
  0xf9   :  { %v5009_v17 = vpop.eup %5008  ;;  %3936 = vst [vmem:[%s6822_s2 + $0x18] sm:$0xff] %v5007_v16  ;;  %5028 = vtanh.f32 %v2414_v12  ;;  %v4607_v18 = vpop.f32.mrb[8].mxu0 }
  0xfa   :  { %v4735_v19 = vpop.f32.mrb[8].mxu1  ;;  %v5011_v20 = vpop.eup %5010  ;;  %4064 = vst [vmem:[%s6822_s2 + $0x418] sm:$0xff] %v5009_v17  ;;  %5030 = vtanh.f32 %v4607_v18 }
  0xfb   :  { %v1915_v21 = vpop.f32.mrb[9].mxu0  ;;  %v2427_v22 = vpop.f32.mrb[9].mxu1  ;;  %3934 = vst [vmem:[%s6822_s2 + $0x8] sm:$0xff] %v5011_v20  ;;  %5032 = vtanh.f32 %v4735_v19 }
  0xfc   :  { %v5013_v25 = vpop.eup %5012  ;;  %v4608_v26 = vpop.f32.mrb[10].mxu0  ;;  %5034 = vtanh.f32 %v1915_v21 }
  0xfd   :  { %v4736_v27 = vpop.f32.mrb[10].mxu1  ;;  %v5015_v30 = vpop.eup %5014  ;;  %4062 = vst [vmem:[%s6822_s2 + $0x408] sm:$0xff] %v5013_v25  ;;  %5036 = vtanh.f32 %v2427_v22 }
  0xfe   :  { %v1918_v31 = vpop.f32.mrb[11].mxu0  ;;  %v2430_v32 = vpop.f32.mrb[11].mxu1  ;;  %3939 = vst [vmem:[%s6822_s2 + $0x30] sm:$0xff] %v5015_v30  ;;  %5038 = vtanh.f32 %v4608_v26  ;;  %4714 = vmatmul.mubr.msk.bf16.gmra.mrb[116].mxu0 %vm1460_vm0, %v4988_v23  ;;  %4842 = vmatmul.mubr.msk.bf16.gmra.mrb[116].mxu1 %vm1460_vm0, %v4989_v24 }
  0xff   :  { %v5017_v33 = vpop.eup %5016  ;;  %5040 = vtanh.f32 %v4736_v27  ;;  %4717 = vmatprep.mubr.msk.bf16.mxu0 %vm1460_vm0, %v4990_v28  ;;  %4845 = vmatprep.mubr.msk.bf16.mxu1 %vm1460_vm0, %v4991_v29 }
 0x100   :  { %v5019_v34 = vpop.eup %5018  ;;  %4067 = vst [vmem:[%s6822_s2 + $0x430] sm:$0xff] %v5017_v33  ;;  %5042 = vtanh.f32 %v1918_v31 }
 0x101   :  { %v5021_v35 = vpop.eup %5020  ;;  %3937 = vst [vmem:[%s6822_s2 + $0x20] sm:$0xff] %v5019_v34  ;;  %5044 = vtanh.f32 %v2430_v32  ;;  %v4611_v38 = vpop.f32.mrb[12].mxu0 }
 0x102   :  { %v5023_v36 = vpop.eup %5022  ;;  %4065 = vst [vmem:[%s6822_s2 + $0x420] sm:$0xff] %v5021_v35  ;;  %v4739_v39 = vpop.f32.mrb[12].mxu1  ;;  %5046 = vtanh.f32 %v4611_v38 }
 0x103   :  { %v5025_v37 = vpop.eup %5024  ;;  %3940 = vst [vmem:[%s6822_s2 + $0x38] sm:$0xff] %v5023_v36  ;;  %v1931_v41 = vpop.f32.mrb[13].mxu0  ;;  %5048 = vtanh.f32 %v4739_v39 }
 0x104   :  { %v5027_v40 = vpop.eup %5026  ;;  %4068 = vst [vmem:[%s6822_s2 + $0x438] sm:$0xff] %v5025_v37  ;;  %v2443_v42 = vpop.f32.mrb[13].mxu1  ;;  %5050 = vtanh.f32 %v1931_v41 }
 0x105   :  { %v5029_v45 = vpop.eup %5028  ;;  %3938 = vst [vmem:[%s6822_s2 + $0x28] sm:$0xff] %v5027_v40  ;;  %v4612_v46 = vpop.f32.mrb[14].mxu0  ;;  %5052 = vtanh.f32 %v2443_v42 }
 0x106   :  { %v4740_v47 = vpop.f32.mrb[14].mxu1  ;;  %v5031_v50 = vpop.eup %5030  ;;  %4066 = vst [vmem:[%s6822_s2 + $0x428] sm:$0xff] %v5029_v45  ;;  %5054 = vtanh.f32 %v4612_v46  ;;  %4718 = vmatmul.mubr.msk.bf16.gmra.mrb[120].mxu0 %vm1460_vm0, %v4992_v43  ;;  %4846 = vmatmul.mubr.msk.bf16.gmra.mrb[120].mxu1 %vm1460_vm0, %v4993_v44 }
 0x107   :  { %v1934_v51 = vpop.f32.mrb[15].mxu0  ;;  %v2446_v52 = vpop.f32.mrb[15].mxu1  ;;  %3943 = vst [vmem:[%s6822_s2 + $0x50] sm:$0xff] %v5031_v50  ;;  %5056 = vtanh.f32 %v4740_v47  ;;  %4721 = vmatprep.mubr.msk.bf16.mxu0 %vm1460_vm0, %v4994_v48  ;;  %4849 = vmatprep.mubr.msk.bf16.mxu1 %vm1460_vm0, %v4995_v49 }
 0x108   :  { %v5033_v53 = vpop.eup %5032  ;;  %5058 = vtanh.f32 %v1934_v51 }
 0x109   :  { %v5035_v54 = vpop.eup %5034  ;;  %4071 = vst [vmem:[%s6822_s2 + $0x450] sm:$0xff] %v5033_v53  ;;  %5060 = vtanh.f32 %v2446_v52  ;;  %v4615_v58 = vpop.f32.mrb[16].mxu0 }
 0x10a   :  { %v5037_v55 = vpop.eup %5036  ;;  %3941 = vst [vmem:[%s6822_s2 + $0x40] sm:$0xff] %v5035_v54  ;;  %v4743_v59 = vpop.f32.mrb[16].mxu1  ;;  %5062 = vtanh.f32 %v4615_v58 }
 0x10b   :  { %v5039_v56 = vpop.eup %5038  ;;  %4069 = vst [vmem:[%s6822_s2 + $0x440] sm:$0xff] %v5037_v55  ;;  %v1947_v61 = vpop.f32.mrb[17].mxu0  ;;  %5064 = vtanh.f32 %v4743_v59 }
 0x10c   :  { %v5041_v57 = vpop.eup %5040  ;;  %3944 = vst [vmem:[%s6822_s2 + $0x58] sm:$0xff] %v5039_v56  ;;  %v2459_v62 = vpop.f32.mrb[17].mxu1  ;;  %5066 = vtanh.f32 %v1947_v61 }
 0x10d   :  { %v5043_v60 = vpop.eup %5042  ;;  %4072 = vst [vmem:[%s6822_s2 + $0x458] sm:$0xff] %v5041_v57  ;;  %v4616_v2 = vpop.f32.mrb[18].mxu0  ;;  %5068 = vtanh.f32 %v2459_v62 }
 0x10e   :  { %v5045_v1 = vpop.eup %5044  ;;  %3942 = vst [vmem:[%s6822_s2 + $0x48] sm:$0xff] %v5043_v60  ;;  %v4744_v3 = vpop.f32.mrb[18].mxu1  ;;  %5070 = vtanh.f32 %v4616_v2  ;;  %4722 = vmatmul.mubr.msk.bf16.gmra.mrb[124].mxu0 %vm1460_vm0, %v4996_v63  ;;  %4850 = vmatmul.mubr.msk.bf16.gmra.mrb[124].mxu1 %vm1460_vm0, %v4997_v0 }
 0x10f   :  { %v5047_v4 = vpop.eup %5046  ;;  %4070 = vst [vmem:[%s6822_s2 + $0x448] sm:$0xff] %v5045_v1  ;;  %v1950_v5 = vpop.f32.mrb[19].mxu0  ;;  %5072 = vtanh.f32 %v4744_v3 }
 0x110   :  { %v2462_v6 = vpop.f32.mrb[19].mxu1  ;;  %v5049_v7 = vpop.eup %5048  ;;  %3947 = vst [vmem:[%s6822_s2 + $0x70] sm:$0xff] %v5047_v4  ;;  %5074 = vtanh.f32 %v1950_v5 }
 0x111   :  { %v5051_v8 = vpop.eup %5050  ;;  %4075 = vst [vmem:[%s6822_s2 + $0x470] sm:$0xff] %v5049_v7  ;;  %5076 = vtanh.f32 %v2462_v6  ;;  %v4619_v12 = vpop.f32.mrb[20].mxu0 }
 0x112   :  { %v5053_v9 = vpop.eup %5052  ;;  %3945 = vst [vmem:[%s6822_s2 + $0x60] sm:$0xff] %v5051_v8  ;;  %v4747_v13 = vpop.f32.mrb[20].mxu1  ;;  %5078 = vtanh.f32 %v4619_v12 }
 0x113   :  { %v5055_v10 = vpop.eup %5054  ;;  %4073 = vst [vmem:[%s6822_s2 + $0x460] sm:$0xff] %v5053_v9  ;;  %v1963_v15 = vpop.f32.mrb[21].mxu0  ;;  %5080 = vtanh.f32 %v4747_v13 }
 0x114   :  { %v5057_v11 = vpop.eup %5056  ;;  %3948 = vst [vmem:[%s6822_s2 + $0x78] sm:$0xff] %v5055_v10  ;;  %v2475_v16 = vpop.f32.mrb[21].mxu1  ;;  %5082 = vtanh.f32 %v1963_v15 }
 0x115   :  { %v5059_v14 = vpop.eup %5058  ;;  %4076 = vst [vmem:[%s6822_s2 + $0x478] sm:$0xff] %v5057_v11  ;;  %v4620_v18 = vpop.f32.mrb[22].mxu0  ;;  %5084 = vtanh.f32 %v2475_v16 }
 0x116   :  { %v5061_v17 = vpop.eup %5060  ;;  %3946 = vst [vmem:[%s6822_s2 + $0x68] sm:$0xff] %v5059_v14  ;;  %v4748_v19 = vpop.f32.mrb[22].mxu1  ;;  %5086 = vtanh.f32 %v4620_v18 }
 0x117   :  { %v5063_v20 = vpop.eup %5062  ;;  %4074 = vst [vmem:[%s6822_s2 + $0x468] sm:$0xff] %v5061_v17  ;;  %v1966_v21 = vpop.f32.mrb[23].mxu0  ;;  %5088 = vtanh.f32 %v4748_v19 }
 0x118   :  { %v2478_v22 = vpop.f32.mrb[23].mxu1  ;;  %v5065_v23 = vpop.eup %5064  ;;  %3951 = vst [vmem:[%s6822_s2 + $0x90] sm:$0xff] %v5063_v20  ;;  %5090 = vtanh.f32 %v1966_v21 }
 0x119   :  { %v5067_v24 = vpop.eup %5066  ;;  %4079 = vst [vmem:[%s6822_s2 + $0x490] sm:$0xff] %v5065_v23  ;;  %5092 = vtanh.f32 %v2478_v22  ;;  %v4623_v28 = vpop.f32.mrb[24].mxu0 }
 0x11a   :  { %v5069_v25 = vpop.eup %5068  ;;  %3949 = vst [vmem:[%s6822_s2 + $0x80] sm:$0xff] %v5067_v24  ;;  %v4751_v29 = vpop.f32.mrb[24].mxu1  ;;  %5094 = vtanh.f32 %v4623_v28 }
 0x11b   :  { %v5071_v26 = vpop.eup %5070  ;;  %4077 = vst [vmem:[%s6822_s2 + $0x480] sm:$0xff] %v5069_v25  ;;  %v1979_v31 = vpop.f32.mrb[25].mxu0  ;;  %5096 = vtanh.f32 %v4751_v29 }
 0x11c   :  { %v5073_v27 = vpop.eup %5072  ;;  %3952 = vst [vmem:[%s6822_s2 + $0x98] sm:$0xff] %v5071_v26  ;;  %v2491_v32 = vpop.f32.mrb[25].mxu1  ;;  %5098 = vtanh.f32 %v1979_v31 }
 0x11d   :  { %v5075_v30 = vpop.eup %5074  ;;  %4080 = vst [vmem:[%s6822_s2 + $0x498] sm:$0xff] %v5073_v27  ;;  %v4624_v34 = vpop.f32.mrb[26].mxu0  ;;  %5100 = vtanh.f32 %v2491_v32 }
 0x11e   :  { %v5077_v33 = vpop.eup %5076  ;;  %3950 = vst [vmem:[%s6822_s2 + $0x88] sm:$0xff] %v5075_v30  ;;  %v4752_v35 = vpop.f32.mrb[26].mxu1  ;;  %5102 = vtanh.f32 %v4624_v34 }
 0x11f   :  { %v5079_v36 = vpop.eup %5078  ;;  %4078 = vst [vmem:[%s6822_s2 + $0x488] sm:$0xff] %v5077_v33  ;;  %v1982_v37 = vpop.f32.mrb[27].mxu0  ;;  %5104 = vtanh.f32 %v4752_v35 }
 0x120   :  { %v2494_v38 = vpop.f32.mrb[27].mxu1  ;;  %v5081_v39 = vpop.eup %5080  ;;  %3955 = vst [vmem:[%s6822_s2 + $0xb0] sm:$0xff] %v5079_v36  ;;  %5106 = vtanh.f32 %v1982_v37 }
 0x121   :  { %v5083_v40 = vpop.eup %5082  ;;  %4083 = vst [vmem:[%s6822_s2 + $0x4b0] sm:$0xff] %v5081_v39  ;;  %5108 = vtanh.f32 %v2494_v38  ;;  %v4627_v44 = vpop.f32.mrb[28].mxu0 }
 0x122   :  { %v5085_v41 = vpop.eup %5084  ;;  %3953 = vst [vmem:[%s6822_s2 + $0xa0] sm:$0xff] %v5083_v40  ;;  %v4755_v45 = vpop.f32.mrb[28].mxu1  ;;  %5110 = vtanh.f32 %v4627_v44 }
 0x123   :  { %v5087_v42 = vpop.eup %5086  ;;  %4081 = vst [vmem:[%s6822_s2 + $0x4a0] sm:$0xff] %v5085_v41  ;;  %v1995_v47 = vpop.f32.mrb[29].mxu0  ;;  %5112 = vtanh.f32 %v4755_v45 }
 0x124   :  { %v5089_v43 = vpop.eup %5088  ;;  %3956 = vst [vmem:[%s6822_s2 + $0xb8] sm:$0xff] %v5087_v42  ;;  %v2507_v48 = vpop.f32.mrb[29].mxu1  ;;  %5114 = vtanh.f32 %v1995_v47 }
 0x125   :  { %v5091_v46 = vpop.eup %5090  ;;  %4084 = vst [vmem:[%s6822_s2 + $0x4b8] sm:$0xff] %v5089_v43  ;;  %v4628_v50 = vpop.f32.mrb[30].mxu0  ;;  %5116 = vtanh.f32 %v2507_v48 }
 0x126   :  { %v5093_v49 = vpop.eup %5092  ;;  %3954 = vst [vmem:[%s6822_s2 + $0xa8] sm:$0xff] %v5091_v46  ;;  %v4756_v51 = vpop.f32.mrb[30].mxu1  ;;  %5118 = vtanh.f32 %v4628_v50 }
 0x127   :  { %v5095_v52 = vpop.eup %5094  ;;  %4082 = vst [vmem:[%s6822_s2 + $0x4a8] sm:$0xff] %v5093_v49  ;;  %v1998_v53 = vpop.f32.mrb[31].mxu0  ;;  %5120 = vtanh.f32 %v4756_v51 }
 0x128   :  { %v2510_v54 = vpop.f32.mrb[31].mxu1  ;;  %v5097_v55 = vpop.eup %5096  ;;  %3959 = vst [vmem:[%s6822_s2 + $0xd0] sm:$0xff] %v5095_v52  ;;  %5122 = vtanh.f32 %v1998_v53 }
 0x129   :  { %v5099_v56 = vpop.eup %5098  ;;  %4087 = vst [vmem:[%s6822_s2 + $0x4d0] sm:$0xff] %v5097_v55  ;;  %5124 = vtanh.f32 %v2510_v54  ;;  %v4631_v60 = vpop.f32.mrb[32].mxu0 }
 0x12a   :  { %v5101_v57 = vpop.eup %5100  ;;  %3957 = vst [vmem:[%s6822_s2 + $0xc0] sm:$0xff] %v5099_v56  ;;  %v4759_v61 = vpop.f32.mrb[32].mxu1  ;;  %5126 = vtanh.f32 %v4631_v60 }
 0x12b   :  { %v5103_v58 = vpop.eup %5102  ;;  %4085 = vst [vmem:[%s6822_s2 + $0x4c0] sm:$0xff] %v5101_v57  ;;  %v2011_v63 = vpop.f32.mrb[33].mxu0  ;;  %5128 = vtanh.f32 %v4759_v61 }
 0x12c   :  { %v5105_v59 = vpop.eup %5104  ;;  %3960 = vst [vmem:[%s6822_s2 + $0xd8] sm:$0xff] %v5103_v58  ;;  %v2523_v0 = vpop.f32.mrb[33].mxu1  ;;  %5130 = vtanh.f32 %v2011_v63 }
 0x12d   :  { %v5107_v62 = vpop.eup %5106  ;;  %4088 = vst [vmem:[%s6822_s2 + $0x4d8] sm:$0xff] %v5105_v59  ;;  %v4632_v2 = vpop.f32.mrb[34].mxu0  ;;  %5132 = vtanh.f32 %v2523_v0 }
 0x12e   :  { %v5109_v1 = vpop.eup %5108  ;;  %3958 = vst [vmem:[%s6822_s2 + $0xc8] sm:$0xff] %v5107_v62  ;;  %v4760_v3 = vpop.f32.mrb[34].mxu1  ;;  %5134 = vtanh.f32 %v4632_v2 }
 0x12f   :  { %v5111_v4 = vpop.eup %5110  ;;  %4086 = vst [vmem:[%s6822_s2 + $0x4c8] sm:$0xff] %v5109_v1  ;;  %v2014_v5 = vpop.f32.mrb[35].mxu0  ;;  %5136 = vtanh.f32 %v4760_v3 }
 0x130   :  { %v2526_v6 = vpop.f32.mrb[35].mxu1  ;;  %v5113_v7 = vpop.eup %5112  ;;  %3963 = vst [vmem:[%s6822_s2 + $0xf0] sm:$0xff] %v5111_v4  ;;  %5138 = vtanh.f32 %v2014_v5 }
 0x131   :  { %v5115_v8 = vpop.eup %5114  ;;  %4091 = vst [vmem:[%s6822_s2 + $0x4f0] sm:$0xff] %v5113_v7  ;;  %5140 = vtanh.f32 %v2526_v6  ;;  %v4635_v12 = vpop.f32.mrb[36].mxu0 }
 0x132   :  { %v5117_v9 = vpop.eup %5116  ;;  %3961 = vst [vmem:[%s6822_s2 + $0xe0] sm:$0xff] %v5115_v8  ;;  %v4763_v13 = vpop.f32.mrb[36].mxu1  ;;  %5142 = vtanh.f32 %v4635_v12 }
 0x133   :  { %v5119_v10 = vpop.eup %5118  ;;  %4089 = vst [vmem:[%s6822_s2 + $0x4e0] sm:$0xff] %v5117_v9  ;;  %v2027_v15 = vpop.f32.mrb[37].mxu0  ;;  %5144 = vtanh.f32 %v4763_v13 }
 0x134   :  { %v5121_v11 = vpop.eup %5120  ;;  %3964 = vst [vmem:[%s6822_s2 + $0xf8] sm:$0xff] %v5119_v10  ;;  %v2539_v16 = vpop.f32.mrb[37].mxu1  ;;  %5146 = vtanh.f32 %v2027_v15 }
 0x135   :  { %v5123_v14 = vpop.eup %5122  ;;  %4092 = vst [vmem:[%s6822_s2 + $0x4f8] sm:$0xff] %v5121_v11  ;;  %v4636_v18 = vpop.f32.mrb[38].mxu0  ;;  %5148 = vtanh.f32 %v2539_v16 }
 0x136   :  { %v5125_v17 = vpop.eup %5124  ;;  %3962 = vst [vmem:[%s6822_s2 + $0xe8] sm:$0xff] %v5123_v14  ;;  %v4764_v19 = vpop.f32.mrb[38].mxu1  ;;  %5150 = vtanh.f32 %v4636_v18 }
 0x137   :  { %v5127_v20 = vpop.eup %5126  ;;  %4090 = vst [vmem:[%s6822_s2 + $0x4e8] sm:$0xff] %v5125_v17  ;;  %v2030_v21 = vpop.f32.mrb[39].mxu0  ;;  %5152 = vtanh.f32 %v4764_v19 }
 0x138   :  { %v2542_v22 = vpop.f32.mrb[39].mxu1  ;;  %v5129_v23 = vpop.eup %5128  ;;  %3967 = vst [vmem:[%s6822_s2 + $0x110] sm:$0xff] %v5127_v20  ;;  %5154 = vtanh.f32 %v2030_v21 }
 0x139   :  { %v5131_v24 = vpop.eup %5130  ;;  %4095 = vst [vmem:[%s6822_s2 + $0x510] sm:$0xff] %v5129_v23  ;;  %5156 = vtanh.f32 %v2542_v22  ;;  %v4639_v28 = vpop.f32.mrb[40].mxu0 }
 0x13a   :  { %v5133_v25 = vpop.eup %5132  ;;  %3965 = vst [vmem:[%s6822_s2 + $0x100] sm:$0xff] %v5131_v24  ;;  %v4767_v29 = vpop.f32.mrb[40].mxu1  ;;  %5158 = vtanh.f32 %v4639_v28 }
 0x13b   :  { %v5135_v26 = vpop.eup %5134  ;;  %4093 = vst [vmem:[%s6822_s2 + $0x500] sm:$0xff] %v5133_v25  ;;  %v2043_v31 = vpop.f32.mrb[41].mxu0  ;;  %5160 = vtanh.f32 %v4767_v29 }
 0x13c   :  { %v5137_v27 = vpop.eup %5136  ;;  %3968 = vst [vmem:[%s6822_s2 + $0x118] sm:$0xff] %v5135_v26  ;;  %v2555_v32 = vpop.f32.mrb[41].mxu1  ;;  %5162 = vtanh.f32 %v2043_v31 }
 0x13d   :  { %v5139_v30 = vpop.eup %5138  ;;  %4096 = vst [vmem:[%s6822_s2 + $0x518] sm:$0xff] %v5137_v27  ;;  %v4640_v34 = vpop.f32.mrb[42].mxu0  ;;  %5164 = vtanh.f32 %v2555_v32 }
 0x13e   :  { %v5141_v33 = vpop.eup %5140  ;;  %3966 = vst [vmem:[%s6822_s2 + $0x108] sm:$0xff] %v5139_v30  ;;  %v4768_v35 = vpop.f32.mrb[42].mxu1  ;;  %5166 = vtanh.f32 %v4640_v34 }
 0x13f   :  { %v5143_v36 = vpop.eup %5142  ;;  %4094 = vst [vmem:[%s6822_s2 + $0x508] sm:$0xff] %v5141_v33  ;;  %v2046_v37 = vpop.f32.mrb[43].mxu0  ;;  %5168 = vtanh.f32 %v4768_v35 }
 0x140   :  { %v2558_v38 = vpop.f32.mrb[43].mxu1  ;;  %v5145_v39 = vpop.eup %5144  ;;  %3971 = vst [vmem:[%s6822_s2 + $0x130] sm:$0xff] %v5143_v36  ;;  %5170 = vtanh.f32 %v2046_v37 }
 0x141   :  { %v5147_v40 = vpop.eup %5146  ;;  %4099 = vst [vmem:[%s6822_s2 + $0x530] sm:$0xff] %v5145_v39  ;;  %5172 = vtanh.f32 %v2558_v38  ;;  %v4643_v44 = vpop.f32.mrb[44].mxu0 }
 0x142   :  { %v5149_v41 = vpop.eup %5148  ;;  %3969 = vst [vmem:[%s6822_s2 + $0x120] sm:$0xff] %v5147_v40  ;;  %v4771_v45 = vpop.f32.mrb[44].mxu1  ;;  %5174 = vtanh.f32 %v4643_v44 }
 0x143   :  { %v5151_v42 = vpop.eup %5150  ;;  %4097 = vst [vmem:[%s6822_s2 + $0x520] sm:$0xff] %v5149_v41  ;;  %v2059_v47 = vpop.f32.mrb[45].mxu0  ;;  %5176 = vtanh.f32 %v4771_v45 }
 0x144   :  { %v5153_v43 = vpop.eup %5152  ;;  %3972 = vst [vmem:[%s6822_s2 + $0x138] sm:$0xff] %v5151_v42  ;;  %v2571_v48 = vpop.f32.mrb[45].mxu1  ;;  %5178 = vtanh.f32 %v2059_v47 }
 0x145   :  { %v5155_v46 = vpop.eup %5154  ;;  %4100 = vst [vmem:[%s6822_s2 + $0x538] sm:$0xff] %v5153_v43  ;;  %v4644_v50 = vpop.f32.mrb[46].mxu0  ;;  %5180 = vtanh.f32 %v2571_v48 }
 0x146   :  { %v5157_v49 = vpop.eup %5156  ;;  %3970 = vst [vmem:[%s6822_s2 + $0x128] sm:$0xff] %v5155_v46  ;;  %v4772_v51 = vpop.f32.mrb[46].mxu1  ;;  %5182 = vtanh.f32 %v4644_v50 }
 0x147   :  { %v5159_v52 = vpop.eup %5158  ;;  %4098 = vst [vmem:[%s6822_s2 + $0x528] sm:$0xff] %v5157_v49  ;;  %v2062_v53 = vpop.f32.mrb[47].mxu0  ;;  %5184 = vtanh.f32 %v4772_v51 }
 0x148   :  { %v2574_v54 = vpop.f32.mrb[47].mxu1  ;;  %v5161_v55 = vpop.eup %5160  ;;  %3975 = vst [vmem:[%s6822_s2 + $0x150] sm:$0xff] %v5159_v52  ;;  %5186 = vtanh.f32 %v2062_v53 }
 0x149   :  { %v5163_v56 = vpop.eup %5162  ;;  %4103 = vst [vmem:[%s6822_s2 + $0x550] sm:$0xff] %v5161_v55  ;;  %5188 = vtanh.f32 %v2574_v54  ;;  %v4647_v60 = vpop.f32.mrb[48].mxu0 }
 0x14a   :  { %v5165_v57 = vpop.eup %5164  ;;  %3973 = vst [vmem:[%s6822_s2 + $0x140] sm:$0xff] %v5163_v56  ;;  %v4775_v61 = vpop.f32.mrb[48].mxu1  ;;  %5190 = vtanh.f32 %v4647_v60 }
 0x14b   :  { %v5167_v58 = vpop.eup %5166  ;;  %4101 = vst [vmem:[%s6822_s2 + $0x540] sm:$0xff] %v5165_v57  ;;  %v2075_v63 = vpop.f32.mrb[49].mxu0  ;;  %5192 = vtanh.f32 %v4775_v61 }
 0x14c   :  { %v5169_v59 = vpop.eup %5168  ;;  %3976 = vst [vmem:[%s6822_s2 + $0x158] sm:$0xff] %v5167_v58  ;;  %v2587_v0 = vpop.f32.mrb[49].mxu1  ;;  %5194 = vtanh.f32 %v2075_v63 }
 0x14d   :  { %v5171_v62 = vpop.eup %5170  ;;  %4104 = vst [vmem:[%s6822_s2 + $0x558] sm:$0xff] %v5169_v59  ;;  %v4648_v2 = vpop.f32.mrb[50].mxu0  ;;  %5196 = vtanh.f32 %v2587_v0 }
 0x14e   :  { %v5173_v1 = vpop.eup %5172  ;;  %3974 = vst [vmem:[%s6822_s2 + $0x148] sm:$0xff] %v5171_v62  ;;  %v4776_v3 = vpop.f32.mrb[50].mxu1  ;;  %5198 = vtanh.f32 %v4648_v2 }
 0x14f   :  { %v5175_v4 = vpop.eup %5174  ;;  %4102 = vst [vmem:[%s6822_s2 + $0x548] sm:$0xff] %v5173_v1  ;;  %v2078_v5 = vpop.f32.mrb[51].mxu0  ;;  %5200 = vtanh.f32 %v4776_v3 }
 0x150   :  { %v2590_v6 = vpop.f32.mrb[51].mxu1  ;;  %v5177_v7 = vpop.eup %5176  ;;  %3979 = vst [vmem:[%s6822_s2 + $0x170] sm:$0xff] %v5175_v4  ;;  %5202 = vtanh.f32 %v2078_v5 }
 0x151   :  { %v5179_v8 = vpop.eup %5178  ;;  %4107 = vst [vmem:[%s6822_s2 + $0x570] sm:$0xff] %v5177_v7  ;;  %5204 = vtanh.f32 %v2590_v6  ;;  %v4651_v12 = vpop.f32.mrb[52].mxu0 }
 0x152   :  { %v5181_v9 = vpop.eup %5180  ;;  %3977 = vst [vmem:[%s6822_s2 + $0x160] sm:$0xff] %v5179_v8  ;;  %v4779_v13 = vpop.f32.mrb[52].mxu1  ;;  %5206 = vtanh.f32 %v4651_v12 }
 0x153   :  { %v5183_v10 = vpop.eup %5182  ;;  %4105 = vst [vmem:[%s6822_s2 + $0x560] sm:$0xff] %v5181_v9  ;;  %v2091_v15 = vpop.f32.mrb[53].mxu0  ;;  %5208 = vtanh.f32 %v4779_v13 }
 0x154   :  { %v5185_v11 = vpop.eup %5184  ;;  %3980 = vst [vmem:[%s6822_s2 + $0x178] sm:$0xff] %v5183_v10  ;;  %v2603_v16 = vpop.f32.mrb[53].mxu1  ;;  %5210 = vtanh.f32 %v2091_v15 }
 0x155   :  { %v5187_v14 = vpop.eup %5186  ;;  %4108 = vst [vmem:[%s6822_s2 + $0x578] sm:$0xff] %v5185_v11  ;;  %v4652_v18 = vpop.f32.mrb[54].mxu0  ;;  %5212 = vtanh.f32 %v2603_v16 }
 0x156   :  { %v5189_v17 = vpop.eup %5188  ;;  %3978 = vst [vmem:[%s6822_s2 + $0x168] sm:$0xff] %v5187_v14  ;;  %v4780_v19 = vpop.f32.mrb[54].mxu1  ;;  %5214 = vtanh.f32 %v4652_v18 }
 0x157   :  { %v5191_v20 = vpop.eup %5190  ;;  %4106 = vst [vmem:[%s6822_s2 + $0x568] sm:$0xff] %v5189_v17  ;;  %v2094_v21 = vpop.f32.mrb[55].mxu0  ;;  %5216 = vtanh.f32 %v4780_v19 }
 0x158   :  { %v2606_v22 = vpop.f32.mrb[55].mxu1  ;;  %v5193_v23 = vpop.eup %5192  ;;  %3983 = vst [vmem:[%s6822_s2 + $0x190] sm:$0xff] %v5191_v20  ;;  %5218 = vtanh.f32 %v2094_v21 }
 0x159   :  { %v5195_v24 = vpop.eup %5194  ;;  %4111 = vst [vmem:[%s6822_s2 + $0x590] sm:$0xff] %v5193_v23  ;;  %5220 = vtanh.f32 %v2606_v22  ;;  %v4655_v28 = vpop.f32.mrb[56].mxu0 }
 0x15a   :  { %v5197_v25 = vpop.eup %5196  ;;  %3981 = vst [vmem:[%s6822_s2 + $0x180] sm:$0xff] %v5195_v24  ;;  %v4783_v29 = vpop.f32.mrb[56].mxu1  ;;  %5222 = vtanh.f32 %v4655_v28 }
 0x15b   :  { %v5199_v26 = vpop.eup %5198  ;;  %4109 = vst [vmem:[%s6822_s2 + $0x580] sm:$0xff] %v5197_v25  ;;  %v2107_v31 = vpop.f32.mrb[57].mxu0  ;;  %5224 = vtanh.f32 %v4783_v29 }
 0x15c   :  { %v5201_v27 = vpop.eup %5200  ;;  %3984 = vst [vmem:[%s6822_s2 + $0x198] sm:$0xff] %v5199_v26  ;;  %v2619_v32 = vpop.f32.mrb[57].mxu1  ;;  %5226 = vtanh.f32 %v2107_v31 }
 0x15d   :  { %v5203_v30 = vpop.eup %5202  ;;  %4112 = vst [vmem:[%s6822_s2 + $0x598] sm:$0xff] %v5201_v27  ;;  %v4656_v34 = vpop.f32.mrb[58].mxu0  ;;  %5228 = vtanh.f32 %v2619_v32 }
 0x15e   :  { %v5205_v33 = vpop.eup %5204  ;;  %3982 = vst [vmem:[%s6822_s2 + $0x188] sm:$0xff] %v5203_v30  ;;  %v4784_v35 = vpop.f32.mrb[58].mxu1  ;;  %5230 = vtanh.f32 %v4656_v34 }
 0x15f   :  { %v5207_v36 = vpop.eup %5206  ;;  %4110 = vst [vmem:[%s6822_s2 + $0x588] sm:$0xff] %v5205_v33  ;;  %v2110_v37 = vpop.f32.mrb[59].mxu0  ;;  %5232 = vtanh.f32 %v4784_v35 }
 0x160   :  { %v2622_v38 = vpop.f32.mrb[59].mxu1  ;;  %v5209_v39 = vpop.eup %5208  ;;  %3987 = vst [vmem:[%s6822_s2 + $0x1b0] sm:$0xff] %v5207_v36  ;;  %5234 = vtanh.f32 %v2110_v37 }
 0x161   :  { %v5211_v40 = vpop.eup %5210  ;;  %4115 = vst [vmem:[%s6822_s2 + $0x5b0] sm:$0xff] %v5209_v39  ;;  %5236 = vtanh.f32 %v2622_v38  ;;  %v4659_v44 = vpop.f32.mrb[60].mxu0 }
 0x162   :  { %v5213_v41 = vpop.eup %5212  ;;  %3985 = vst [vmem:[%s6822_s2 + $0x1a0] sm:$0xff] %v5211_v40  ;;  %v4787_v45 = vpop.f32.mrb[60].mxu1  ;;  %5238 = vtanh.f32 %v4659_v44 }
 0x163   :  { %v5215_v42 = vpop.eup %5214  ;;  %4113 = vst [vmem:[%s6822_s2 + $0x5a0] sm:$0xff] %v5213_v41  ;;  %v2123_v47 = vpop.f32.mrb[61].mxu0  ;;  %5240 = vtanh.f32 %v4787_v45 }
 0x164   :  { %v5217_v43 = vpop.eup %5216  ;;  %3988 = vst [vmem:[%s6822_s2 + $0x1b8] sm:$0xff] %v5215_v42  ;;  %v2635_v48 = vpop.f32.mrb[61].mxu1  ;;  %5242 = vtanh.f32 %v2123_v47 }
 0x165   :  { %v5219_v46 = vpop.eup %5218  ;;  %4116 = vst [vmem:[%s6822_s2 + $0x5b8] sm:$0xff] %v5217_v43  ;;  %v4660_v50 = vpop.f32.mrb[62].mxu0  ;;  %5244 = vtanh.f32 %v2635_v48 }
 0x166   :  { %v5221_v49 = vpop.eup %5220  ;;  %3986 = vst [vmem:[%s6822_s2 + $0x1a8] sm:$0xff] %v5219_v46  ;;  %v4788_v51 = vpop.f32.mrb[62].mxu1  ;;  %5246 = vtanh.f32 %v4660_v50 }
 0x167   :  { %v5223_v52 = vpop.eup %5222  ;;  %4114 = vst [vmem:[%s6822_s2 + $0x5a8] sm:$0xff] %v5221_v49  ;;  %v2126_v53 = vpop.f32.mrb[63].mxu0  ;;  %5248 = vtanh.f32 %v4788_v51 }
 0x168   :  { %v2638_v54 = vpop.f32.mrb[63].mxu1  ;;  %v5225_v55 = vpop.eup %5224  ;;  %3991 = vst [vmem:[%s6822_s2 + $0x1d0] sm:$0xff] %v5223_v52  ;;  %5250 = vtanh.f32 %v2126_v53 }
 0x169   :  { %v5227_v56 = vpop.eup %5226  ;;  %4119 = vst [vmem:[%s6822_s2 + $0x5d0] sm:$0xff] %v5225_v55  ;;  %5252 = vtanh.f32 %v2638_v54  ;;  %v4663_v60 = vpop.f32.mrb[64].mxu0 }
 0x16a   :  { %v5229_v57 = vpop.eup %5228  ;;  %3989 = vst [vmem:[%s6822_s2 + $0x1c0] sm:$0xff] %v5227_v56  ;;  %v4791_v61 = vpop.f32.mrb[64].mxu1  ;;  %5254 = vtanh.f32 %v4663_v60 }
 0x16b   :  { %v5231_v58 = vpop.eup %5230  ;;  %4117 = vst [vmem:[%s6822_s2 + $0x5c0] sm:$0xff] %v5229_v57  ;;  %v2139_v63 = vpop.f32.mrb[65].mxu0  ;;  %5256 = vtanh.f32 %v4791_v61 }
 0x16c   :  { %v5233_v59 = vpop.eup %5232  ;;  %3992 = vst [vmem:[%s6822_s2 + $0x1d8] sm:$0xff] %v5231_v58  ;;  %v2651_v0 = vpop.f32.mrb[65].mxu1  ;;  %5258 = vtanh.f32 %v2139_v63 }
 0x16d   :  { %v5235_v62 = vpop.eup %5234  ;;  %4120 = vst [vmem:[%s6822_s2 + $0x5d8] sm:$0xff] %v5233_v59  ;;  %v4664_v2 = vpop.f32.mrb[66].mxu0  ;;  %5260 = vtanh.f32 %v2651_v0 }
 0x16e   :  { %v5237_v1 = vpop.eup %5236  ;;  %3990 = vst [vmem:[%s6822_s2 + $0x1c8] sm:$0xff] %v5235_v62  ;;  %v4792_v3 = vpop.f32.mrb[66].mxu1  ;;  %5262 = vtanh.f32 %v4664_v2 }
 0x16f   :  { %v5239_v4 = vpop.eup %5238  ;;  %4118 = vst [vmem:[%s6822_s2 + $0x5c8] sm:$0xff] %v5237_v1  ;;  %v2142_v5 = vpop.f32.mrb[67].mxu0  ;;  %5264 = vtanh.f32 %v4792_v3 }
 0x170   :  { %v2654_v6 = vpop.f32.mrb[67].mxu1  ;;  %v5241_v7 = vpop.eup %5240  ;;  %3995 = vst [vmem:[%s6822_s2 + $0x1f0] sm:$0xff] %v5239_v4  ;;  %5266 = vtanh.f32 %v2142_v5 }
 0x171   :  { %v5243_v8 = vpop.eup %5242  ;;  %4123 = vst [vmem:[%s6822_s2 + $0x5f0] sm:$0xff] %v5241_v7  ;;  %5268 = vtanh.f32 %v2654_v6  ;;  %v4667_v12 = vpop.f32.mrb[68].mxu0 }
 0x172   :  { %v5245_v9 = vpop.eup %5244  ;;  %3993 = vst [vmem:[%s6822_s2 + $0x1e0] sm:$0xff] %v5243_v8  ;;  %v4795_v13 = vpop.f32.mrb[68].mxu1  ;;  %5270 = vtanh.f32 %v4667_v12 }
 0x173   :  { %v5247_v10 = vpop.eup %5246  ;;  %4121 = vst [vmem:[%s6822_s2 + $0x5e0] sm:$0xff] %v5245_v9  ;;  %v2155_v15 = vpop.f32.mrb[69].mxu0  ;;  %5272 = vtanh.f32 %v4795_v13 }
 0x174   :  { %v5249_v11 = vpop.eup %5248  ;;  %3996 = vst [vmem:[%s6822_s2 + $0x1f8] sm:$0xff] %v5247_v10  ;;  %v2667_v16 = vpop.f32.mrb[69].mxu1  ;;  %5274 = vtanh.f32 %v2155_v15 }
 0x175   :  { %v5251_v14 = vpop.eup %5250  ;;  %4124 = vst [vmem:[%s6822_s2 + $0x5f8] sm:$0xff] %v5249_v11  ;;  %v4668_v18 = vpop.f32.mrb[70].mxu0  ;;  %5276 = vtanh.f32 %v2667_v16 }
 0x176   :  { %v5253_v17 = vpop.eup %5252  ;;  %3994 = vst [vmem:[%s6822_s2 + $0x1e8] sm:$0xff] %v5251_v14  ;;  %v4796_v19 = vpop.f32.mrb[70].mxu1  ;;  %5278 = vtanh.f32 %v4668_v18 }
 0x177   :  { %v5255_v20 = vpop.eup %5254  ;;  %4122 = vst [vmem:[%s6822_s2 + $0x5e8] sm:$0xff] %v5253_v17  ;;  %v2158_v21 = vpop.f32.mrb[71].mxu0  ;;  %5280 = vtanh.f32 %v4796_v19 }
 0x178   :  { %v2670_v22 = vpop.f32.mrb[71].mxu1  ;;  %v5257_v23 = vpop.eup %5256  ;;  %3999 = vst [vmem:[%s6822_s2 + $0x210] sm:$0xff] %v5255_v20  ;;  %5282 = vtanh.f32 %v2158_v21 }
 0x179   :  { %v5259_v24 = vpop.eup %5258  ;;  %4127 = vst [vmem:[%s6822_s2 + $0x610] sm:$0xff] %v5257_v23  ;;  %5284 = vtanh.f32 %v2670_v22  ;;  %v4671_v28 = vpop.f32.mrb[72].mxu0 }
 0x17a   :  { %v5261_v25 = vpop.eup %5260  ;;  %3997 = vst [vmem:[%s6822_s2 + $0x200] sm:$0xff] %v5259_v24  ;;  %v4799_v29 = vpop.f32.mrb[72].mxu1  ;;  %5286 = vtanh.f32 %v4671_v28 }
 0x17b   :  { %v5263_v26 = vpop.eup %5262  ;;  %4125 = vst [vmem:[%s6822_s2 + $0x600] sm:$0xff] %v5261_v25  ;;  %v2171_v31 = vpop.f32.mrb[73].mxu0  ;;  %5288 = vtanh.f32 %v4799_v29 }
 0x17c   :  { %v5265_v27 = vpop.eup %5264  ;;  %4000 = vst [vmem:[%s6822_s2 + $0x218] sm:$0xff] %v5263_v26  ;;  %v2683_v32 = vpop.f32.mrb[73].mxu1  ;;  %5290 = vtanh.f32 %v2171_v31 }
 0x17d   :  { %v5267_v30 = vpop.eup %5266  ;;  %4128 = vst [vmem:[%s6822_s2 + $0x618] sm:$0xff] %v5265_v27  ;;  %v4672_v34 = vpop.f32.mrb[74].mxu0  ;;  %5292 = vtanh.f32 %v2683_v32 }
 0x17e   :  { %v5269_v33 = vpop.eup %5268  ;;  %3998 = vst [vmem:[%s6822_s2 + $0x208] sm:$0xff] %v5267_v30  ;;  %v4800_v35 = vpop.f32.mrb[74].mxu1  ;;  %5294 = vtanh.f32 %v4672_v34 }
 0x17f   :  { %v5271_v36 = vpop.eup %5270  ;;  %4126 = vst [vmem:[%s6822_s2 + $0x608] sm:$0xff] %v5269_v33  ;;  %v2174_v37 = vpop.f32.mrb[75].mxu0  ;;  %5296 = vtanh.f32 %v4800_v35 }
 0x180   :  { %v2686_v38 = vpop.f32.mrb[75].mxu1  ;;  %v5273_v39 = vpop.eup %5272  ;;  %4003 = vst [vmem:[%s6822_s2 + $0x230] sm:$0xff] %v5271_v36  ;;  %5298 = vtanh.f32 %v2174_v37 }
 0x181   :  { %v5275_v40 = vpop.eup %5274  ;;  %4131 = vst [vmem:[%s6822_s2 + $0x630] sm:$0xff] %v5273_v39  ;;  %5300 = vtanh.f32 %v2686_v38  ;;  %v4675_v44 = vpop.f32.mrb[76].mxu0 }
 0x182   :  { %v5277_v41 = vpop.eup %5276  ;;  %4001 = vst [vmem:[%s6822_s2 + $0x220] sm:$0xff] %v5275_v40  ;;  %v4803_v45 = vpop.f32.mrb[76].mxu1  ;;  %5302 = vtanh.f32 %v4675_v44 }
 0x183   :  { %v5279_v42 = vpop.eup %5278  ;;  %4129 = vst [vmem:[%s6822_s2 + $0x620] sm:$0xff] %v5277_v41  ;;  %v2187_v47 = vpop.f32.mrb[77].mxu0  ;;  %5304 = vtanh.f32 %v4803_v45 }
 0x184   :  { %v5281_v43 = vpop.eup %5280  ;;  %4004 = vst [vmem:[%s6822_s2 + $0x238] sm:$0xff] %v5279_v42  ;;  %v2699_v48 = vpop.f32.mrb[77].mxu1  ;;  %5306 = vtanh.f32 %v2187_v47 }
 0x185   :  { %v5283_v46 = vpop.eup %5282  ;;  %4132 = vst [vmem:[%s6822_s2 + $0x638] sm:$0xff] %v5281_v43  ;;  %v4676_v50 = vpop.f32.mrb[78].mxu0  ;;  %5308 = vtanh.f32 %v2699_v48 }
 0x186   :  { %v5285_v49 = vpop.eup %5284  ;;  %4002 = vst [vmem:[%s6822_s2 + $0x228] sm:$0xff] %v5283_v46  ;;  %v4804_v51 = vpop.f32.mrb[78].mxu1  ;;  %5310 = vtanh.f32 %v4676_v50 }
 0x187   :  { %v5287_v52 = vpop.eup %5286  ;;  %4130 = vst [vmem:[%s6822_s2 + $0x628] sm:$0xff] %v5285_v49  ;;  %v2190_v53 = vpop.f32.mrb[79].mxu0  ;;  %5312 = vtanh.f32 %v4804_v51 }
 0x188   :  { %v2702_v54 = vpop.f32.mrb[79].mxu1  ;;  %v5289_v55 = vpop.eup %5288  ;;  %4007 = vst [vmem:[%s6822_s2 + $0x250] sm:$0xff] %v5287_v52  ;;  %5314 = vtanh.f32 %v2190_v53 }
 0x189   :  { %v5291_v56 = vpop.eup %5290  ;;  %4135 = vst [vmem:[%s6822_s2 + $0x650] sm:$0xff] %v5289_v55  ;;  %5316 = vtanh.f32 %v2702_v54  ;;  %v4679_v60 = vpop.f32.mrb[80].mxu0 }
 0x18a   :  { %v5293_v57 = vpop.eup %5292  ;;  %4005 = vst [vmem:[%s6822_s2 + $0x240] sm:$0xff] %v5291_v56  ;;  %v4807_v61 = vpop.f32.mrb[80].mxu1  ;;  %5318 = vtanh.f32 %v4679_v60 }
 0x18b   :  { %v5295_v58 = vpop.eup %5294  ;;  %4133 = vst [vmem:[%s6822_s2 + $0x640] sm:$0xff] %v5293_v57  ;;  %v2203_v63 = vpop.f32.mrb[81].mxu0  ;;  %5320 = vtanh.f32 %v4807_v61 }
 0x18c   :  { %v5297_v59 = vpop.eup %5296  ;;  %4008 = vst [vmem:[%s6822_s2 + $0x258] sm:$0xff] %v5295_v58  ;;  %v2715_v0 = vpop.f32.mrb[81].mxu1  ;;  %5322 = vtanh.f32 %v2203_v63 }
 0x18d   :  { %v5299_v62 = vpop.eup %5298  ;;  %4136 = vst [vmem:[%s6822_s2 + $0x658] sm:$0xff] %v5297_v59  ;;  %v4680_v2 = vpop.f32.mrb[82].mxu0  ;;  %5324 = vtanh.f32 %v2715_v0 }
 0x18e   :  { %v5301_v1 = vpop.eup %5300  ;;  %4006 = vst [vmem:[%s6822_s2 + $0x248] sm:$0xff] %v5299_v62  ;;  %v4808_v3 = vpop.f32.mrb[82].mxu1  ;;  %5326 = vtanh.f32 %v4680_v2 }
 0x18f   :  { %v5303_v4 = vpop.eup %5302  ;;  %4134 = vst [vmem:[%s6822_s2 + $0x648] sm:$0xff] %v5301_v1  ;;  %v2206_v5 = vpop.f32.mrb[83].mxu0  ;;  %5328 = vtanh.f32 %v4808_v3 }
 0x190   :  { %v2718_v6 = vpop.f32.mrb[83].mxu1  ;;  %v5305_v7 = vpop.eup %5304  ;;  %4011 = vst [vmem:[%s6822_s2 + $0x270] sm:$0xff] %v5303_v4  ;;  %5330 = vtanh.f32 %v2206_v5 }
 0x191   :  { %v5307_v8 = vpop.eup %5306  ;;  %4139 = vst [vmem:[%s6822_s2 + $0x670] sm:$0xff] %v5305_v7  ;;  %5332 = vtanh.f32 %v2718_v6  ;;  %v4683_v12 = vpop.f32.mrb[84].mxu0 }
 0x192   :  { %v5309_v9 = vpop.eup %5308  ;;  %4009 = vst [vmem:[%s6822_s2 + $0x260] sm:$0xff] %v5307_v8  ;;  %v4811_v13 = vpop.f32.mrb[84].mxu1  ;;  %5334 = vtanh.f32 %v4683_v12 }
 0x193   :  { %v5311_v10 = vpop.eup %5310  ;;  %4137 = vst [vmem:[%s6822_s2 + $0x660] sm:$0xff] %v5309_v9  ;;  %v2219_v15 = vpop.f32.mrb[85].mxu0  ;;  %5336 = vtanh.f32 %v4811_v13 }
 0x194   :  { %v5313_v11 = vpop.eup %5312  ;;  %4012 = vst [vmem:[%s6822_s2 + $0x278] sm:$0xff] %v5311_v10  ;;  %v2731_v16 = vpop.f32.mrb[85].mxu1  ;;  %5338 = vtanh.f32 %v2219_v15 }
 0x195   :  { %v5315_v14 = vpop.eup %5314  ;;  %4140 = vst [vmem:[%s6822_s2 + $0x678] sm:$0xff] %v5313_v11  ;;  %v4684_v18 = vpop.f32.mrb[86].mxu0  ;;  %5340 = vtanh.f32 %v2731_v16 }
 0x196   :  { %v5317_v17 = vpop.eup %5316  ;;  %4010 = vst [vmem:[%s6822_s2 + $0x268] sm:$0xff] %v5315_v14  ;;  %v4812_v19 = vpop.f32.mrb[86].mxu1  ;;  %5342 = vtanh.f32 %v4684_v18 }
 0x197   :  { %v5319_v20 = vpop.eup %5318  ;;  %4138 = vst [vmem:[%s6822_s2 + $0x668] sm:$0xff] %v5317_v17  ;;  %v2222_v21 = vpop.f32.mrb[87].mxu0  ;;  %5344 = vtanh.f32 %v4812_v19 }
 0x198   :  { %v2734_v22 = vpop.f32.mrb[87].mxu1  ;;  %v5321_v23 = vpop.eup %5320  ;;  %4015 = vst [vmem:[%s6822_s2 + $0x290] sm:$0xff] %v5319_v20  ;;  %5346 = vtanh.f32 %v2222_v21 }
 0x199   :  { %v5323_v24 = vpop.eup %5322  ;;  %4143 = vst [vmem:[%s6822_s2 + $0x690] sm:$0xff] %v5321_v23  ;;  %5348 = vtanh.f32 %v2734_v22  ;;  %v4687_v28 = vpop.f32.mrb[88].mxu0 }
 0x19a   :  { %v5325_v25 = vpop.eup %5324  ;;  %4013 = vst [vmem:[%s6822_s2 + $0x280] sm:$0xff] %v5323_v24  ;;  %v4815_v29 = vpop.f32.mrb[88].mxu1  ;;  %5350 = vtanh.f32 %v4687_v28 }
 0x19b   :  { %v5327_v26 = vpop.eup %5326  ;;  %4141 = vst [vmem:[%s6822_s2 + $0x680] sm:$0xff] %v5325_v25  ;;  %v2235_v31 = vpop.f32.mrb[89].mxu0  ;;  %5352 = vtanh.f32 %v4815_v29 }
 0x19c   :  { %v5329_v27 = vpop.eup %5328  ;;  %4016 = vst [vmem:[%s6822_s2 + $0x298] sm:$0xff] %v5327_v26  ;;  %v2747_v32 = vpop.f32.mrb[89].mxu1  ;;  %5354 = vtanh.f32 %v2235_v31 }
 0x19d   :  { %v5331_v30 = vpop.eup %5330  ;;  %4144 = vst [vmem:[%s6822_s2 + $0x698] sm:$0xff] %v5329_v27  ;;  %v4688_v34 = vpop.f32.mrb[90].mxu0  ;;  %5356 = vtanh.f32 %v2747_v32 }
 0x19e   :  { %v5333_v33 = vpop.eup %5332  ;;  %4014 = vst [vmem:[%s6822_s2 + $0x288] sm:$0xff] %v5331_v30  ;;  %v4816_v35 = vpop.f32.mrb[90].mxu1  ;;  %5358 = vtanh.f32 %v4688_v34 }
 0x19f   :  { %v5335_v36 = vpop.eup %5334  ;;  %4142 = vst [vmem:[%s6822_s2 + $0x688] sm:$0xff] %v5333_v33  ;;  %v2238_v37 = vpop.f32.mrb[91].mxu0  ;;  %5360 = vtanh.f32 %v4816_v35 }
 0x1a0   :  { %v2750_v38 = vpop.f32.mrb[91].mxu1  ;;  %v5337_v39 = vpop.eup %5336  ;;  %4019 = vst [vmem:[%s6822_s2 + $0x2b0] sm:$0xff] %v5335_v36  ;;  %5362 = vtanh.f32 %v2238_v37 }
 0x1a1   :  { %v5339_v40 = vpop.eup %5338  ;;  %4147 = vst [vmem:[%s6822_s2 + $0x6b0] sm:$0xff] %v5337_v39  ;;  %5364 = vtanh.f32 %v2750_v38  ;;  %v4691_v44 = vpop.f32.mrb[92].mxu0 }
 0x1a2   :  { %v5341_v41 = vpop.eup %5340  ;;  %4017 = vst [vmem:[%s6822_s2 + $0x2a0] sm:$0xff] %v5339_v40  ;;  %v4819_v45 = vpop.f32.mrb[92].mxu1  ;;  %5366 = vtanh.f32 %v4691_v44 }
 0x1a3   :  { %v5343_v42 = vpop.eup %5342  ;;  %4145 = vst [vmem:[%s6822_s2 + $0x6a0] sm:$0xff] %v5341_v41  ;;  %v2251_v47 = vpop.f32.mrb[93].mxu0  ;;  %5368 = vtanh.f32 %v4819_v45 }
 0x1a4   :  { %v5345_v43 = vpop.eup %5344  ;;  %4020 = vst [vmem:[%s6822_s2 + $0x2b8] sm:$0xff] %v5343_v42  ;;  %v2763_v48 = vpop.f32.mrb[93].mxu1  ;;  %5370 = vtanh.f32 %v2251_v47 }
 0x1a5   :  { %v5347_v46 = vpop.eup %5346  ;;  %4148 = vst [vmem:[%s6822_s2 + $0x6b8] sm:$0xff] %v5345_v43  ;;  %v4692_v50 = vpop.f32.mrb[94].mxu0  ;;  %5372 = vtanh.f32 %v2763_v48 }
 0x1a6   :  { %v5349_v49 = vpop.eup %5348  ;;  %4018 = vst [vmem:[%s6822_s2 + $0x2a8] sm:$0xff] %v5347_v46  ;;  %v4820_v51 = vpop.f32.mrb[94].mxu1  ;;  %5374 = vtanh.f32 %v4692_v50 }
 0x1a7   :  { %v5351_v52 = vpop.eup %5350  ;;  %4146 = vst [vmem:[%s6822_s2 + $0x6a8] sm:$0xff] %v5349_v49  ;;  %v2254_v53 = vpop.f32.mrb[95].mxu0  ;;  %5376 = vtanh.f32 %v4820_v51 }
 0x1a8   :  { %v2766_v54 = vpop.f32.mrb[95].mxu1  ;;  %v5353_v55 = vpop.eup %5352  ;;  %4023 = vst [vmem:[%s6822_s2 + $0x2d0] sm:$0xff] %v5351_v52  ;;  %5378 = vtanh.f32 %v2254_v53 }
 0x1a9   :  { %v5355_v56 = vpop.eup %5354  ;;  %4151 = vst [vmem:[%s6822_s2 + $0x6d0] sm:$0xff] %v5353_v55  ;;  %5380 = vtanh.f32 %v2766_v54  ;;  %v4695_v60 = vpop.f32.mrb[96].mxu0 }
 0x1aa   :  { %v5357_v57 = vpop.eup %5356  ;;  %4021 = vst [vmem:[%s6822_s2 + $0x2c0] sm:$0xff] %v5355_v56  ;;  %v4823_v61 = vpop.f32.mrb[96].mxu1  ;;  %5382 = vtanh.f32 %v4695_v60 }
 0x1ab   :  { %v5359_v58 = vpop.eup %5358  ;;  %4149 = vst [vmem:[%s6822_s2 + $0x6c0] sm:$0xff] %v5357_v57  ;;  %v2267_v63 = vpop.f32.mrb[97].mxu0  ;;  %5384 = vtanh.f32 %v4823_v61 }
 0x1ac   :  { %v5361_v59 = vpop.eup %5360  ;;  %4024 = vst [vmem:[%s6822_s2 + $0x2d8] sm:$0xff] %v5359_v58  ;;  %v2779_v0 = vpop.f32.mrb[97].mxu1  ;;  %5386 = vtanh.f32 %v2267_v63 }
 0x1ad   :  { %v5363_v62 = vpop.eup %5362  ;;  %4152 = vst [vmem:[%s6822_s2 + $0x6d8] sm:$0xff] %v5361_v59  ;;  %v4696_v2 = vpop.f32.mrb[98].mxu0  ;;  %5388 = vtanh.f32 %v2779_v0 }
 0x1ae   :  { %v5365_v1 = vpop.eup %5364  ;;  %4022 = vst [vmem:[%s6822_s2 + $0x2c8] sm:$0xff] %v5363_v62  ;;  %v4824_v3 = vpop.f32.mrb[98].mxu1  ;;  %5390 = vtanh.f32 %v4696_v2 }
 0x1af   :  { %v5367_v4 = vpop.eup %5366  ;;  %4150 = vst [vmem:[%s6822_s2 + $0x6c8] sm:$0xff] %v5365_v1  ;;  %v2270_v5 = vpop.f32.mrb[99].mxu0  ;;  %5392 = vtanh.f32 %v4824_v3 }
 0x1b0   :  { %v2782_v6 = vpop.f32.mrb[99].mxu1  ;;  %v5369_v7 = vpop.eup %5368  ;;  %4027 = vst [vmem:[%s6822_s2 + $0x2f0] sm:$0xff] %v5367_v4  ;;  %5394 = vtanh.f32 %v2270_v5 }
 0x1b1   :  { %v5371_v8 = vpop.eup %5370  ;;  %4155 = vst [vmem:[%s6822_s2 + $0x6f0] sm:$0xff] %v5369_v7  ;;  %5396 = vtanh.f32 %v2782_v6  ;;  %v4699_v12 = vpop.f32.mrb[100].mxu0 }
 0x1b2   :  { %v5373_v9 = vpop.eup %5372  ;;  %4025 = vst [vmem:[%s6822_s2 + $0x2e0] sm:$0xff] %v5371_v8  ;;  %v4827_v13 = vpop.f32.mrb[100].mxu1  ;;  %5398 = vtanh.f32 %v4699_v12 }
 0x1b3   :  { %v5375_v10 = vpop.eup %5374  ;;  %4153 = vst [vmem:[%s6822_s2 + $0x6e0] sm:$0xff] %v5373_v9  ;;  %v2283_v15 = vpop.f32.mrb[101].mxu0  ;;  %5400 = vtanh.f32 %v4827_v13 }
 0x1b4   :  { %v5377_v11 = vpop.eup %5376  ;;  %4028 = vst [vmem:[%s6822_s2 + $0x2f8] sm:$0xff] %v5375_v10  ;;  %v2795_v16 = vpop.f32.mrb[101].mxu1  ;;  %5402 = vtanh.f32 %v2283_v15 }
 0x1b5   :  { %v5379_v14 = vpop.eup %5378  ;;  %4156 = vst [vmem:[%s6822_s2 + $0x6f8] sm:$0xff] %v5377_v11  ;;  %v4700_v18 = vpop.f32.mrb[102].mxu0  ;;  %5404 = vtanh.f32 %v2795_v16 }
 0x1b6   :  { %v5381_v17 = vpop.eup %5380  ;;  %4026 = vst [vmem:[%s6822_s2 + $0x2e8] sm:$0xff] %v5379_v14  ;;  %v4828_v19 = vpop.f32.mrb[102].mxu1  ;;  %5406 = vtanh.f32 %v4700_v18 }
 0x1b7   :  { %v5383_v20 = vpop.eup %5382  ;;  %4154 = vst [vmem:[%s6822_s2 + $0x6e8] sm:$0xff] %v5381_v17  ;;  %v2286_v21 = vpop.f32.mrb[103].mxu0  ;;  %5408 = vtanh.f32 %v4828_v19 }
 0x1b8   :  { %v2798_v22 = vpop.f32.mrb[103].mxu1  ;;  %v5385_v23 = vpop.eup %5384  ;;  %4031 = vst [vmem:[%s6822_s2 + $0x310] sm:$0xff] %v5383_v20  ;;  %5410 = vtanh.f32 %v2286_v21 }
 0x1b9   :  { %v5387_v24 = vpop.eup %5386  ;;  %4159 = vst [vmem:[%s6822_s2 + $0x710] sm:$0xff] %v5385_v23  ;;  %5412 = vtanh.f32 %v2798_v22  ;;  %v4703_v28 = vpop.f32.mrb[104].mxu0 }
 0x1ba   :  { %v5389_v25 = vpop.eup %5388  ;;  %4029 = vst [vmem:[%s6822_s2 + $0x300] sm:$0xff] %v5387_v24  ;;  %v4831_v29 = vpop.f32.mrb[104].mxu1  ;;  %5414 = vtanh.f32 %v4703_v28 }
 0x1bb   :  { %v5391_v26 = vpop.eup %5390  ;;  %4157 = vst [vmem:[%s6822_s2 + $0x700] sm:$0xff] %v5389_v25  ;;  %v2299_v31 = vpop.f32.mrb[105].mxu0  ;;  %5416 = vtanh.f32 %v4831_v29 }
 0x1bc   :  { %v5393_v27 = vpop.eup %5392  ;;  %4032 = vst [vmem:[%s6822_s2 + $0x318] sm:$0xff] %v5391_v26  ;;  %v2811_v32 = vpop.f32.mrb[105].mxu1  ;;  %5418 = vtanh.f32 %v2299_v31 }
 0x1bd   :  { %v5395_v30 = vpop.eup %5394  ;;  %4160 = vst [vmem:[%s6822_s2 + $0x718] sm:$0xff] %v5393_v27  ;;  %v4704_v34 = vpop.f32.mrb[106].mxu0  ;;  %5420 = vtanh.f32 %v2811_v32 }
 0x1be   :  { %v5397_v33 = vpop.eup %5396  ;;  %4030 = vst [vmem:[%s6822_s2 + $0x308] sm:$0xff] %v5395_v30  ;;  %v4832_v35 = vpop.f32.mrb[106].mxu1  ;;  %5422 = vtanh.f32 %v4704_v34 }
 0x1bf   :  { %v5399_v36 = vpop.eup %5398  ;;  %4158 = vst [vmem:[%s6822_s2 + $0x708] sm:$0xff] %v5397_v33  ;;  %v2302_v37 = vpop.f32.mrb[107].mxu0  ;;  %5424 = vtanh.f32 %v4832_v35 }
 0x1c0   :  { %v2814_v38 = vpop.f32.mrb[107].mxu1  ;;  %v5401_v39 = vpop.eup %5400  ;;  %4035 = vst [vmem:[%s6822_s2 + $0x330] sm:$0xff] %v5399_v36  ;;  %5426 = vtanh.f32 %v2302_v37 }
 0x1c1   :  { %v5403_v40 = vpop.eup %5402  ;;  %4163 = vst [vmem:[%s6822_s2 + $0x730] sm:$0xff] %v5401_v39  ;;  %5428 = vtanh.f32 %v2814_v38  ;;  %v4707_v44 = vpop.f32.mrb[108].mxu0 }
 0x1c2   :  { %v5405_v41 = vpop.eup %5404  ;;  %4033 = vst [vmem:[%s6822_s2 + $0x320] sm:$0xff] %v5403_v40  ;;  %v4835_v45 = vpop.f32.mrb[108].mxu1  ;;  %5430 = vtanh.f32 %v4707_v44 }
 0x1c3   :  { %v5407_v42 = vpop.eup %5406  ;;  %4161 = vst [vmem:[%s6822_s2 + $0x720] sm:$0xff] %v5405_v41  ;;  %v2315_v47 = vpop.f32.mrb[109].mxu0  ;;  %5432 = vtanh.f32 %v4835_v45 }
 0x1c4   :  { %v5409_v43 = vpop.eup %5408  ;;  %4036 = vst [vmem:[%s6822_s2 + $0x338] sm:$0xff] %v5407_v42  ;;  %v2827_v48 = vpop.f32.mrb[109].mxu1  ;;  %5434 = vtanh.f32 %v2315_v47 }
 0x1c5   :  { %v5411_v46 = vpop.eup %5410  ;;  %4164 = vst [vmem:[%s6822_s2 + $0x738] sm:$0xff] %v5409_v43  ;;  %v4708_v50 = vpop.f32.mrb[110].mxu0  ;;  %5436 = vtanh.f32 %v2827_v48 }
 0x1c6   :  { %v5413_v49 = vpop.eup %5412  ;;  %4034 = vst [vmem:[%s6822_s2 + $0x328] sm:$0xff] %v5411_v46  ;;  %v4836_v51 = vpop.f32.mrb[110].mxu1  ;;  %5438 = vtanh.f32 %v4708_v50 }
 0x1c7   :  { %v5415_v52 = vpop.eup %5414  ;;  %4162 = vst [vmem:[%s6822_s2 + $0x728] sm:$0xff] %v5413_v49  ;;  %v2318_v53 = vpop.f32.mrb[111].mxu0  ;;  %5440 = vtanh.f32 %v4836_v51 }
 0x1c8   :  { %v2830_v54 = vpop.f32.mrb[111].mxu1  ;;  %v5417_v55 = vpop.eup %5416  ;;  %4039 = vst [vmem:[%s6822_s2 + $0x350] sm:$0xff] %v5415_v52  ;;  %5442 = vtanh.f32 %v2318_v53 }
 0x1c9   :  { %v5419_v56 = vpop.eup %5418  ;;  %4167 = vst [vmem:[%s6822_s2 + $0x750] sm:$0xff] %v5417_v55  ;;  %5444 = vtanh.f32 %v2830_v54  ;;  %v4711_v60 = vpop.f32.mrb[112].mxu0 }
 0x1ca   :  { %v5421_v57 = vpop.eup %5420  ;;  %4037 = vst [vmem:[%s6822_s2 + $0x340] sm:$0xff] %v5419_v56  ;;  %v4839_v61 = vpop.f32.mrb[112].mxu1  ;;  %5446 = vtanh.f32 %v4711_v60 }
 0x1cb   :  { %v5423_v58 = vpop.eup %5422  ;;  %4165 = vst [vmem:[%s6822_s2 + $0x740] sm:$0xff] %v5421_v57  ;;  %v2331_v63 = vpop.f32.mrb[113].mxu0  ;;  %5448 = vtanh.f32 %v4839_v61 }
 0x1cc   :  { %v5425_v59 = vpop.eup %5424  ;;  %4040 = vst [vmem:[%s6822_s2 + $0x358] sm:$0xff] %v5423_v58  ;;  %v2843_v0 = vpop.f32.mrb[113].mxu1  ;;  %5450 = vtanh.f32 %v2331_v63 }
 0x1cd   :  { %v5427_v62 = vpop.eup %5426  ;;  %4168 = vst [vmem:[%s6822_s2 + $0x758] sm:$0xff] %v5425_v59  ;;  %v4712_v2 = vpop.f32.mrb[114].mxu0  ;;  %5452 = vtanh.f32 %v2843_v0 }
 0x1ce   :  { %v5429_v1 = vpop.eup %5428  ;;  %4038 = vst [vmem:[%s6822_s2 + $0x348] sm:$0xff] %v5427_v62  ;;  %v4840_v3 = vpop.f32.mrb[114].mxu1  ;;  %5454 = vtanh.f32 %v4712_v2 }
 0x1cf   :  { %v5431_v4 = vpop.eup %5430  ;;  %4166 = vst [vmem:[%s6822_s2 + $0x748] sm:$0xff] %v5429_v1  ;;  %v2334_v5 = vpop.f32.mrb[115].mxu0  ;;  %5456 = vtanh.f32 %v4840_v3 }
 0x1d0   :  { %v2846_v6 = vpop.f32.mrb[115].mxu1  ;;  %v5433_v7 = vpop.eup %5432  ;;  %4043 = vst [vmem:[%s6822_s2 + $0x370] sm:$0xff] %v5431_v4  ;;  %5458 = vtanh.f32 %v2334_v5 }
 0x1d1   :  { %v5435_v8 = vpop.eup %5434  ;;  %4171 = vst [vmem:[%s6822_s2 + $0x770] sm:$0xff] %v5433_v7  ;;  %5460 = vtanh.f32 %v2846_v6  ;;  %v4715_v12 = vpop.f32.mrb[116].mxu0 }
 0x1d2   :  { %v5437_v9 = vpop.eup %5436  ;;  %4041 = vst [vmem:[%s6822_s2 + $0x360] sm:$0xff] %v5435_v8  ;;  %v4843_v13 = vpop.f32.mrb[116].mxu1  ;;  %5462 = vtanh.f32 %v4715_v12 }
 0x1d3   :  { %v5439_v10 = vpop.eup %5438  ;;  %4169 = vst [vmem:[%s6822_s2 + $0x760] sm:$0xff] %v5437_v9  ;;  %v2347_v15 = vpop.f32.mrb[117].mxu0  ;;  %5464 = vtanh.f32 %v4843_v13 }
 0x1d4   :  { %v5441_v11 = vpop.eup %5440  ;;  %4044 = vst [vmem:[%s6822_s2 + $0x378] sm:$0xff] %v5439_v10  ;;  %v2859_v16 = vpop.f32.mrb[117].mxu1  ;;  %5466 = vtanh.f32 %v2347_v15 }
 0x1d5   :  { %v5443_v14 = vpop.eup %5442  ;;  %4172 = vst [vmem:[%s6822_s2 + $0x778] sm:$0xff] %v5441_v11  ;;  %v4716_v18 = vpop.f32.mrb[118].mxu0  ;;  %5468 = vtanh.f32 %v2859_v16 }
 0x1d6   :  { %v5445_v17 = vpop.eup %5444  ;;  %4042 = vst [vmem:[%s6822_s2 + $0x368] sm:$0xff] %v5443_v14  ;;  %v4844_v19 = vpop.f32.mrb[118].mxu1  ;;  %5470 = vtanh.f32 %v4716_v18 }
 0x1d7   :  { %v5447_v20 = vpop.eup %5446  ;;  %4170 = vst [vmem:[%s6822_s2 + $0x768] sm:$0xff] %v5445_v17  ;;  %v2350_v21 = vpop.f32.mrb[119].mxu0  ;;  %5472 = vtanh.f32 %v4844_v19 }
 0x1d8   :  { %v2862_v22 = vpop.f32.mrb[119].mxu1  ;;  %v5449_v23 = vpop.eup %5448  ;;  %4047 = vst [vmem:[%s6822_s2 + $0x390] sm:$0xff] %v5447_v20  ;;  %5474 = vtanh.f32 %v2350_v21 }
 0x1d9   :  { %v5451_v24 = vpop.eup %5450  ;;  %4175 = vst [vmem:[%s6822_s2 + $0x790] sm:$0xff] %v5449_v23  ;;  %5476 = vtanh.f32 %v2862_v22  ;;  %v4719_v28 = vpop.f32.mrb[120].mxu0 }
 0x1da   :  { %v5453_v25 = vpop.eup %5452  ;;  %4045 = vst [vmem:[%s6822_s2 + $0x380] sm:$0xff] %v5451_v24  ;;  %v4847_v29 = vpop.f32.mrb[120].mxu1  ;;  %5478 = vtanh.f32 %v4719_v28 }
 0x1db   :  { %v5455_v26 = vpop.eup %5454  ;;  %4173 = vst [vmem:[%s6822_s2 + $0x780] sm:$0xff] %v5453_v25  ;;  %v2363_v31 = vpop.f32.mrb[121].mxu0  ;;  %5480 = vtanh.f32 %v4847_v29 }
 0x1dc   :  { %v5457_v27 = vpop.eup %5456  ;;  %4048 = vst [vmem:[%s6822_s2 + $0x398] sm:$0xff] %v5455_v26  ;;  %v2875_v32 = vpop.f32.mrb[121].mxu1  ;;  %5482 = vtanh.f32 %v2363_v31 }
 0x1dd   :  { %v5459_v30 = vpop.eup %5458  ;;  %4176 = vst [vmem:[%s6822_s2 + $0x798] sm:$0xff] %v5457_v27  ;;  %v4720_v34 = vpop.f32.mrb[122].mxu0  ;;  %5484 = vtanh.f32 %v2875_v32 }
 0x1de   :  { %v5461_v33 = vpop.eup %5460  ;;  %4046 = vst [vmem:[%s6822_s2 + $0x388] sm:$0xff] %v5459_v30  ;;  %v4848_v35 = vpop.f32.mrb[122].mxu1  ;;  %5486 = vtanh.f32 %v4720_v34 }
 0x1df   :  { %v5463_v36 = vpop.eup %5462  ;;  %4174 = vst [vmem:[%s6822_s2 + $0x788] sm:$0xff] %v5461_v33  ;;  %v2366_v37 = vpop.f32.mrb[123].mxu0  ;;  %5488 = vtanh.f32 %v4848_v35 }
 0x1e0   :  { %v2878_v38 = vpop.f32.mrb[123].mxu1  ;;  %v5465_v39 = vpop.eup %5464  ;;  %4051 = vst [vmem:[%s6822_s2 + $0x3b0] sm:$0xff] %v5463_v36  ;;  %5490 = vtanh.f32 %v2366_v37 }
 0x1e1   :  { %v5467_v40 = vpop.eup %5466  ;;  %4179 = vst [vmem:[%s6822_s2 + $0x7b0] sm:$0xff] %v5465_v39  ;;  %5492 = vtanh.f32 %v2878_v38  ;;  %v4723_v44 = vpop.f32.mrb[124].mxu0 }
 0x1e2   :  { %v5469_v41 = vpop.eup %5468  ;;  %4049 = vst [vmem:[%s6822_s2 + $0x3a0] sm:$0xff] %v5467_v40  ;;  %v4851_v45 = vpop.f32.mrb[124].mxu1  ;;  %5494 = vtanh.f32 %v4723_v44 }
 0x1e3   :  { %v5471_v42 = vpop.eup %5470  ;;  %4177 = vst [vmem:[%s6822_s2 + $0x7a0] sm:$0xff] %v5469_v41  ;;  %v2379_v47 = vpop.f32.mrb[125].mxu0  ;;  %5496 = vtanh.f32 %v4851_v45 }
 0x1e4   :  { %v5473_v43 = vpop.eup %5472  ;;  %4052 = vst [vmem:[%s6822_s2 + $0x3b8] sm:$0xff] %v5471_v42  ;;  %v2891_v48 = vpop.f32.mrb[125].mxu1  ;;  %5498 = vtanh.f32 %v2379_v47 }
 0x1e5   :  { %v5475_v46 = vpop.eup %5474  ;;  %4180 = vst [vmem:[%s6822_s2 + $0x7b8] sm:$0xff] %v5473_v43  ;;  %v4724_v50 = vpop.f32.mrb[126].mxu0  ;;  %5500 = vtanh.f32 %v2891_v48 }
 0x1e6   :  { %v5477_v49 = vpop.eup %5476  ;;  %4050 = vst [vmem:[%s6822_s2 + $0x3a8] sm:$0xff] %v5475_v46  ;;  %v4852_v51 = vpop.f32.mrb[126].mxu1  ;;  %5502 = vtanh.f32 %v4724_v50 }
 0x1e7   :  { %v5479_v52 = vpop.eup %5478  ;;  %4178 = vst [vmem:[%s6822_s2 + $0x7a8] sm:$0xff] %v5477_v49  ;;  %v2382_v53 = vpop.f32.mrb[127].mxu0  ;;  %5504 = vtanh.f32 %v4852_v51 }
 0x1e8   :  { %v2894_v54 = vpop.f32.mrb[127].mxu1  ;;  %v5481_v55 = vpop.eup %5480  ;;  %4055 = vst [vmem:[%s6822_s2 + $0x3d0] sm:$0xff] %v5479_v52  ;;  %5506 = vtanh.f32 %v2382_v53 }
 0x1e9   :  { %v5483_v56 = vpop.eup %5482  ;;  %4183 = vst [vmem:[%s6822_s2 + $0x7d0] sm:$0xff] %v5481_v55  ;;  %5508 = vtanh.f32 %v2894_v54 }
 0x1ea   :  { %v5485_v57 = vpop.eup %5484  ;;  %4053 = vst [vmem:[%s6822_s2 + $0x3c0] sm:$0xff] %v5483_v56 }
 0x1eb   :  { %v5487_v58 = vpop.eup %5486  ;;  %4181 = vst [vmem:[%s6822_s2 + $0x7c0] sm:$0xff] %v5485_v57 }
 0x1ec   :  { %v5489_v59 = vpop.eup %5488  ;;  %4056 = vst [vmem:[%s6822_s2 + $0x3d8] sm:$0xff] %v5487_v58 }
 0x1ed   :  { %v5491_v60 = vpop.eup %5490  ;;  %4184 = vst [vmem:[%s6822_s2 + $0x7d8] sm:$0xff] %v5489_v59 }
 0x1ee   :  { %v5493_v61 = vpop.eup %5492  ;;  %4054 = vst [vmem:[%s6822_s2 + $0x3c8] sm:$0xff] %v5491_v60 }
 0x1ef   :  { %v5495_v62 = vpop.eup %5494  ;;  %4182 = vst [vmem:[%s6822_s2 + $0x7c8] sm:$0xff] %v5493_v61 }
 0x1f0   :  { %v5497_v63 = vpop.eup %5496  ;;  %4059 = vst [vmem:[%s6822_s2 + $0x3f0] sm:$0xff] %v5495_v62 }
 0x1f1   :  { %v5499_v0 = vpop.eup %5498  ;;  %4187 = vst [vmem:[%s6822_s2 + $0x7f0] sm:$0xff] %v5497_v63 }
 0x1f2   :  { %v5501_v1 = vpop.eup %5500  ;;  %4057 = vst [vmem:[%s6822_s2 + $0x3e0] sm:$0xff] %v5499_v0 }
 0x1f3   :  { %v5503_v2 = vpop.eup %5502  ;;  %4185 = vst [vmem:[%s6822_s2 + $0x7e0] sm:$0xff] %v5501_v1 }
 0x1f4   :  { %v5505_v3 = vpop.eup %5504  ;;  %4060 = vst [vmem:[%s6822_s2 + $0x3f8] sm:$0xff] %v5503_v2 }
 0x1f5   :  { %v5507_v4 = vpop.eup %5506  ;;  %4188 = vst [vmem:[%s6822_s2 + $0x7f8] sm:$0xff] %v5505_v3 }
 0x1f6   :  { %v5509_v5 = vpop.eup %5508  ;;  %4058 = vst [vmem:[%s6822_s2 + $0x3e8] sm:$0xff] %v5507_v4 }
 0x1f7   :  { %4186 = vst [vmem:[%s6822_s2 + $0x7e8] sm:$0xff] %v5509_v5 }

</bundles_post_ra>
